<compile_context>
chip_gen: v6e
topology: v6e:2x2x1
jax: 0.10.0
libtpu: 0.0.40
codegen_flags: <defaults>
</compile_context>

<pallas_src>
import functools
import math
import numpy as np
import jax
import jax.numpy as jnp
from jax import lax
from jax.experimental import pallas as pl
from jax.experimental.pallas import tpu as pltpu

# ----------------------------- model sizes ---------------------------------
B_CLIPS = 4          # clips in the test batch
T_SEQ = 16           # number of frames (padded max sequence length)
D_IN = 256           # fused feature size (module default 4608; small here)
D_RED = 128          # reduced_size
H = 32               # hidden_size
TAU = 12             # _sitp tau
BETA = 0.5           # _sitp beta
SQRT3 = math.sqrt(3.0)
SCALE_K = 1.0        # scale={'K': 1}
M_K = 0.0            # m={'K': 0}
OUT_LANES = 128      # lane-dense output tile width


# ------------------------------ Pallas kernel -------------------------------
def _bvqa_kernel(b_blk, lens_ref, feats_ref, wf_ref, bf_ref, whh_ref,
                 bhhn_ref, wreg_ref, breg_ref, out_ref):
    T = feats_ref.shape[0] // b_blk
    Hh = whh_ref.shape[0]
    blk = pl.program_id(0)
    padw = TAU - 1
    wq = T + 2 * padw

    # ---- fused (dim-reduction + GRU input projection), whole block at once --
    # gi3[t*b_blk + b] = feats[b, t] @ (W_dr @ W_ih) + folded bias (bf16 in,
    # f32 accumulation).  Gate width is zero-padded to 128 lanes.
    gi3 = jnp.dot(feats_ref[...], wf_ref[...],
                  preferred_element_type=jnp.float32) + bf_ref[...]     # (b_blk*T, 128)

    whh = whh_ref[...]           # (H, 128) hoisted, zero-padded past 3H
    bhhn = bhhn_ref[...]         # (1, H)   n-gate hidden bias (inside r*(...))
    wreg = wreg_ref[...]         # (1, H)   regression weight row
    breg = breg_ref[0]           # scalar   regression bias (SMEM)

    # per-clip lengths of this block as a (b_blk, 1) int column
    row_b = lax.broadcasted_iota(jnp.int32, (b_blk, 1), 0)
    L = jnp.zeros((b_blk, 1), jnp.int32)
    for b in range(b_blk):
        L = jnp.where(row_b == b, lens_ref[blk * b_blk + b], L)

    # ---- GRU recurrence (PyTorch gate order r,z,n; h0=0), unrolled ----------
    # All b_blk clips are advanced together (M=b_blk matmuls).  q[t] is
    # computed per step and scattered into the padded row Q so the SITP below
    # is pure static lane-slices (no (T,H) carry, no (T,T) tensors).
    colw = lax.broadcasted_iota(jnp.int32, (b_blk, wq), 1)
    Q = jnp.zeros((b_blk, wq), jnp.float32)
    h = jnp.zeros((b_blk, Hh), jnp.float32)
    for t in range(T):
        g = gi3[t * b_blk:(t + 1) * b_blk, :]                           # (b_blk, 128)
        hh = jnp.dot(h, whh, preferred_element_type=jnp.float32)        # (b_blk, 128)
        r = jax.nn.sigmoid(g[:, 0:Hh] + hh[:, 0:Hh])
        z = jax.nn.sigmoid(g[:, Hh:2 * Hh] + hh[:, Hh:2 * Hh])
        n = jnp.tanh(g[:, 2 * Hh:3 * Hh] + r * (hh[:, 2 * Hh:3 * Hh] + bhhn))
        h = (1.0 - z) * n + z * h
        q_t = jnp.sum(h * wreg, axis=1, keepdims=True) + breg           # (b_blk, 1)
        Q = jnp.where(colw == padw + t, q_t, Q)

    # ---- _sitp (subjectively-inspired temporal pooling), windowed -----------
    t_col = colw - padw
    in_seq = (t_col >= 0) & (t_col < L)          # valid frame positions
    eqQ = jnp.exp(-Q)                            # transcendentals on (b_blk, wq) only
    ql = jnp.where(in_seq, Q, jnp.inf)           # +inf outside the sequence
    eqp = jnp.where(in_seq, eqQ, 0.0)
    wqp = jnp.where(in_seq, Q * eqQ, 0.0)

    l_min = jnp.full((b_blk, T), jnp.inf, jnp.float32)
    m_num = jnp.zeros((b_blk, T), jnp.float32)
    n_den = jnp.zeros((b_blk, T), jnp.float32)
    for s in range(TAU):
        l_min = jnp.minimum(l_min, ql[:, padw - s:padw - s + T])   # min q[j-s..j]
        m_num = m_num + wqp[:, padw + s:padw + s + T]              # sum (q e^-q)[j..j+s]
        n_den = n_den + eqp[:, padw + s:padw + s + T]              # sum (e^-q)[j..j+s]

    col_t = lax.broadcasted_iota(jnp.int32, (b_blk, T), 1)
    valid = col_t < L
    m_row = jnp.where(valid, m_num / jnp.where(n_den > 0.0, n_den, 1.0), 0.0)
    l_row = jnp.where(valid, l_min, 0.0)         # mask before combining: no inf survives
    q_hat = BETA * m_row + (1.0 - BETA) * l_row
    Lf = jnp.maximum(L, 1).astype(jnp.float32)   # L=0 guard (empty clip -> score 0)
    score = jnp.sum(q_hat, axis=1, keepdims=True) / Lf               # (b_blk, 1)

    # ---- bound + nlm + lm['K'] ----------------------------------------------
    relative = jax.nn.sigmoid(score)
    mapped = jax.nn.sigmoid(2.0 * SQRT3 * relative - SQRT3)
    aligned = SCALE_K * mapped + M_K

    # merged lane-dense output tile: sublane b = clip b of this block,
    # lane 0/1 = relative/mapped, lanes >= 2 = aligned.
    lane = lax.broadcasted_iota(jnp.int32, (b_blk, OUT_LANES), 1)
    row = jnp.where(lane == 0, relative, jnp.where(lane == 1, mapped, aligned))
    out_sub = out_ref.shape[0]
    if out_sub > b_blk:
        row = jnp.concatenate(
            [row, jnp.zeros((out_sub - b_blk, OUT_LANES), jnp.float32)], axis=0)
    out_ref[...] = row


# ------------------------------ wrapper --------------------------------------
def bvqa_forward(fusion_features, input_lengths, params, *,
                 clips_per_block=None, feats_bf16=True):
    """fusion_features: (B, T, D_IN) f32, input_lengths: (B,) int32."""
    B, T, Din = fusion_features.shape
    hidden = params["w_hh"].shape[0]
    gw = pl.cdiv(3 * hidden, 128) * 128           # gate width padded to 128 lanes

    if clips_per_block is None:
        # two blocks by default: one per v7x TensorCore; single-TC chips still
        # get an M=B/2 batched recurrence with only 2 grid steps.
        clips_per_block = max(1, pl.cdiv(B, 2))
    b_blk = int(clips_per_block)
    nblk = pl.cdiv(B, b_blk)
    bp = nblk * b_blk

    hp = lax.Precision.HIGHEST
    # Fuse the dim-reduction Linear into the GRU input projection (once,
    # wrapper side).  Fold the r/z parts of the GRU hidden bias; the n-gate
    # hidden bias must stay inside the r*(...) term.
    w_fused = jnp.dot(params["w_dr"], params["w_ih"], precision=hp)             # (D_IN, 3H)
    b_fused = jnp.dot(params["b_dr"], params["w_ih"], precision=hp) + params["b_ih"]
    b_fused = b_fused.at[:, :2 * hidden].add(params["b_hh"][:, :2 * hidden])
    b_hh_n = params["b_hh"][:, 2 * hidden:]                                     # (1, H)
    w_reg_row = params["w_reg"].T                                               # (1, H)

    # zero-pad gate width 3H -> gw (lane-dense MXU results / stores)
    w_fused_p = jnp.zeros((Din, gw), jnp.float32).at[:, :3 * hidden].set(w_fused)
    b_fused_p = jnp.zeros((1, gw), jnp.float32).at[:, :3 * hidden].set(b_fused)
    w_hh_p = jnp.zeros((hidden, gw), jnp.float32).at[:, :3 * hidden].set(params["w_hh"])

    feat_dtype = jnp.bfloat16 if feats_bf16 else jnp.float32
    w_fused_p = w_fused_p.astype(feat_dtype)
    feats = fusion_features.astype(feat_dtype)
    lens = input_lengths.astype(jnp.int32)
    if bp != B:                                    # pad batch to a block multiple
        feats = jnp.concatenate(
            [feats, jnp.zeros((bp - B, T, Din), feat_dtype)], axis=0)
        lens = jnp.concatenate([lens, jnp.ones((bp - B,), jnp.int32)], axis=0)

    # time-major inside each block: row (t*b_blk + b) = clip b at frame t, so
    # the recurrence reads contiguous (b_blk, gw) slabs of gi3.
    feats_blk = feats.reshape(nblk, b_blk, T, Din).transpose(0, 2, 1, 3)
    feats_blk = feats_blk.reshape(nblk, T * b_blk, Din)

    breg = params["b_reg"].reshape(1).astype(jnp.float32)          # SMEM scalar
    out_sub = max(8, pl.cdiv(b_blk, 8) * 8)

    grid_spec = pltpu.PrefetchScalarGridSpec(
        num_scalar_prefetch=1,                     # per-clip lengths land in SMEM
        grid=(nblk,),
        in_specs=[
            pl.BlockSpec((pl.Squeezed(), T * b_blk, Din),
                         lambda blk, lens_ref: (blk, 0, 0)),           # feats block
            pl.BlockSpec((Din, gw), lambda blk, lens_ref: (0, 0)),     # W_fused
            pl.BlockSpec((1, gw), lambda blk, lens_ref: (0, 0)),       # b_fused
            pl.BlockSpec((hidden, gw), lambda blk, lens_ref: (0, 0)),  # W_hh
            pl.BlockSpec((1, hidden), lambda blk, lens_ref: (0, 0)),   # b_hh_n
            pl.BlockSpec((1, hidden), lambda blk, lens_ref: (0, 0)),   # w_reg row
            pl.BlockSpec(memory_space=pltpu.MemorySpace.SMEM),         # b_reg scalar
        ],
        out_specs=pl.BlockSpec((pl.Squeezed(), out_sub, OUT_LANES),
                               lambda blk, lens_ref: (blk, 0, 0)),
    )

    fn = pl.pallas_call(
        functools.partial(_bvqa_kernel, b_blk),
        out_shape=jax.ShapeDtypeStruct((nblk, out_sub, OUT_LANES), jnp.float32),
        grid_spec=grid_spec,
        compiler_params=pltpu.CompilerParams(
            dimension_semantics=("parallel",)),    # blocks shard across TensorCores
    )
    out = fn(lens, feats_blk, w_fused_p, b_fused_p, w_hh_p, b_hh_n,
             w_reg_row, breg)
    vals = out[:, :b_blk, :3].reshape(bp, 3)[:B]
    return vals[:, 0], vals[:, 1], vals[:, 2]      # relative, mapped, aligned


# --------------------------- pure numpy reference ----------------------------
def _sitp_ref(q, tau=TAU, beta=BETA):
    L = q.shape[0]
    l = np.array([q[max(0, t - tau + 1):t + 1].min() for t in range(L)])
    w = q * np.exp(-q)
    e = np.exp(-q)
    m_num = np.array([w[t:t + tau].sum() for t in range(L)])
    n_den = np.array([e[t:t + tau].sum() for t in range(L)])
    m = m_num / n_den
    return (beta * m + (1.0 - beta) * l).mean()


def reference_forward_clip(feats, L, p):
    feats = np.asarray(feats, np.float64)
    T = feats.shape[0]
    w_dr, b_dr = np.asarray(p["w_dr"], np.float64), np.asarray(p["b_dr"], np.float64)
    w_ih, b_ih = np.asarray(p["w_ih"], np.float64), np.asarray(p["b_ih"], np.float64)
    w_hh, b_hh = np.asarray(p["w_hh"], np.float64), np.asarray(p["b_hh"], np.float64)
    w_reg, b_reg = np.asarray(p["w_reg"], np.float64), np.asarray(p["b_reg"], np.float64)

    x = feats @ w_dr + b_dr
    gi = x @ w_ih + b_ih
    h = np.zeros((1, H))
    hs = []
    for t in range(T):
        g = gi[t:t + 1]
        hh = h @ w_hh + b_hh
        r = 1.0 / (1.0 + np.exp(-(g[:, :H] + hh[:, :H])))
        z = 1.0 / (1.0 + np.exp(-(g[:, H:2 * H] + hh[:, H:2 * H])))
        n = np.tanh(g[:, 2 * H:] + r * hh[:, 2 * H:])
        h = (1.0 - z) * n + z * h
        hs.append(h[0])
    q = (np.stack(hs) @ w_reg + b_reg)[:, 0]
    score = _sitp_ref(q[:L])
    relative = 1.0 / (1.0 + np.exp(-score))
    mapped = 1.0 / (1.0 + np.exp(-(2.0 * SQRT3 * relative - SQRT3)))
    aligned = SCALE_K * mapped + M_K
    return relative, mapped, aligned


# --------------------------------- main ---------------------------------------
if __name__ == "__main__":
    key = jax.random.PRNGKey(0)
    ks = jax.random.split(key, 9)

    # deterministic synthetic parameters (module __init__ shapes, small config;
    # GRU weights kept in (in, 3H) column order [r|z|n], matching the reference)
    params = {
        "w_dr": jax.random.normal(ks[0], (D_IN, D_RED), jnp.float32) * 0.05,
        "b_dr": jax.random.normal(ks[1], (1, D_RED), jnp.float32) * 0.05,
        "w_ih": jax.random.normal(ks[2], (D_RED, 3 * H), jnp.float32) * 0.05,
        "b_ih": jax.random.normal(ks[3], (1, 3 * H), jnp.float32) * 0.05,
        "w_hh": jax.random.normal(ks[4], (H, 3 * H), jnp.float32) * 0.05,
        "b_hh": jax.random.normal(ks[5], (1, 3 * H), jnp.float32) * 0.05,
        "w_reg": jax.random.normal(ks[6], (H, 1), jnp.float32) * 0.1,
        "b_reg": jnp.zeros((1, 1), jnp.float32),
    }

    # synthetic fused (spatial ++ motion) per-frame features for B clips
    feats = jax.random.normal(ks[7], (B_CLIPS, T_SEQ, D_IN), jnp.float32)
    lengths = jnp.array([13, 16, 7, 10], dtype=jnp.int32)    # per-clip lengths

    rel, mapped, aligned = bvqa_forward(feats, lengths, params)
    jax.block_until_ready((rel, mapped, aligned))

    # verify against the f64 reference (tolerance accounts for the bf16
    # feats/W_fused cast on the dominant matmul)
    feats_np = np.asarray(feats)
    for i in range(B_CLIPS):
        r_ref, m_ref, a_ref = reference_forward_clip(feats_np[i], int(lengths[i]), params)
        np.testing.assert_allclose(float(rel[i]), r_ref, atol=5e-3)
        np.testing.assert_allclose(float(mapped[i]), m_ref, atol=5e-3)
        np.testing.assert_allclose(float(aligned[i]), a_ref, atol=5e-3)

    print("KERNEL_OK")
</pallas_src>

<mosaic_0001>
module attributes {stable_mosaic.version = 11 : i64} {
  func.func @_bvqa_kernel(%arg0: i32, %arg1: memref<4xi32, #tpu.memory_space<smem>>, %arg2: memref<1x32x256xbf16, #tpu.memory_space<vmem>>, %arg3: memref<256x128xbf16, #tpu.memory_space<vmem>>, %arg4: memref<1x128xf32, #tpu.memory_space<vmem>>, %arg5: memref<32x128xf32, #tpu.memory_space<vmem>>, %arg6: memref<1x32xf32, #tpu.memory_space<vmem>>, %arg7: memref<1x32xf32, #tpu.memory_space<vmem>>, %arg8: memref<1xf32, #tpu.memory_space<smem>>, %arg9: memref<1x8x128xf32, #tpu.memory_space<vmem>>) attributes {dimension_semantics = [#tpu.dimension_semantics<parallel>], iteration_bounds = array<i64: 2>, scalar_prefetch = 1 : i64, scratch_operands = 0 : i64, tpu.core_type = #tpu.core_type<tc>, window_params = [{transform_indices = @transform_0, window_bounds = array<i64: 1, 32, 256>}, {pipeline_mode = #tpu.pipeline_mode<synchronous>, transform_indices = @transform_1, window_bounds = array<i64: 256, 128>}, {pipeline_mode = #tpu.pipeline_mode<synchronous>, transform_indices = @transform_2, window_bounds = array<i64: 1, 128>}, {pipeline_mode = #tpu.pipeline_mode<synchronous>, transform_indices = @transform_3, window_bounds = array<i64: 32, 128>}, {pipeline_mode = #tpu.pipeline_mode<synchronous>, transform_indices = @transform_4, window_bounds = array<i64: 1, 32>}, {pipeline_mode = #tpu.pipeline_mode<synchronous>, transform_indices = @transform_5, window_bounds = array<i64: 1, 32>}, {transform_indices = @transform_6, window_bounds = array<i64: 1>}, {transform_indices = @transform_7, window_bounds = array<i64: 1, 8, 128>}]} {
    %c0 = arith.constant 0 : index
    %c0_0 = arith.constant 0 : index
    %c0_1 = arith.constant 0 : index
    %0 = vector.load %arg2[%c0, %c0_0, %c0_1] : memref<1x32x256xbf16, #tpu.memory_space<vmem>>, vector<1x32x256xbf16>
    %1 = vector.shape_cast %0 : vector<1x32x256xbf16> to vector<32x256xbf16>
    %c0_2 = arith.constant 0 : index
    %c0_3 = arith.constant 0 : index
    %2 = vector.load %arg3[%c0_2, %c0_3] : memref<256x128xbf16, #tpu.memory_space<vmem>>, vector<256x128xbf16>
    %cst = arith.constant dense<0.000000e+00> : vector<32x128xf32>
    %3 = tpu.matmul %1, %2, %cst {dimension_numbers = #tpu.dot_dimension_numbers<[1], [0], [0], [1], [0, 0, 1, 1], [], []>} : vector<32x256xbf16>, vector<256x128xbf16>, vector<32x128xf32> -> vector<32x128xf32>
    %c0_4 = arith.constant 0 : index
    %c0_5 = arith.constant 0 : index
    %4 = vector.load %arg4[%c0_4, %c0_5] : memref<1x128xf32, #tpu.memory_space<vmem>>, vector<1x128xf32>
    %5 = vector.broadcast %4 : vector<1x128xf32> to vector<32x128xf32>
    %6 = arith.addf %3, %5 : vector<32x128xf32>
    %c0_6 = arith.constant 0 : index
    %c0_7 = arith.constant 0 : index
    %7 = vector.load %arg5[%c0_6, %c0_7] : memref<32x128xf32, #tpu.memory_space<vmem>>, vector<32x128xf32>
    %c0_8 = arith.constant 0 : index
    %c0_9 = arith.constant 0 : index
    %8 = vector.load %arg6[%c0_8, %c0_9] : memref<1x32xf32, #tpu.memory_space<vmem>>, vector<1x32xf32>
    %c0_10 = arith.constant 0 : index
    %c0_11 = arith.constant 0 : index
    %9 = vector.load %arg7[%c0_10, %c0_11] : memref<1x32xf32, #tpu.memory_space<vmem>>, vector<1x32xf32>
    %c0_12 = arith.constant 0 : index
    %10 = memref.load %arg8[%c0_12] : memref<1xf32, #tpu.memory_space<smem>>
    %11 = tpu.iota {dimensions = array<i32: 0>} : vector<2x1xi32>
    %c0_i32 = arith.constant 0 : i32
    %12 = vector.broadcast %c0_i32 : i32 to vector<2x1xi32>
    %c0_i32_13 = arith.constant 0 : i32
    %13 = vector.broadcast %c0_i32_13 : i32 to vector<2x1xi32>
    %14 = arith.cmpi eq, %11, %13 : vector<2x1xi32>
    %c2_i32 = arith.constant 2 : i32
    %15 = arith.muli %arg0, %c2_i32 : i32
    %c0_i32_14 = arith.constant 0 : i32
    %16 = arith.addi %15, %c0_i32_14 : i32
    %17 = arith.index_cast %16 : i32 to index
    %18 = memref.load %arg1[%17] : memref<4xi32, #tpu.memory_space<smem>>
    %19 = vector.broadcast %18 : i32 to vector<2x1xi32>
    %20 = arith.select %14, %19, %12 : vector<2x1xi1>, vector<2x1xi32>
    %c1_i32 = arith.constant 1 : i32
    %21 = vector.broadcast %c1_i32 : i32 to vector<2x1xi32>
    %22 = arith.cmpi eq, %11, %21 : vector<2x1xi32>
    %c2_i32_15 = arith.constant 2 : i32
    %23 = arith.muli %arg0, %c2_i32_15 : i32
    %c1_i32_16 = arith.constant 1 : i32
    %24 = arith.addi %23, %c1_i32_16 : i32
    %25 = arith.index_cast %24 : i32 to index
    %26 = memref.load %arg1[%25] : memref<4xi32, #tpu.memory_space<smem>>
    %27 = vector.broadcast %26 : i32 to vector<2x1xi32>
    %28 = arith.select %22, %27, %20 : vector<2x1xi1>, vector<2x1xi32>
    %29 = tpu.iota {dimensions = array<i32: 1>} : vector<2x38xi32>
    %cst_17 = arith.constant 0.000000e+00 : f32
    %30 = vector.broadcast %cst_17 : f32 to vector<2x38xf32>
    %cst_18 = arith.constant 0.000000e+00 : f32
    %31 = vector.broadcast %cst_18 : f32 to vector<2x32xf32>
    %32 = vector.extract_strided_slice %6 {offsets = [0, 0], sizes = [2, 128], strides = [1, 1]} : vector<32x128xf32> to vector<2x128xf32>
    %cst_19 = arith.constant dense<0.000000e+00> : vector<2x128xf32>
    %33 = tpu.matmul %31, %7, %cst_19 {dimension_numbers = #tpu.dot_dimension_numbers<[1], [0], [0], [1], [0, 0, 1, 1], [], []>} : vector<2x32xf32>, vector<32x128xf32>, vector<2x128xf32> -> vector<2x128xf32>
    %34 = vector.extract_strided_slice %32 {offsets = [0, 0], sizes = [2, 32], strides = [1, 1]} : vector<2x128xf32> to vector<2x32xf32>
    %35 = vector.extract_strided_slice %33 {offsets = [0, 0], sizes = [2, 32], strides = [1, 1]} : vector<2x128xf32> to vector<2x32xf32>
    %36 = arith.addf %34, %35 : vector<2x32xf32>
    %37 = arith.negf %36 : vector<2x32xf32>
    %38 = math.exp %37 : vector<2x32xf32>
    %cst_20 = arith.constant 1.000000e+00 : f32
    %39 = vector.broadcast %cst_20 : f32 to vector<2x32xf32>
    %40 = arith.addf %39, %38 : vector<2x32xf32>
    %41 = arith.divf %39, %40 : vector<2x32xf32>
    %42 = vector.extract_strided_slice %32 {offsets = [0, 32], sizes = [2, 32], strides = [1, 1]} : vector<2x128xf32> to vector<2x32xf32>
    %43 = vector.extract_strided_slice %33 {offsets = [0, 32], sizes = [2, 32], strides = [1, 1]} : vector<2x128xf32> to vector<2x32xf32>
    %44 = arith.addf %42, %43 : vector<2x32xf32>
    %45 = arith.negf %44 : vector<2x32xf32>
    %46 = math.exp %45 : vector<2x32xf32>
    %cst_21 = arith.constant 1.000000e+00 : f32
    %47 = vector.broadcast %cst_21 : f32 to vector<2x32xf32>
    %48 = arith.addf %47, %46 : vector<2x32xf32>
    %49 = arith.divf %47, %48 : vector<2x32xf32>
    %50 = vector.extract_strided_slice %32 {offsets = [0, 64], sizes = [2, 32], strides = [1, 1]} : vector<2x128xf32> to vector<2x32xf32>
    %51 = vector.extract_strided_slice %33 {offsets = [0, 64], sizes = [2, 32], strides = [1, 1]} : vector<2x128xf32> to vector<2x32xf32>
    %52 = vector.broadcast %8 : vector<1x32xf32> to vector<2x32xf32>
    %53 = arith.addf %51, %52 : vector<2x32xf32>
    %54 = arith.mulf %41, %53 : vector<2x32xf32>
    %55 = arith.addf %50, %54 : vector<2x32xf32>
    %56 = math.tanh %55 : vector<2x32xf32>
    %cst_22 = arith.constant 1.000000e+00 : f32
    %57 = vector.broadcast %cst_22 : f32 to vector<2x32xf32>
    %58 = arith.subf %57, %49 : vector<2x32xf32>
    %59 = arith.mulf %58, %56 : vector<2x32xf32>
    %60 = arith.mulf %49, %31 : vector<2x32xf32>
    %61 = arith.addf %59, %60 : vector<2x32xf32>
    %62 = vector.broadcast %9 : vector<1x32xf32> to vector<2x32xf32>
    %63 = arith.mulf %61, %62 : vector<2x32xf32>
    %cst_23 = arith.constant dense<0.000000e+00> : vector<2xf32>
    %64 = vector.multi_reduction <add>, %63, %cst_23 [1] : vector<2x32xf32> to vector<2xf32>
    %65 = vector.shape_cast %64 : vector<2xf32> to vector<2x1xf32>
    %66 = vector.broadcast %10 : f32 to vector<2x1xf32>
    %67 = arith.addf %65, %66 : vector<2x1xf32>
    %c11_i32 = arith.constant 11 : i32
    %68 = vector.broadcast %c11_i32 : i32 to vector<2x38xi32>
    %69 = arith.cmpi eq, %29, %68 : vector<2x38xi32>
    %70 = vector.shape_cast %67 : vector<2x1xf32> to vector<2x1xf32>
    %71 = vector.broadcast %70 : vector<2x1xf32> to vector<2x38xf32>
    %72 = arith.select %69, %71, %30 : vector<2x38xi1>, vector<2x38xf32>
    %73 = vector.extract_strided_slice %6 {offsets = [2, 0], sizes = [2, 128], strides = [1, 1]} : vector<32x128xf32> to vector<2x128xf32>
    %cst_24 = arith.constant dense<0.000000e+00> : vector<2x128xf32>
    %74 = tpu.matmul %61, %7, %cst_24 {dimension_numbers = #tpu.dot_dimension_numbers<[1], [0], [0], [1], [0, 0, 1, 1], [], []>} : vector<2x32xf32>, vector<32x128xf32>, vector<2x128xf32> -> vector<2x128xf32>
    %75 = vector.extract_strided_slice %73 {offsets = [0, 0], sizes = [2, 32], strides = [1, 1]} : vector<2x128xf32> to vector<2x32xf32>
    %76 = vector.extract_strided_slice %74 {offsets = [0, 0], sizes = [2, 32], strides = [1, 1]} : vector<2x128xf32> to vector<2x32xf32>
    %77 = arith.addf %75, %76 : vector<2x32xf32>
    %78 = arith.negf %77 : vector<2x32xf32>
    %79 = math.exp %78 : vector<2x32xf32>
    %cst_25 = arith.constant 1.000000e+00 : f32
    %80 = vector.broadcast %cst_25 : f32 to vector<2x32xf32>
    %81 = arith.addf %80, %79 : vector<2x32xf32>
    %82 = arith.divf %80, %81 : vector<2x32xf32>
    %83 = vector.extract_strided_slice %73 {offsets = [0, 32], sizes = [2, 32], strides = [1, 1]} : vector<2x128xf32> to vector<2x32xf32>
    %84 = vector.extract_strided_slice %74 {offsets = [0, 32], sizes = [2, 32], strides = [1, 1]} : vector<2x128xf32> to vector<2x32xf32>
    %85 = arith.addf %83, %84 : vector<2x32xf32>
    %86 = arith.negf %85 : vector<2x32xf32>
    %87 = math.exp %86 : vector<2x32xf32>
    %cst_26 = arith.constant 1.000000e+00 : f32
    %88 = vector.broadcast %cst_26 : f32 to vector<2x32xf32>
    %89 = arith.addf %88, %87 : vector<2x32xf32>
    %90 = arith.divf %88, %89 : vector<2x32xf32>
    %91 = vector.extract_strided_slice %73 {offsets = [0, 64], sizes = [2, 32], strides = [1, 1]} : vector<2x128xf32> to vector<2x32xf32>
    %92 = vector.extract_strided_slice %74 {offsets = [0, 64], sizes = [2, 32], strides = [1, 1]} : vector<2x128xf32> to vector<2x32xf32>
    %93 = vector.broadcast %8 : vector<1x32xf32> to vector<2x32xf32>
    %94 = arith.addf %92, %93 : vector<2x32xf32>
    %95 = arith.mulf %82, %94 : vector<2x32xf32>
    %96 = arith.addf %91, %95 : vector<2x32xf32>
    %97 = math.tanh %96 : vector<2x32xf32>
    %cst_27 = arith.constant 1.000000e+00 : f32
    %98 = vector.broadcast %cst_27 : f32 to vector<2x32xf32>
    %99 = arith.subf %98, %90 : vector<2x32xf32>
    %100 = arith.mulf %99, %97 : vector<2x32xf32>
    %101 = arith.mulf %90, %61 : vector<2x32xf32>
    %102 = arith.addf %100, %101 : vector<2x32xf32>
    %103 = vector.broadcast %9 : vector<1x32xf32> to vector<2x32xf32>
    %104 = arith.mulf %102, %103 : vector<2x32xf32>
    %cst_28 = arith.constant dense<0.000000e+00> : vector<2xf32>
    %105 = vector.multi_reduction <add>, %104, %cst_28 [1] : vector<2x32xf32> to vector<2xf32>
    %106 = vector.shape_cast %105 : vector<2xf32> to vector<2x1xf32>
    %107 = vector.broadcast %10 : f32 to vector<2x1xf32>
    %108 = arith.addf %106, %107 : vector<2x1xf32>
    %c12_i32 = arith.constant 12 : i32
    %109 = vector.broadcast %c12_i32 : i32 to vector<2x38xi32>
    %110 = arith.cmpi eq, %29, %109 : vector<2x38xi32>
    %111 = vector.shape_cast %108 : vector<2x1xf32> to vector<2x1xf32>
    %112 = vector.broadcast %111 : vector<2x1xf32> to vector<2x38xf32>
    %113 = arith.select %110, %112, %72 : vector<2x38xi1>, vector<2x38xf32>
    %114 = vector.extract_strided_slice %6 {offsets = [4, 0], sizes = [2, 128], strides = [1, 1]} : vector<32x128xf32> to vector<2x128xf32>
    %cst_29 = arith.constant dense<0.000000e+00> : vector<2x128xf32>
    %115 = tpu.matmul %102, %7, %cst_29 {dimension_numbers = #tpu.dot_dimension_numbers<[1], [0], [0], [1], [0, 0, 1, 1], [], []>} : vector<2x32xf32>, vector<32x128xf32>, vector<2x128xf32> -> vector<2x128xf32>
    %116 = vector.extract_strided_slice %114 {offsets = [0, 0], sizes = [2, 32], strides = [1, 1]} : vector<2x128xf32> to vector<2x32xf32>
    %117 = vector.extract_strided_slice %115 {offsets = [0, 0], sizes = [2, 32], strides = [1, 1]} : vector<2x128xf32> to vector<2x32xf32>
    %118 = arith.addf %116, %117 : vector<2x32xf32>
    %119 = arith.negf %118 : vector<2x32xf32>
    %120 = math.exp %119 : vector<2x32xf32>
    %cst_30 = arith.constant 1.000000e+00 : f32
    %121 = vector.broadcast %cst_30 : f32 to vector<2x32xf32>
    %122 = arith.addf %121, %120 : vector<2x32xf32>
    %123 = arith.divf %121, %122 : vector<2x32xf32>
    %124 = vector.extract_strided_slice %114 {offsets = [0, 32], sizes = [2, 32], strides = [1, 1]} : vector<2x128xf32> to vector<2x32xf32>
    %125 = vector.extract_strided_slice %115 {offsets = [0, 32], sizes = [2, 32], strides = [1, 1]} : vector<2x128xf32> to vector<2x32xf32>
    %126 = arith.addf %124, %125 : vector<2x32xf32>
    %127 = arith.negf %126 : vector<2x32xf32>
    %128 = math.exp %127 : vector<2x32xf32>
    %cst_31 = arith.constant 1.000000e+00 : f32
    %129 = vector.broadcast %cst_31 : f32 to vector<2x32xf32>
    %130 = arith.addf %129, %128 : vector<2x32xf32>
    %131 = arith.divf %129, %130 : vector<2x32xf32>
    %132 = vector.extract_strided_slice %114 {offsets = [0, 64], sizes = [2, 32], strides = [1, 1]} : vector<2x128xf32> to vector<2x32xf32>
    %133 = vector.extract_strided_slice %115 {offsets = [0, 64], sizes = [2, 32], strides = [1, 1]} : vector<2x128xf32> to vector<2x32xf32>
    %134 = vector.broadcast %8 : vector<1x32xf32> to vector<2x32xf32>
    %135 = arith.addf %133, %134 : vector<2x32xf32>
    %136 = arith.mulf %123, %135 : vector<2x32xf32>
    %137 = arith.addf %132, %136 : vector<2x32xf32>
    %138 = math.tanh %137 : vector<2x32xf32>
    %cst_32 = arith.constant 1.000000e+00 : f32
    %139 = vector.broadcast %cst_32 : f32 to vector<2x32xf32>
    %140 = arith.subf %139, %131 : vector<2x32xf32>
    %141 = arith.mulf %140, %138 : vector<2x32xf32>
    %142 = arith.mulf %131, %102 : vector<2x32xf32>
    %143 = arith.addf %141, %142 : vector<2x32xf32>
    %144 = vector.broadcast %9 : vector<1x32xf32> to vector<2x32xf32>
    %145 = arith.mulf %143, %144 : vector<2x32xf32>
    %cst_33 = arith.constant dense<0.000000e+00> : vector<2xf32>
    %146 = vector.multi_reduction <add>, %145, %cst_33 [1] : vector<2x32xf32> to vector<2xf32>
    %147 = vector.shape_cast %146 : vector<2xf32> to vector<2x1xf32>
    %148 = vector.broadcast %10 : f32 to vector<2x1xf32>
    %149 = arith.addf %147, %148 : vector<2x1xf32>
    %c13_i32 = arith.constant 13 : i32
    %150 = vector.broadcast %c13_i32 : i32 to vector<2x38xi32>
    %151 = arith.cmpi eq, %29, %150 : vector<2x38xi32>
    %152 = vector.shape_cast %149 : vector<2x1xf32> to vector<2x1xf32>
    %153 = vector.broadcast %152 : vector<2x1xf32> to vector<2x38xf32>
    %154 = arith.select %151, %153, %113 : vector<2x38xi1>, vector<2x38xf32>
    %155 = vector.extract_strided_slice %6 {offsets = [6, 0], sizes = [2, 128], strides = [1, 1]} : vector<32x128xf32> to vector<2x128xf32>
    %cst_34 = arith.constant dense<0.000000e+00> : vector<2x128xf32>
    %156 = tpu.matmul %143, %7, %cst_34 {dimension_numbers = #tpu.dot_dimension_numbers<[1], [0], [0], [1], [0, 0, 1, 1], [], []>} : vector<2x32xf32>, vector<32x128xf32>, vector<2x128xf32> -> vector<2x128xf32>
    %157 = vector.extract_strided_slice %155 {offsets = [0, 0], sizes = [2, 32], strides = [1, 1]} : vector<2x128xf32> to vector<2x32xf32>
    %158 = vector.extract_strided_slice %156 {offsets = [0, 0], sizes = [2, 32], strides = [1, 1]} : vector<2x128xf32> to vector<2x32xf32>
    %159 = arith.addf %157, %158 : vector<2x32xf32>
    %160 = arith.negf %159 : vector<2x32xf32>
    %161 = math.exp %160 : vector<2x32xf32>
    %cst_35 = arith.constant 1.000000e+00 : f32
    %162 = vector.broadcast %cst_35 : f32 to vector<2x32xf32>
    %163 = arith.addf %162, %161 : vector<2x32xf32>
    %164 = arith.divf %162, %163 : vector<2x32xf32>
    %165 = vector.extract_strided_slice %155 {offsets = [0, 32], sizes = [2, 32], strides = [1, 1]} : vector<2x128xf32> to vector<2x32xf32>
    %166 = vector.extract_strided_slice %156 {offsets = [0, 32], sizes = [2, 32], strides = [1, 1]} : vector<2x128xf32> to vector<2x32xf32>
    %167 = arith.addf %165, %166 : vector<2x32xf32>
    %168 = arith.negf %167 : vector<2x32xf32>
    %169 = math.exp %168 : vector<2x32xf32>
    %cst_36 = arith.constant 1.000000e+00 : f32
    %170 = vector.broadcast %cst_36 : f32 to vector<2x32xf32>
    %171 = arith.addf %170, %169 : vector<2x32xf32>
    %172 = arith.divf %170, %171 : vector<2x32xf32>
    %173 = vector.extract_strided_slice %155 {offsets = [0, 64], sizes = [2, 32], strides = [1, 1]} : vector<2x128xf32> to vector<2x32xf32>
    %174 = vector.extract_strided_slice %156 {offsets = [0, 64], sizes = [2, 32], strides = [1, 1]} : vector<2x128xf32> to vector<2x32xf32>
    %175 = vector.broadcast %8 : vector<1x32xf32> to vector<2x32xf32>
    %176 = arith.addf %174, %175 : vector<2x32xf32>
    %177 = arith.mulf %164, %176 : vector<2x32xf32>
    %178 = arith.addf %173, %177 : vector<2x32xf32>
    %179 = math.tanh %178 : vector<2x32xf32>
    %cst_37 = arith.constant 1.000000e+00 : f32
    %180 = vector.broadcast %cst_37 : f32 to vector<2x32xf32>
    %181 = arith.subf %180, %172 : vector<2x32xf32>
    %182 = arith.mulf %181, %179 : vector<2x32xf32>
    %183 = arith.mulf %172, %143 : vector<2x32xf32>
    %184 = arith.addf %182, %183 : vector<2x32xf32>
    %185 = vector.broadcast %9 : vector<1x32xf32> to vector<2x32xf32>
    %186 = arith.mulf %184, %185 : vector<2x32xf32>
    %cst_38 = arith.constant dense<0.000000e+00> : vector<2xf32>
    %187 = vector.multi_reduction <add>, %186, %cst_38 [1] : vector<2x32xf32> to vector<2xf32>
    %188 = vector.shape_cast %187 : vector<2xf32> to vector<2x1xf32>
    %189 = vector.broadcast %10 : f32 to vector<2x1xf32>
    %190 = arith.addf %188, %189 : vector<2x1xf32>
    %c14_i32 = arith.constant 14 : i32
    %191 = vector.broadcast %c14_i32 : i32 to vector<2x38xi32>
    %192 = arith.cmpi eq, %29, %191 : vector<2x38xi32>
    %193 = vector.shape_cast %190 : vector<2x1xf32> to vector<2x1xf32>
    %194 = vector.broadcast %193 : vector<2x1xf32> to vector<2x38xf32>
    %195 = arith.select %192, %194, %154 : vector<2x38xi1>, vector<2x38xf32>
    %196 = vector.extract_strided_slice %6 {offsets = [8, 0], sizes = [2, 128], strides = [1, 1]} : vector<32x128xf32> to vector<2x128xf32>
    %cst_39 = arith.constant dense<0.000000e+00> : vector<2x128xf32>
    %197 = tpu.matmul %184, %7, %cst_39 {dimension_numbers = #tpu.dot_dimension_numbers<[1], [0], [0], [1], [0, 0, 1, 1], [], []>} : vector<2x32xf32>, vector<32x128xf32>, vector<2x128xf32> -> vector<2x128xf32>
    %198 = vector.extract_strided_slice %196 {offsets = [0, 0], sizes = [2, 32], strides = [1, 1]} : vector<2x128xf32> to vector<2x32xf32>
    %199 = vector.extract_strided_slice %197 {offsets = [0, 0], sizes = [2, 32], strides = [1, 1]} : vector<2x128xf32> to vector<2x32xf32>
    %200 = arith.addf %198, %199 : vector<2x32xf32>
    %201 = arith.negf %200 : vector<2x32xf32>
    %202 = math.exp %201 : vector<2x32xf32>
    %cst_40 = arith.constant 1.000000e+00 : f32
    %203 = vector.broadcast %cst_40 : f32 to vector<2x32xf32>
    %204 = arith.addf %203, %202 : vector<2x32xf32>
    %205 = arith.divf %203, %204 : vector<2x32xf32>
    %206 = vector.extract_strided_slice %196 {offsets = [0, 32], sizes = [2, 32], strides = [1, 1]} : vector<2x128xf32> to vector<2x32xf32>
    %207 = vector.extract_strided_slice %197 {offsets = [0, 32], sizes = [2, 32], strides = [1, 1]} : vector<2x128xf32> to vector<2x32xf32>
    %208 = arith.addf %206, %207 : vector<2x32xf32>
    %209 = arith.negf %208 : vector<2x32xf32>
    %210 = math.exp %209 : vector<2x32xf32>
    %cst_41 = arith.constant 1.000000e+00 : f32
    %211 = vector.broadcast %cst_41 : f32 to vector<2x32xf32>
    %212 = arith.addf %211, %210 : vector<2x32xf32>
    %213 = arith.divf %211, %212 : vector<2x32xf32>
    %214 = vector.extract_strided_slice %196 {offsets = [0, 64], sizes = [2, 32], strides = [1, 1]} : vector<2x128xf32> to vector<2x32xf32>
    %215 = vector.extract_strided_slice %197 {offsets = [0, 64], sizes = [2, 32], strides = [1, 1]} : vector<2x128xf32> to vector<2x32xf32>
    %216 = vector.broadcast %8 : vector<1x32xf32> to vector<2x32xf32>
    %217 = arith.addf %215, %216 : vector<2x32xf32>
    %218 = arith.mulf %205, %217 : vector<2x32xf32>
    %219 = arith.addf %214, %218 : vector<2x32xf32>
    %220 = math.tanh %219 : vector<2x32xf32>
    %cst_42 = arith.constant 1.000000e+00 : f32
    %221 = vector.broadcast %cst_42 : f32 to vector<2x32xf32>
    %222 = arith.subf %221, %213 : vector<2x32xf32>
    %223 = arith.mulf %222, %220 : vector<2x32xf32>
    %224 = arith.mulf %213, %184 : vector<2x32xf32>
    %225 = arith.addf %223, %224 : vector<2x32xf32>
    %226 = vector.broadcast %9 : vector<1x32xf32> to vector<2x32xf32>
    %227 = arith.mulf %225, %226 : vector<2x32xf32>
    %cst_43 = arith.constant dense<0.000000e+00> : vector<2xf32>
    %228 = vector.multi_reduction <add>, %227, %cst_43 [1] : vector<2x32xf32> to vector<2xf32>
    %229 = vector.shape_cast %228 : vector<2xf32> to vector<2x1xf32>
    %230 = vector.broadcast %10 : f32 to vector<2x1xf32>
    %231 = arith.addf %229, %230 : vector<2x1xf32>
    %c15_i32 = arith.constant 15 : i32
    %232 = vector.broadcast %c15_i32 : i32 to vector<2x38xi32>
    %233 = arith.cmpi eq, %29, %232 : vector<2x38xi32>
    %234 = vector.shape_cast %231 : vector<2x1xf32> to vector<2x1xf32>
    %235 = vector.broadcast %234 : vector<2x1xf32> to vector<2x38xf32>
    %236 = arith.select %233, %235, %195 : vector<2x38xi1>, vector<2x38xf32>
    %237 = vector.extract_strided_slice %6 {offsets = [10, 0], sizes = [2, 128], strides = [1, 1]} : vector<32x128xf32> to vector<2x128xf32>
    %cst_44 = arith.constant dense<0.000000e+00> : vector<2x128xf32>
    %238 = tpu.matmul %225, %7, %cst_44 {dimension_numbers = #tpu.dot_dimension_numbers<[1], [0], [0], [1], [0, 0, 1, 1], [], []>} : vector<2x32xf32>, vector<32x128xf32>, vector<2x128xf32> -> vector<2x128xf32>
    %239 = vector.extract_strided_slice %237 {offsets = [0, 0], sizes = [2, 32], strides = [1, 1]} : vector<2x128xf32> to vector<2x32xf32>
    %240 = vector.extract_strided_slice %238 {offsets = [0, 0], sizes = [2, 32], strides = [1, 1]} : vector<2x128xf32> to vector<2x32xf32>
    %241 = arith.addf %239, %240 : vector<2x32xf32>
    %242 = arith.negf %241 : vector<2x32xf32>
    %243 = math.exp %242 : vector<2x32xf32>
    %cst_45 = arith.constant 1.000000e+00 : f32
    %244 = vector.broadcast %cst_45 : f32 to vector<2x32xf32>
    %245 = arith.addf %244, %243 : vector<2x32xf32>
    %246 = arith.divf %244, %245 : vector<2x32xf32>
    %247 = vector.extract_strided_slice %237 {offsets = [0, 32], sizes = [2, 32], strides = [1, 1]} : vector<2x128xf32> to vector<2x32xf32>
    %248 = vector.extract_strided_slice %238 {offsets = [0, 32], sizes = [2, 32], strides = [1, 1]} : vector<2x128xf32> to vector<2x32xf32>
    %249 = arith.addf %247, %248 : vector<2x32xf32>
    %250 = arith.negf %249 : vector<2x32xf32>
    %251 = math.exp %250 : vector<2x32xf32>
    %cst_46 = arith.constant 1.000000e+00 : f32
    %252 = vector.broadcast %cst_46 : f32 to vector<2x32xf32>
    %253 = arith.addf %252, %251 : vector<2x32xf32>
    %254 = arith.divf %252, %253 : vector<2x32xf32>
    %255 = vector.extract_strided_slice %237 {offsets = [0, 64], sizes = [2, 32], strides = [1, 1]} : vector<2x128xf32> to vector<2x32xf32>
    %256 = vector.extract_strided_slice %238 {offsets = [0, 64], sizes = [2, 32], strides = [1, 1]} : vector<2x128xf32> to vector<2x32xf32>
    %257 = vector.broadcast %8 : vector<1x32xf32> to vector<2x32xf32>
    %258 = arith.addf %256, %257 : vector<2x32xf32>
    %259 = arith.mulf %246, %258 : vector<2x32xf32>
    %260 = arith.addf %255, %259 : vector<2x32xf32>
    %261 = math.tanh %260 : vector<2x32xf32>
    %cst_47 = arith.constant 1.000000e+00 : f32
    %262 = vector.broadcast %cst_47 : f32 to vector<2x32xf32>
    %263 = arith.subf %262, %254 : vector<2x32xf32>
    %264 = arith.mulf %263, %261 : vector<2x32xf32>
    %265 = arith.mulf %254, %225 : vector<2x32xf32>
    %266 = arith.addf %264, %265 : vector<2x32xf32>
    %267 = vector.broadcast %9 : vector<1x32xf32> to vector<2x32xf32>
    %268 = arith.mulf %266, %267 : vector<2x32xf32>
    %cst_48 = arith.constant dense<0.000000e+00> : vector<2xf32>
    %269 = vector.multi_reduction <add>, %268, %cst_48 [1] : vector<2x32xf32> to vector<2xf32>
    %270 = vector.shape_cast %269 : vector<2xf32> to vector<2x1xf32>
    %271 = vector.broadcast %10 : f32 to vector<2x1xf32>
    %272 = arith.addf %270, %271 : vector<2x1xf32>
    %c16_i32 = arith.constant 16 : i32
    %273 = vector.broadcast %c16_i32 : i32 to vector<2x38xi32>
    %274 = arith.cmpi eq, %29, %273 : vector<2x38xi32>
    %275 = vector.shape_cast %272 : vector<2x1xf32> to vector<2x1xf32>
    %276 = vector.broadcast %275 : vector<2x1xf32> to vector<2x38xf32>
    %277 = arith.select %274, %276, %236 : vector<2x38xi1>, vector<2x38xf32>
    %278 = vector.extract_strided_slice %6 {offsets = [12, 0], sizes = [2, 128], strides = [1, 1]} : vector<32x128xf32> to vector<2x128xf32>
    %cst_49 = arith.constant dense<0.000000e+00> : vector<2x128xf32>
    %279 = tpu.matmul %266, %7, %cst_49 {dimension_numbers = #tpu.dot_dimension_numbers<[1], [0], [0], [1], [0, 0, 1, 1], [], []>} : vector<2x32xf32>, vector<32x128xf32>, vector<2x128xf32> -> vector<2x128xf32>
    %280 = vector.extract_strided_slice %278 {offsets = [0, 0], sizes = [2, 32], strides = [1, 1]} : vector<2x128xf32> to vector<2x32xf32>
    %281 = vector.extract_strided_slice %279 {offsets = [0, 0], sizes = [2, 32], strides = [1, 1]} : vector<2x128xf32> to vector<2x32xf32>
    %282 = arith.addf %280, %281 : vector<2x32xf32>
    %283 = arith.negf %282 : vector<2x32xf32>
    %284 = math.exp %283 : vector<2x32xf32>
    %cst_50 = arith.constant 1.000000e+00 : f32
    %285 = vector.broadcast %cst_50 : f32 to vector<2x32xf32>
    %286 = arith.addf %285, %284 : vector<2x32xf32>
    %287 = arith.divf %285, %286 : vector<2x32xf32>
    %288 = vector.extract_strided_slice %278 {offsets = [0, 32], sizes = [2, 32], strides = [1, 1]} : vector<2x128xf32> to vector<2x32xf32>
    %289 = vector.extract_strided_slice %279 {offsets = [0, 32], sizes = [2, 32], strides = [1, 1]} : vector<2x128xf32> to vector<2x32xf32>
    %290 = arith.addf %288, %289 : vector<2x32xf32>
    %291 = arith.negf %290 : vector<2x32xf32>
    %292 = math.exp %291 : vector<2x32xf32>
    %cst_51 = arith.constant 1.000000e+00 : f32
    %293 = vector.broadcast %cst_51 : f32 to vector<2x32xf32>
    %294 = arith.addf %293, %292 : vector<2x32xf32>
    %295 = arith.divf %293, %294 : vector<2x32xf32>
    %296 = vector.extract_strided_slice %278 {offsets = [0, 64], sizes = [2, 32], strides = [1, 1]} : vector<2x128xf32> to vector<2x32xf32>
    %297 = vector.extract_strided_slice %279 {offsets = [0, 64], sizes = [2, 32], strides = [1, 1]} : vector<2x128xf32> to vector<2x32xf32>
    %298 = vector.broadcast %8 : vector<1x32xf32> to vector<2x32xf32>
    %299 = arith.addf %297, %298 : vector<2x32xf32>
    %300 = arith.mulf %287, %299 : vector<2x32xf32>
    %301 = arith.addf %296, %300 : vector<2x32xf32>
    %302 = math.tanh %301 : vector<2x32xf32>
    %cst_52 = arith.constant 1.000000e+00 : f32
    %303 = vector.broadcast %cst_52 : f32 to vector<2x32xf32>
    %304 = arith.subf %303, %295 : vector<2x32xf32>
    %305 = arith.mulf %304, %302 : vector<2x32xf32>
    %306 = arith.mulf %295, %266 : vector<2x32xf32>
    %307 = arith.addf %305, %306 : vector<2x32xf32>
    %308 = vector.broadcast %9 : vector<1x32xf32> to vector<2x32xf32>
    %309 = arith.mulf %307, %308 : vector<2x32xf32>
    %cst_53 = arith.constant dense<0.000000e+00> : vector<2xf32>
    %310 = vector.multi_reduction <add>, %309, %cst_53 [1] : vector<2x32xf32> to vector<2xf32>
    %311 = vector.shape_cast %310 : vector<2xf32> to vector<2x1xf32>
    %312 = vector.broadcast %10 : f32 to vector<2x1xf32>
    %313 = arith.addf %311, %312 : vector<2x1xf32>
    %c17_i32 = arith.constant 17 : i32
    %314 = vector.broadcast %c17_i32 : i32 to vector<2x38xi32>
    %315 = arith.cmpi eq, %29, %314 : vector<2x38xi32>
    %316 = vector.shape_cast %313 : vector<2x1xf32> to vector<2x1xf32>
    %317 = vector.broadcast %316 : vector<2x1xf32> to vector<2x38xf32>
    %318 = arith.select %315, %317, %277 : vector<2x38xi1>, vector<2x38xf32>
    %319 = vector.extract_strided_slice %6 {offsets = [14, 0], sizes = [2, 128], strides = [1, 1]} : vector<32x128xf32> to vector<2x128xf32>
    %cst_54 = arith.constant dense<0.000000e+00> : vector<2x128xf32>
    %320 = tpu.matmul %307, %7, %cst_54 {dimension_numbers = #tpu.dot_dimension_numbers<[1], [0], [0], [1], [0, 0, 1, 1], [], []>} : vector<2x32xf32>, vector<32x128xf32>, vector<2x128xf32> -> vector<2x128xf32>
    %321 = vector.extract_strided_slice %319 {offsets = [0, 0], sizes = [2, 32], strides = [1, 1]} : vector<2x128xf32> to vector<2x32xf32>
    %322 = vector.extract_strided_slice %320 {offsets = [0, 0], sizes = [2, 32], strides = [1, 1]} : vector<2x128xf32> to vector<2x32xf32>
    %323 = arith.addf %321, %322 : vector<2x32xf32>
    %324 = arith.negf %323 : vector<2x32xf32>
    %325 = math.exp %324 : vector<2x32xf32>
    %cst_55 = arith.constant 1.000000e+00 : f32
    %326 = vector.broadcast %cst_55 : f32 to vector<2x32xf32>
    %327 = arith.addf %326, %325 : vector<2x32xf32>
    %328 = arith.divf %326, %327 : vector<2x32xf32>
    %329 = vector.extract_strided_slice %319 {offsets = [0, 32], sizes = [2, 32], strides = [1, 1]} : vector<2x128xf32> to vector<2x32xf32>
    %330 = vector.extract_strided_slice %320 {offsets = [0, 32], sizes = [2, 32], strides = [1, 1]} : vector<2x128xf32> to vector<2x32xf32>
    %331 = arith.addf %329, %330 : vector<2x32xf32>
    %332 = arith.negf %331 : vector<2x32xf32>
    %333 = math.exp %332 : vector<2x32xf32>
    %cst_56 = arith.constant 1.000000e+00 : f32
    %334 = vector.broadcast %cst_56 : f32 to vector<2x32xf32>
    %335 = arith.addf %334, %333 : vector<2x32xf32>
    %336 = arith.divf %334, %335 : vector<2x32xf32>
    %337 = vector.extract_strided_slice %319 {offsets = [0, 64], sizes = [2, 32], strides = [1, 1]} : vector<2x128xf32> to vector<2x32xf32>
    %338 = vector.extract_strided_slice %320 {offsets = [0, 64], sizes = [2, 32], strides = [1, 1]} : vector<2x128xf32> to vector<2x32xf32>
    %339 = vector.broadcast %8 : vector<1x32xf32> to vector<2x32xf32>
    %340 = arith.addf %338, %339 : vector<2x32xf32>
    %341 = arith.mulf %328, %340 : vector<2x32xf32>
    %342 = arith.addf %337, %341 : vector<2x32xf32>
    %343 = math.tanh %342 : vector<2x32xf32>
    %cst_57 = arith.constant 1.000000e+00 : f32
    %344 = vector.broadcast %cst_57 : f32 to vector<2x32xf32>
    %345 = arith.subf %344, %336 : vector<2x32xf32>
    %346 = arith.mulf %345, %343 : vector<2x32xf32>
    %347 = arith.mulf %336, %307 : vector<2x32xf32>
    %348 = arith.addf %346, %347 : vector<2x32xf32>
    %349 = vector.broadcast %9 : vector<1x32xf32> to vector<2x32xf32>
    %350 = arith.mulf %348, %349 : vector<2x32xf32>
    %cst_58 = arith.constant dense<0.000000e+00> : vector<2xf32>
    %351 = vector.multi_reduction <add>, %350, %cst_58 [1] : vector<2x32xf32> to vector<2xf32>
    %352 = vector.shape_cast %351 : vector<2xf32> to vector<2x1xf32>
    %353 = vector.broadcast %10 : f32 to vector<2x1xf32>
    %354 = arith.addf %352, %353 : vector<2x1xf32>
    %c18_i32 = arith.constant 18 : i32
    %355 = vector.broadcast %c18_i32 : i32 to vector<2x38xi32>
    %356 = arith.cmpi eq, %29, %355 : vector<2x38xi32>
    %357 = vector.shape_cast %354 : vector<2x1xf32> to vector<2x1xf32>
    %358 = vector.broadcast %357 : vector<2x1xf32> to vector<2x38xf32>
    %359 = arith.select %356, %358, %318 : vector<2x38xi1>, vector<2x38xf32>
    %360 = vector.extract_strided_slice %6 {offsets = [16, 0], sizes = [2, 128], strides = [1, 1]} : vector<32x128xf32> to vector<2x128xf32>
    %cst_59 = arith.constant dense<0.000000e+00> : vector<2x128xf32>
    %361 = tpu.matmul %348, %7, %cst_59 {dimension_numbers = #tpu.dot_dimension_numbers<[1], [0], [0], [1], [0, 0, 1, 1], [], []>} : vector<2x32xf32>, vector<32x128xf32>, vector<2x128xf32> -> vector<2x128xf32>
    %362 = vector.extract_strided_slice %360 {offsets = [0, 0], sizes = [2, 32], strides = [1, 1]} : vector<2x128xf32> to vector<2x32xf32>
    %363 = vector.extract_strided_slice %361 {offsets = [0, 0], sizes = [2, 32], strides = [1, 1]} : vector<2x128xf32> to vector<2x32xf32>
    %364 = arith.addf %362, %363 : vector<2x32xf32>
    %365 = arith.negf %364 : vector<2x32xf32>
    %366 = math.exp %365 : vector<2x32xf32>
    %cst_60 = arith.constant 1.000000e+00 : f32
    %367 = vector.broadcast %cst_60 : f32 to vector<2x32xf32>
    %368 = arith.addf %367, %366 : vector<2x32xf32>
    %369 = arith.divf %367, %368 : vector<2x32xf32>
    %370 = vector.extract_strided_slice %360 {offsets = [0, 32], sizes = [2, 32], strides = [1, 1]} : vector<2x128xf32> to vector<2x32xf32>
    %371 = vector.extract_strided_slice %361 {offsets = [0, 32], sizes = [2, 32], strides = [1, 1]} : vector<2x128xf32> to vector<2x32xf32>
    %372 = arith.addf %370, %371 : vector<2x32xf32>
    %373 = arith.negf %372 : vector<2x32xf32>
    %374 = math.exp %373 : vector<2x32xf32>
    %cst_61 = arith.constant 1.000000e+00 : f32
    %375 = vector.broadcast %cst_61 : f32 to vector<2x32xf32>
    %376 = arith.addf %375, %374 : vector<2x32xf32>
    %377 = arith.divf %375, %376 : vector<2x32xf32>
    %378 = vector.extract_strided_slice %360 {offsets = [0, 64], sizes = [2, 32], strides = [1, 1]} : vector<2x128xf32> to vector<2x32xf32>
    %379 = vector.extract_strided_slice %361 {offsets = [0, 64], sizes = [2, 32], strides = [1, 1]} : vector<2x128xf32> to vector<2x32xf32>
    %380 = vector.broadcast %8 : vector<1x32xf32> to vector<2x32xf32>
    %381 = arith.addf %379, %380 : vector<2x32xf32>
    %382 = arith.mulf %369, %381 : vector<2x32xf32>
    %383 = arith.addf %378, %382 : vector<2x32xf32>
    %384 = math.tanh %383 : vector<2x32xf32>
    %cst_62 = arith.constant 1.000000e+00 : f32
    %385 = vector.broadcast %cst_62 : f32 to vector<2x32xf32>
    %386 = arith.subf %385, %377 : vector<2x32xf32>
    %387 = arith.mulf %386, %384 : vector<2x32xf32>
    %388 = arith.mulf %377, %348 : vector<2x32xf32>
    %389 = arith.addf %387, %388 : vector<2x32xf32>
    %390 = vector.broadcast %9 : vector<1x32xf32> to vector<2x32xf32>
    %391 = arith.mulf %389, %390 : vector<2x32xf32>
    %cst_63 = arith.constant dense<0.000000e+00> : vector<2xf32>
    %392 = vector.multi_reduction <add>, %391, %cst_63 [1] : vector<2x32xf32> to vector<2xf32>
    %393 = vector.shape_cast %392 : vector<2xf32> to vector<2x1xf32>
    %394 = vector.broadcast %10 : f32 to vector<2x1xf32>
    %395 = arith.addf %393, %394 : vector<2x1xf32>
    %c19_i32 = arith.constant 19 : i32
    %396 = vector.broadcast %c19_i32 : i32 to vector<2x38xi32>
    %397 = arith.cmpi eq, %29, %396 : vector<2x38xi32>
    %398 = vector.shape_cast %395 : vector<2x1xf32> to vector<2x1xf32>
    %399 = vector.broadcast %398 : vector<2x1xf32> to vector<2x38xf32>
    %400 = arith.select %397, %399, %359 : vector<2x38xi1>, vector<2x38xf32>
    %401 = vector.extract_strided_slice %6 {offsets = [18, 0], sizes = [2, 128], strides = [1, 1]} : vector<32x128xf32> to vector<2x128xf32>
    %cst_64 = arith.constant dense<0.000000e+00> : vector<2x128xf32>
    %402 = tpu.matmul %389, %7, %cst_64 {dimension_numbers = #tpu.dot_dimension_numbers<[1], [0], [0], [1], [0, 0, 1, 1], [], []>} : vector<2x32xf32>, vector<32x128xf32>, vector<2x128xf32> -> vector<2x128xf32>
    %403 = vector.extract_strided_slice %401 {offsets = [0, 0], sizes = [2, 32], strides = [1, 1]} : vector<2x128xf32> to vector<2x32xf32>
    %404 = vector.extract_strided_slice %402 {offsets = [0, 0], sizes = [2, 32], strides = [1, 1]} : vector<2x128xf32> to vector<2x32xf32>
    %405 = arith.addf %403, %404 : vector<2x32xf32>
    %406 = arith.negf %405 : vector<2x32xf32>
    %407 = math.exp %406 : vector<2x32xf32>
    %cst_65 = arith.constant 1.000000e+00 : f32
    %408 = vector.broadcast %cst_65 : f32 to vector<2x32xf32>
    %409 = arith.addf %408, %407 : vector<2x32xf32>
    %410 = arith.divf %408, %409 : vector<2x32xf32>
    %411 = vector.extract_strided_slice %401 {offsets = [0, 32], sizes = [2, 32], strides = [1, 1]} : vector<2x128xf32> to vector<2x32xf32>
    %412 = vector.extract_strided_slice %402 {offsets = [0, 32], sizes = [2, 32], strides = [1, 1]} : vector<2x128xf32> to vector<2x32xf32>
    %413 = arith.addf %411, %412 : vector<2x32xf32>
    %414 = arith.negf %413 : vector<2x32xf32>
    %415 = math.exp %414 : vector<2x32xf32>
    %cst_66 = arith.constant 1.000000e+00 : f32
    %416 = vector.broadcast %cst_66 : f32 to vector<2x32xf32>
    %417 = arith.addf %416, %415 : vector<2x32xf32>
    %418 = arith.divf %416, %417 : vector<2x32xf32>
    %419 = vector.extract_strided_slice %401 {offsets = [0, 64], sizes = [2, 32], strides = [1, 1]} : vector<2x128xf32> to vector<2x32xf32>
    %420 = vector.extract_strided_slice %402 {offsets = [0, 64], sizes = [2, 32], strides = [1, 1]} : vector<2x128xf32> to vector<2x32xf32>
    %421 = vector.broadcast %8 : vector<1x32xf32> to vector<2x32xf32>
    %422 = arith.addf %420, %421 : vector<2x32xf32>
    %423 = arith.mulf %410, %422 : vector<2x32xf32>
    %424 = arith.addf %419, %423 : vector<2x32xf32>
    %425 = math.tanh %424 : vector<2x32xf32>
    %cst_67 = arith.constant 1.000000e+00 : f32
    %426 = vector.broadcast %cst_67 : f32 to vector<2x32xf32>
    %427 = arith.subf %426, %418 : vector<2x32xf32>
    %428 = arith.mulf %427, %425 : vector<2x32xf32>
    %429 = arith.mulf %418, %389 : vector<2x32xf32>
    %430 = arith.addf %428, %429 : vector<2x32xf32>
    %431 = vector.broadcast %9 : vector<1x32xf32> to vector<2x32xf32>
    %432 = arith.mulf %430, %431 : vector<2x32xf32>
    %cst_68 = arith.constant dense<0.000000e+00> : vector<2xf32>
    %433 = vector.multi_reduction <add>, %432, %cst_68 [1] : vector<2x32xf32> to vector<2xf32>
    %434 = vector.shape_cast %433 : vector<2xf32> to vector<2x1xf32>
    %435 = vector.broadcast %10 : f32 to vector<2x1xf32>
    %436 = arith.addf %434, %435 : vector<2x1xf32>
    %c20_i32 = arith.constant 20 : i32
    %437 = vector.broadcast %c20_i32 : i32 to vector<2x38xi32>
    %438 = arith.cmpi eq, %29, %437 : vector<2x38xi32>
    %439 = vector.shape_cast %436 : vector<2x1xf32> to vector<2x1xf32>
    %440 = vector.broadcast %439 : vector<2x1xf32> to vector<2x38xf32>
    %441 = arith.select %438, %440, %400 : vector<2x38xi1>, vector<2x38xf32>
    %442 = vector.extract_strided_slice %6 {offsets = [20, 0], sizes = [2, 128], strides = [1, 1]} : vector<32x128xf32> to vector<2x128xf32>
    %cst_69 = arith.constant dense<0.000000e+00> : vector<2x128xf32>
    %443 = tpu.matmul %430, %7, %cst_69 {dimension_numbers = #tpu.dot_dimension_numbers<[1], [0], [0], [1], [0, 0, 1, 1], [], []>} : vector<2x32xf32>, vector<32x128xf32>, vector<2x128xf32> -> vector<2x128xf32>
    %444 = vector.extract_strided_slice %442 {offsets = [0, 0], sizes = [2, 32], strides = [1, 1]} : vector<2x128xf32> to vector<2x32xf32>
    %445 = vector.extract_strided_slice %443 {offsets = [0, 0], sizes = [2, 32], strides = [1, 1]} : vector<2x128xf32> to vector<2x32xf32>
    %446 = arith.addf %444, %445 : vector<2x32xf32>
    %447 = arith.negf %446 : vector<2x32xf32>
    %448 = math.exp %447 : vector<2x32xf32>
    %cst_70 = arith.constant 1.000000e+00 : f32
    %449 = vector.broadcast %cst_70 : f32 to vector<2x32xf32>
    %450 = arith.addf %449, %448 : vector<2x32xf32>
    %451 = arith.divf %449, %450 : vector<2x32xf32>
    %452 = vector.extract_strided_slice %442 {offsets = [0, 32], sizes = [2, 32], strides = [1, 1]} : vector<2x128xf32> to vector<2x32xf32>
    %453 = vector.extract_strided_slice %443 {offsets = [0, 32], sizes = [2, 32], strides = [1, 1]} : vector<2x128xf32> to vector<2x32xf32>
    %454 = arith.addf %452, %453 : vector<2x32xf32>
    %455 = arith.negf %454 : vector<2x32xf32>
    %456 = math.exp %455 : vector<2x32xf32>
    %cst_71 = arith.constant 1.000000e+00 : f32
    %457 = vector.broadcast %cst_71 : f32 to vector<2x32xf32>
    %458 = arith.addf %457, %456 : vector<2x32xf32>
    %459 = arith.divf %457, %458 : vector<2x32xf32>
    %460 = vector.extract_strided_slice %442 {offsets = [0, 64], sizes = [2, 32], strides = [1, 1]} : vector<2x128xf32> to vector<2x32xf32>
    %461 = vector.extract_strided_slice %443 {offsets = [0, 64], sizes = [2, 32], strides = [1, 1]} : vector<2x128xf32> to vector<2x32xf32>
    %462 = vector.broadcast %8 : vector<1x32xf32> to vector<2x32xf32>
    %463 = arith.addf %461, %462 : vector<2x32xf32>
    %464 = arith.mulf %451, %463 : vector<2x32xf32>
    %465 = arith.addf %460, %464 : vector<2x32xf32>
    %466 = math.tanh %465 : vector<2x32xf32>
    %cst_72 = arith.constant 1.000000e+00 : f32
    %467 = vector.broadcast %cst_72 : f32 to vector<2x32xf32>
    %468 = arith.subf %467, %459 : vector<2x32xf32>
    %469 = arith.mulf %468, %466 : vector<2x32xf32>
    %470 = arith.mulf %459, %430 : vector<2x32xf32>
    %471 = arith.addf %469, %470 : vector<2x32xf32>
    %472 = vector.broadcast %9 : vector<1x32xf32> to vector<2x32xf32>
    %473 = arith.mulf %471, %472 : vector<2x32xf32>
    %cst_73 = arith.constant dense<0.000000e+00> : vector<2xf32>
    %474 = vector.multi_reduction <add>, %473, %cst_73 [1] : vector<2x32xf32> to vector<2xf32>
    %475 = vector.shape_cast %474 : vector<2xf32> to vector<2x1xf32>
    %476 = vector.broadcast %10 : f32 to vector<2x1xf32>
    %477 = arith.addf %475, %476 : vector<2x1xf32>
    %c21_i32 = arith.constant 21 : i32
    %478 = vector.broadcast %c21_i32 : i32 to vector<2x38xi32>
    %479 = arith.cmpi eq, %29, %478 : vector<2x38xi32>
    %480 = vector.shape_cast %477 : vector<2x1xf32> to vector<2x1xf32>
    %481 = vector.broadcast %480 : vector<2x1xf32> to vector<2x38xf32>
    %482 = arith.select %479, %481, %441 : vector<2x38xi1>, vector<2x38xf32>
    %483 = vector.extract_strided_slice %6 {offsets = [22, 0], sizes = [2, 128], strides = [1, 1]} : vector<32x128xf32> to vector<2x128xf32>
    %cst_74 = arith.constant dense<0.000000e+00> : vector<2x128xf32>
    %484 = tpu.matmul %471, %7, %cst_74 {dimension_numbers = #tpu.dot_dimension_numbers<[1], [0], [0], [1], [0, 0, 1, 1], [], []>} : vector<2x32xf32>, vector<32x128xf32>, vector<2x128xf32> -> vector<2x128xf32>
    %485 = vector.extract_strided_slice %483 {offsets = [0, 0], sizes = [2, 32], strides = [1, 1]} : vector<2x128xf32> to vector<2x32xf32>
    %486 = vector.extract_strided_slice %484 {offsets = [0, 0], sizes = [2, 32], strides = [1, 1]} : vector<2x128xf32> to vector<2x32xf32>
    %487 = arith.addf %485, %486 : vector<2x32xf32>
    %488 = arith.negf %487 : vector<2x32xf32>
    %489 = math.exp %488 : vector<2x32xf32>
    %cst_75 = arith.constant 1.000000e+00 : f32
    %490 = vector.broadcast %cst_75 : f32 to vector<2x32xf32>
    %491 = arith.addf %490, %489 : vector<2x32xf32>
    %492 = arith.divf %490, %491 : vector<2x32xf32>
    %493 = vector.extract_strided_slice %483 {offsets = [0, 32], sizes = [2, 32], strides = [1, 1]} : vector<2x128xf32> to vector<2x32xf32>
    %494 = vector.extract_strided_slice %484 {offsets = [0, 32], sizes = [2, 32], strides = [1, 1]} : vector<2x128xf32> to vector<2x32xf32>
    %495 = arith.addf %493, %494 : vector<2x32xf32>
    %496 = arith.negf %495 : vector<2x32xf32>
    %497 = math.exp %496 : vector<2x32xf32>
    %cst_76 = arith.constant 1.000000e+00 : f32
    %498 = vector.broadcast %cst_76 : f32 to vector<2x32xf32>
    %499 = arith.addf %498, %497 : vector<2x32xf32>
    %500 = arith.divf %498, %499 : vector<2x32xf32>
    %501 = vector.extract_strided_slice %483 {offsets = [0, 64], sizes = [2, 32], strides = [1, 1]} : vector<2x128xf32> to vector<2x32xf32>
    %502 = vector.extract_strided_slice %484 {offsets = [0, 64], sizes = [2, 32], strides = [1, 1]} : vector<2x128xf32> to vector<2x32xf32>
    %503 = vector.broadcast %8 : vector<1x32xf32> to vector<2x32xf32>
    %504 = arith.addf %502, %503 : vector<2x32xf32>
    %505 = arith.mulf %492, %504 : vector<2x32xf32>
    %506 = arith.addf %501, %505 : vector<2x32xf32>
    %507 = math.tanh %506 : vector<2x32xf32>
    %cst_77 = arith.constant 1.000000e+00 : f32
    %508 = vector.broadcast %cst_77 : f32 to vector<2x32xf32>
    %509 = arith.subf %508, %500 : vector<2x32xf32>
    %510 = arith.mulf %509, %507 : vector<2x32xf32>
    %511 = arith.mulf %500, %471 : vector<2x32xf32>
    %512 = arith.addf %510, %511 : vector<2x32xf32>
    %513 = vector.broadcast %9 : vector<1x32xf32> to vector<2x32xf32>
    %514 = arith.mulf %512, %513 : vector<2x32xf32>
    %cst_78 = arith.constant dense<0.000000e+00> : vector<2xf32>
    %515 = vector.multi_reduction <add>, %514, %cst_78 [1] : vector<2x32xf32> to vector<2xf32>
    %516 = vector.shape_cast %515 : vector<2xf32> to vector<2x1xf32>
    %517 = vector.broadcast %10 : f32 to vector<2x1xf32>
    %518 = arith.addf %516, %517 : vector<2x1xf32>
    %c22_i32 = arith.constant 22 : i32
    %519 = vector.broadcast %c22_i32 : i32 to vector<2x38xi32>
    %520 = arith.cmpi eq, %29, %519 : vector<2x38xi32>
    %521 = vector.shape_cast %518 : vector<2x1xf32> to vector<2x1xf32>
    %522 = vector.broadcast %521 : vector<2x1xf32> to vector<2x38xf32>
    %523 = arith.select %520, %522, %482 : vector<2x38xi1>, vector<2x38xf32>
    %524 = vector.extract_strided_slice %6 {offsets = [24, 0], sizes = [2, 128], strides = [1, 1]} : vector<32x128xf32> to vector<2x128xf32>
    %cst_79 = arith.constant dense<0.000000e+00> : vector<2x128xf32>
    %525 = tpu.matmul %512, %7, %cst_79 {dimension_numbers = #tpu.dot_dimension_numbers<[1], [0], [0], [1], [0, 0, 1, 1], [], []>} : vector<2x32xf32>, vector<32x128xf32>, vector<2x128xf32> -> vector<2x128xf32>
    %526 = vector.extract_strided_slice %524 {offsets = [0, 0], sizes = [2, 32], strides = [1, 1]} : vector<2x128xf32> to vector<2x32xf32>
    %527 = vector.extract_strided_slice %525 {offsets = [0, 0], sizes = [2, 32], strides = [1, 1]} : vector<2x128xf32> to vector<2x32xf32>
    %528 = arith.addf %526, %527 : vector<2x32xf32>
    %529 = arith.negf %528 : vector<2x32xf32>
    %530 = math.exp %529 : vector<2x32xf32>
    %cst_80 = arith.constant 1.000000e+00 : f32
    %531 = vector.broadcast %cst_80 : f32 to vector<2x32xf32>
    %532 = arith.addf %531, %530 : vector<2x32xf32>
    %533 = arith.divf %531, %532 : vector<2x32xf32>
    %534 = vector.extract_strided_slice %524 {offsets = [0, 32], sizes = [2, 32], strides = [1, 1]} : vector<2x128xf32> to vector<2x32xf32>
    %535 = vector.extract_strided_slice %525 {offsets = [0, 32], sizes = [2, 32], strides = [1, 1]} : vector<2x128xf32> to vector<2x32xf32>
    %536 = arith.addf %534, %535 : vector<2x32xf32>
    %537 = arith.negf %536 : vector<2x32xf32>
    %538 = math.exp %537 : vector<2x32xf32>
    %cst_81 = arith.constant 1.000000e+00 : f32
    %539 = vector.broadcast %cst_81 : f32 to vector<2x32xf32>
    %540 = arith.addf %539, %538 : vector<2x32xf32>
    %541 = arith.divf %539, %540 : vector<2x32xf32>
    %542 = vector.extract_strided_slice %524 {offsets = [0, 64], sizes = [2, 32], strides = [1, 1]} : vector<2x128xf32> to vector<2x32xf32>
    %543 = vector.extract_strided_slice %525 {offsets = [0, 64], sizes = [2, 32], strides = [1, 1]} : vector<2x128xf32> to vector<2x32xf32>
    %544 = vector.broadcast %8 : vector<1x32xf32> to vector<2x32xf32>
    %545 = arith.addf %543, %544 : vector<2x32xf32>
    %546 = arith.mulf %533, %545 : vector<2x32xf32>
    %547 = arith.addf %542, %546 : vector<2x32xf32>
    %548 = math.tanh %547 : vector<2x32xf32>
    %cst_82 = arith.constant 1.000000e+00 : f32
    %549 = vector.broadcast %cst_82 : f32 to vector<2x32xf32>
    %550 = arith.subf %549, %541 : vector<2x32xf32>
    %551 = arith.mulf %550, %548 : vector<2x32xf32>
    %552 = arith.mulf %541, %512 : vector<2x32xf32>
    %553 = arith.addf %551, %552 : vector<2x32xf32>
    %554 = vector.broadcast %9 : vector<1x32xf32> to vector<2x32xf32>
    %555 = arith.mulf %553, %554 : vector<2x32xf32>
    %cst_83 = arith.constant dense<0.000000e+00> : vector<2xf32>
    %556 = vector.multi_reduction <add>, %555, %cst_83 [1] : vector<2x32xf32> to vector<2xf32>
    %557 = vector.shape_cast %556 : vector<2xf32> to vector<2x1xf32>
    %558 = vector.broadcast %10 : f32 to vector<2x1xf32>
    %559 = arith.addf %557, %558 : vector<2x1xf32>
    %c23_i32 = arith.constant 23 : i32
    %560 = vector.broadcast %c23_i32 : i32 to vector<2x38xi32>
    %561 = arith.cmpi eq, %29, %560 : vector<2x38xi32>
    %562 = vector.shape_cast %559 : vector<2x1xf32> to vector<2x1xf32>
    %563 = vector.broadcast %562 : vector<2x1xf32> to vector<2x38xf32>
    %564 = arith.select %561, %563, %523 : vector<2x38xi1>, vector<2x38xf32>
    %565 = vector.extract_strided_slice %6 {offsets = [26, 0], sizes = [2, 128], strides = [1, 1]} : vector<32x128xf32> to vector<2x128xf32>
    %cst_84 = arith.constant dense<0.000000e+00> : vector<2x128xf32>
    %566 = tpu.matmul %553, %7, %cst_84 {dimension_numbers = #tpu.dot_dimension_numbers<[1], [0], [0], [1], [0, 0, 1, 1], [], []>} : vector<2x32xf32>, vector<32x128xf32>, vector<2x128xf32> -> vector<2x128xf32>
    %567 = vector.extract_strided_slice %565 {offsets = [0, 0], sizes = [2, 32], strides = [1, 1]} : vector<2x128xf32> to vector<2x32xf32>
    %568 = vector.extract_strided_slice %566 {offsets = [0, 0], sizes = [2, 32], strides = [1, 1]} : vector<2x128xf32> to vector<2x32xf32>
    %569 = arith.addf %567, %568 : vector<2x32xf32>
    %570 = arith.negf %569 : vector<2x32xf32>
    %571 = math.exp %570 : vector<2x32xf32>
    %cst_85 = arith.constant 1.000000e+00 : f32
    %572 = vector.broadcast %cst_85 : f32 to vector<2x32xf32>
    %573 = arith.addf %572, %571 : vector<2x32xf32>
    %574 = arith.divf %572, %573 : vector<2x32xf32>
    %575 = vector.extract_strided_slice %565 {offsets = [0, 32], sizes = [2, 32], strides = [1, 1]} : vector<2x128xf32> to vector<2x32xf32>
    %576 = vector.extract_strided_slice %566 {offsets = [0, 32], sizes = [2, 32], strides = [1, 1]} : vector<2x128xf32> to vector<2x32xf32>
    %577 = arith.addf %575, %576 : vector<2x32xf32>
    %578 = arith.negf %577 : vector<2x32xf32>
    %579 = math.exp %578 : vector<2x32xf32>
    %cst_86 = arith.constant 1.000000e+00 : f32
    %580 = vector.broadcast %cst_86 : f32 to vector<2x32xf32>
    %581 = arith.addf %580, %579 : vector<2x32xf32>
    %582 = arith.divf %580, %581 : vector<2x32xf32>
    %583 = vector.extract_strided_slice %565 {offsets = [0, 64], sizes = [2, 32], strides = [1, 1]} : vector<2x128xf32> to vector<2x32xf32>
    %584 = vector.extract_strided_slice %566 {offsets = [0, 64], sizes = [2, 32], strides = [1, 1]} : vector<2x128xf32> to vector<2x32xf32>
    %585 = vector.broadcast %8 : vector<1x32xf32> to vector<2x32xf32>
    %586 = arith.addf %584, %585 : vector<2x32xf32>
    %587 = arith.mulf %574, %586 : vector<2x32xf32>
    %588 = arith.addf %583, %587 : vector<2x32xf32>
    %589 = math.tanh %588 : vector<2x32xf32>
    %cst_87 = arith.constant 1.000000e+00 : f32
    %590 = vector.broadcast %cst_87 : f32 to vector<2x32xf32>
    %591 = arith.subf %590, %582 : vector<2x32xf32>
    %592 = arith.mulf %591, %589 : vector<2x32xf32>
    %593 = arith.mulf %582, %553 : vector<2x32xf32>
    %594 = arith.addf %592, %593 : vector<2x32xf32>
    %595 = vector.broadcast %9 : vector<1x32xf32> to vector<2x32xf32>
    %596 = arith.mulf %594, %595 : vector<2x32xf32>
    %cst_88 = arith.constant dense<0.000000e+00> : vector<2xf32>
    %597 = vector.multi_reduction <add>, %596, %cst_88 [1] : vector<2x32xf32> to vector<2xf32>
    %598 = vector.shape_cast %597 : vector<2xf32> to vector<2x1xf32>
    %599 = vector.broadcast %10 : f32 to vector<2x1xf32>
    %600 = arith.addf %598, %599 : vector<2x1xf32>
    %c24_i32 = arith.constant 24 : i32
    %601 = vector.broadcast %c24_i32 : i32 to vector<2x38xi32>
    %602 = arith.cmpi eq, %29, %601 : vector<2x38xi32>
    %603 = vector.shape_cast %600 : vector<2x1xf32> to vector<2x1xf32>
    %604 = vector.broadcast %603 : vector<2x1xf32> to vector<2x38xf32>
    %605 = arith.select %602, %604, %564 : vector<2x38xi1>, vector<2x38xf32>
    %606 = vector.extract_strided_slice %6 {offsets = [28, 0], sizes = [2, 128], strides = [1, 1]} : vector<32x128xf32> to vector<2x128xf32>
    %cst_89 = arith.constant dense<0.000000e+00> : vector<2x128xf32>
    %607 = tpu.matmul %594, %7, %cst_89 {dimension_numbers = #tpu.dot_dimension_numbers<[1], [0], [0], [1], [0, 0, 1, 1], [], []>} : vector<2x32xf32>, vector<32x128xf32>, vector<2x128xf32> -> vector<2x128xf32>
    %608 = vector.extract_strided_slice %606 {offsets = [0, 0], sizes = [2, 32], strides = [1, 1]} : vector<2x128xf32> to vector<2x32xf32>
    %609 = vector.extract_strided_slice %607 {offsets = [0, 0], sizes = [2, 32], strides = [1, 1]} : vector<2x128xf32> to vector<2x32xf32>
    %610 = arith.addf %608, %609 : vector<2x32xf32>
    %611 = arith.negf %610 : vector<2x32xf32>
    %612 = math.exp %611 : vector<2x32xf32>
    %cst_90 = arith.constant 1.000000e+00 : f32
    %613 = vector.broadcast %cst_90 : f32 to vector<2x32xf32>
    %614 = arith.addf %613, %612 : vector<2x32xf32>
    %615 = arith.divf %613, %614 : vector<2x32xf32>
    %616 = vector.extract_strided_slice %606 {offsets = [0, 32], sizes = [2, 32], strides = [1, 1]} : vector<2x128xf32> to vector<2x32xf32>
    %617 = vector.extract_strided_slice %607 {offsets = [0, 32], sizes = [2, 32], strides = [1, 1]} : vector<2x128xf32> to vector<2x32xf32>
    %618 = arith.addf %616, %617 : vector<2x32xf32>
    %619 = arith.negf %618 : vector<2x32xf32>
    %620 = math.exp %619 : vector<2x32xf32>
    %cst_91 = arith.constant 1.000000e+00 : f32
    %621 = vector.broadcast %cst_91 : f32 to vector<2x32xf32>
    %622 = arith.addf %621, %620 : vector<2x32xf32>
    %623 = arith.divf %621, %622 : vector<2x32xf32>
    %624 = vector.extract_strided_slice %606 {offsets = [0, 64], sizes = [2, 32], strides = [1, 1]} : vector<2x128xf32> to vector<2x32xf32>
    %625 = vector.extract_strided_slice %607 {offsets = [0, 64], sizes = [2, 32], strides = [1, 1]} : vector<2x128xf32> to vector<2x32xf32>
    %626 = vector.broadcast %8 : vector<1x32xf32> to vector<2x32xf32>
    %627 = arith.addf %625, %626 : vector<2x32xf32>
    %628 = arith.mulf %615, %627 : vector<2x32xf32>
    %629 = arith.addf %624, %628 : vector<2x32xf32>
    %630 = math.tanh %629 : vector<2x32xf32>
    %cst_92 = arith.constant 1.000000e+00 : f32
    %631 = vector.broadcast %cst_92 : f32 to vector<2x32xf32>
    %632 = arith.subf %631, %623 : vector<2x32xf32>
    %633 = arith.mulf %632, %630 : vector<2x32xf32>
    %634 = arith.mulf %623, %594 : vector<2x32xf32>
    %635 = arith.addf %633, %634 : vector<2x32xf32>
    %636 = vector.broadcast %9 : vector<1x32xf32> to vector<2x32xf32>
    %637 = arith.mulf %635, %636 : vector<2x32xf32>
    %cst_93 = arith.constant dense<0.000000e+00> : vector<2xf32>
    %638 = vector.multi_reduction <add>, %637, %cst_93 [1] : vector<2x32xf32> to vector<2xf32>
    %639 = vector.shape_cast %638 : vector<2xf32> to vector<2x1xf32>
    %640 = vector.broadcast %10 : f32 to vector<2x1xf32>
    %641 = arith.addf %639, %640 : vector<2x1xf32>
    %c25_i32 = arith.constant 25 : i32
    %642 = vector.broadcast %c25_i32 : i32 to vector<2x38xi32>
    %643 = arith.cmpi eq, %29, %642 : vector<2x38xi32>
    %644 = vector.shape_cast %641 : vector<2x1xf32> to vector<2x1xf32>
    %645 = vector.broadcast %644 : vector<2x1xf32> to vector<2x38xf32>
    %646 = arith.select %643, %645, %605 : vector<2x38xi1>, vector<2x38xf32>
    %647 = vector.extract_strided_slice %6 {offsets = [30, 0], sizes = [2, 128], strides = [1, 1]} : vector<32x128xf32> to vector<2x128xf32>
    %cst_94 = arith.constant dense<0.000000e+00> : vector<2x128xf32>
    %648 = tpu.matmul %635, %7, %cst_94 {dimension_numbers = #tpu.dot_dimension_numbers<[1], [0], [0], [1], [0, 0, 1, 1], [], []>} : vector<2x32xf32>, vector<32x128xf32>, vector<2x128xf32> -> vector<2x128xf32>
    %649 = vector.extract_strided_slice %647 {offsets = [0, 0], sizes = [2, 32], strides = [1, 1]} : vector<2x128xf32> to vector<2x32xf32>
    %650 = vector.extract_strided_slice %648 {offsets = [0, 0], sizes = [2, 32], strides = [1, 1]} : vector<2x128xf32> to vector<2x32xf32>
    %651 = arith.addf %649, %650 : vector<2x32xf32>
    %652 = arith.negf %651 : vector<2x32xf32>
    %653 = math.exp %652 : vector<2x32xf32>
    %cst_95 = arith.constant 1.000000e+00 : f32
    %654 = vector.broadcast %cst_95 : f32 to vector<2x32xf32>
    %655 = arith.addf %654, %653 : vector<2x32xf32>
    %656 = arith.divf %654, %655 : vector<2x32xf32>
    %657 = vector.extract_strided_slice %647 {offsets = [0, 32], sizes = [2, 32], strides = [1, 1]} : vector<2x128xf32> to vector<2x32xf32>
    %658 = vector.extract_strided_slice %648 {offsets = [0, 32], sizes = [2, 32], strides = [1, 1]} : vector<2x128xf32> to vector<2x32xf32>
    %659 = arith.addf %657, %658 : vector<2x32xf32>
    %660 = arith.negf %659 : vector<2x32xf32>
    %661 = math.exp %660 : vector<2x32xf32>
    %cst_96 = arith.constant 1.000000e+00 : f32
    %662 = vector.broadcast %cst_96 : f32 to vector<2x32xf32>
    %663 = arith.addf %662, %661 : vector<2x32xf32>
    %664 = arith.divf %662, %663 : vector<2x32xf32>
    %665 = vector.extract_strided_slice %647 {offsets = [0, 64], sizes = [2, 32], strides = [1, 1]} : vector<2x128xf32> to vector<2x32xf32>
    %666 = vector.extract_strided_slice %648 {offsets = [0, 64], sizes = [2, 32], strides = [1, 1]} : vector<2x128xf32> to vector<2x32xf32>
    %667 = vector.broadcast %8 : vector<1x32xf32> to vector<2x32xf32>
    %668 = arith.addf %666, %667 : vector<2x32xf32>
    %669 = arith.mulf %656, %668 : vector<2x32xf32>
    %670 = arith.addf %665, %669 : vector<2x32xf32>
    %671 = math.tanh %670 : vector<2x32xf32>
    %cst_97 = arith.constant 1.000000e+00 : f32
    %672 = vector.broadcast %cst_97 : f32 to vector<2x32xf32>
    %673 = arith.subf %672, %664 : vector<2x32xf32>
    %674 = arith.mulf %673, %671 : vector<2x32xf32>
    %675 = arith.mulf %664, %635 : vector<2x32xf32>
    %676 = arith.addf %674, %675 : vector<2x32xf32>
    %677 = vector.broadcast %9 : vector<1x32xf32> to vector<2x32xf32>
    %678 = arith.mulf %676, %677 : vector<2x32xf32>
    %cst_98 = arith.constant dense<0.000000e+00> : vector<2xf32>
    %679 = vector.multi_reduction <add>, %678, %cst_98 [1] : vector<2x32xf32> to vector<2xf32>
    %680 = vector.shape_cast %679 : vector<2xf32> to vector<2x1xf32>
    %681 = vector.broadcast %10 : f32 to vector<2x1xf32>
    %682 = arith.addf %680, %681 : vector<2x1xf32>
    %c26_i32 = arith.constant 26 : i32
    %683 = vector.broadcast %c26_i32 : i32 to vector<2x38xi32>
    %684 = arith.cmpi eq, %29, %683 : vector<2x38xi32>
    %685 = vector.shape_cast %682 : vector<2x1xf32> to vector<2x1xf32>
    %686 = vector.broadcast %685 : vector<2x1xf32> to vector<2x38xf32>
    %687 = arith.select %684, %686, %646 : vector<2x38xi1>, vector<2x38xf32>
    %c11_i32_99 = arith.constant 11 : i32
    %688 = vector.broadcast %c11_i32_99 : i32 to vector<2x38xi32>
    %689 = arith.subi %29, %688 : vector<2x38xi32>
    %c0_i32_100 = arith.constant 0 : i32
    %690 = vector.broadcast %c0_i32_100 : i32 to vector<2x38xi32>
    %691 = arith.cmpi sge, %689, %690 : vector<2x38xi32>
    %692 = vector.broadcast %28 : vector<2x1xi32> to vector<2x38xi32>
    %693 = arith.cmpi slt, %689, %692 : vector<2x38xi32>
    %694 = arith.andi %691, %693 : vector<2x38xi1>
    %cst_101 = arith.constant 0.000000e+00 : f32
    %695 = vector.broadcast %cst_101 : f32 to vector<2x38xf32>
    %696 = arith.subf %695, %687 : vector<2x38xf32>
    %697 = math.exp %696 : vector<2x38xf32>
    %cst_102 = arith.constant 0x7F800000 : f32
    %698 = vector.broadcast %cst_102 : f32 to vector<2x38xf32>
    %699 = arith.select %694, %687, %698 : vector<2x38xi1>, vector<2x38xf32>
    %cst_103 = arith.constant 0.000000e+00 : f32
    %700 = vector.broadcast %cst_103 : f32 to vector<2x38xf32>
    %701 = arith.select %694, %697, %700 : vector<2x38xi1>, vector<2x38xf32>
    %702 = arith.mulf %687, %697 : vector<2x38xf32>
    %cst_104 = arith.constant 0.000000e+00 : f32
    %703 = vector.broadcast %cst_104 : f32 to vector<2x38xf32>
    %704 = arith.select %694, %702, %703 : vector<2x38xi1>, vector<2x38xf32>
    %cst_105 = arith.constant 0x7F800000 : f32
    %705 = vector.broadcast %cst_105 : f32 to vector<2x16xf32>
    %cst_106 = arith.constant 0.000000e+00 : f32
    %706 = vector.broadcast %cst_106 : f32 to vector<2x16xf32>
    %cst_107 = arith.constant 0.000000e+00 : f32
    %707 = vector.broadcast %cst_107 : f32 to vector<2x16xf32>
    %708 = vector.extract_strided_slice %699 {offsets = [0, 11], sizes = [2, 16], strides = [1, 1]} : vector<2x38xf32> to vector<2x16xf32>
    %709 = arith.minimumf %705, %708 : vector<2x16xf32>
    %710 = vector.extract_strided_slice %704 {offsets = [0, 11], sizes = [2, 16], strides = [1, 1]} : vector<2x38xf32> to vector<2x16xf32>
    %711 = arith.addf %706, %710 : vector<2x16xf32>
    %712 = vector.extract_strided_slice %701 {offsets = [0, 11], sizes = [2, 16], strides = [1, 1]} : vector<2x38xf32> to vector<2x16xf32>
    %713 = arith.addf %707, %712 : vector<2x16xf32>
    %714 = vector.extract_strided_slice %699 {offsets = [0, 10], sizes = [2, 16], strides = [1, 1]} : vector<2x38xf32> to vector<2x16xf32>
    %715 = arith.minimumf %709, %714 : vector<2x16xf32>
    %716 = vector.extract_strided_slice %704 {offsets = [0, 12], sizes = [2, 16], strides = [1, 1]} : vector<2x38xf32> to vector<2x16xf32>
    %717 = arith.addf %711, %716 : vector<2x16xf32>
    %718 = vector.extract_strided_slice %701 {offsets = [0, 12], sizes = [2, 16], strides = [1, 1]} : vector<2x38xf32> to vector<2x16xf32>
    %719 = arith.addf %713, %718 : vector<2x16xf32>
    %720 = vector.extract_strided_slice %699 {offsets = [0, 9], sizes = [2, 16], strides = [1, 1]} : vector<2x38xf32> to vector<2x16xf32>
    %721 = arith.minimumf %715, %720 : vector<2x16xf32>
    %722 = vector.extract_strided_slice %704 {offsets = [0, 13], sizes = [2, 16], strides = [1, 1]} : vector<2x38xf32> to vector<2x16xf32>
    %723 = arith.addf %717, %722 : vector<2x16xf32>
    %724 = vector.extract_strided_slice %701 {offsets = [0, 13], sizes = [2, 16], strides = [1, 1]} : vector<2x38xf32> to vector<2x16xf32>
    %725 = arith.addf %719, %724 : vector<2x16xf32>
    %726 = vector.extract_strided_slice %699 {offsets = [0, 8], sizes = [2, 16], strides = [1, 1]} : vector<2x38xf32> to vector<2x16xf32>
    %727 = arith.minimumf %721, %726 : vector<2x16xf32>
    %728 = vector.extract_strided_slice %704 {offsets = [0, 14], sizes = [2, 16], strides = [1, 1]} : vector<2x38xf32> to vector<2x16xf32>
    %729 = arith.addf %723, %728 : vector<2x16xf32>
    %730 = vector.extract_strided_slice %701 {offsets = [0, 14], sizes = [2, 16], strides = [1, 1]} : vector<2x38xf32> to vector<2x16xf32>
    %731 = arith.addf %725, %730 : vector<2x16xf32>
    %732 = vector.extract_strided_slice %699 {offsets = [0, 7], sizes = [2, 16], strides = [1, 1]} : vector<2x38xf32> to vector<2x16xf32>
    %733 = arith.minimumf %727, %732 : vector<2x16xf32>
    %734 = vector.extract_strided_slice %704 {offsets = [0, 15], sizes = [2, 16], strides = [1, 1]} : vector<2x38xf32> to vector<2x16xf32>
    %735 = arith.addf %729, %734 : vector<2x16xf32>
    %736 = vector.extract_strided_slice %701 {offsets = [0, 15], sizes = [2, 16], strides = [1, 1]} : vector<2x38xf32> to vector<2x16xf32>
    %737 = arith.addf %731, %736 : vector<2x16xf32>
    %738 = vector.extract_strided_slice %699 {offsets = [0, 6], sizes = [2, 16], strides = [1, 1]} : vector<2x38xf32> to vector<2x16xf32>
    %739 = arith.minimumf %733, %738 : vector<2x16xf32>
    %740 = vector.extract_strided_slice %704 {offsets = [0, 16], sizes = [2, 16], strides = [1, 1]} : vector<2x38xf32> to vector<2x16xf32>
    %741 = arith.addf %735, %740 : vector<2x16xf32>
    %742 = vector.extract_strided_slice %701 {offsets = [0, 16], sizes = [2, 16], strides = [1, 1]} : vector<2x38xf32> to vector<2x16xf32>
    %743 = arith.addf %737, %742 : vector<2x16xf32>
    %744 = vector.extract_strided_slice %699 {offsets = [0, 5], sizes = [2, 16], strides = [1, 1]} : vector<2x38xf32> to vector<2x16xf32>
    %745 = arith.minimumf %739, %744 : vector<2x16xf32>
    %746 = vector.extract_strided_slice %704 {offsets = [0, 17], sizes = [2, 16], strides = [1, 1]} : vector<2x38xf32> to vector<2x16xf32>
    %747 = arith.addf %741, %746 : vector<2x16xf32>
    %748 = vector.extract_strided_slice %701 {offsets = [0, 17], sizes = [2, 16], strides = [1, 1]} : vector<2x38xf32> to vector<2x16xf32>
    %749 = arith.addf %743, %748 : vector<2x16xf32>
    %750 = vector.extract_strided_slice %699 {offsets = [0, 4], sizes = [2, 16], strides = [1, 1]} : vector<2x38xf32> to vector<2x16xf32>
    %751 = arith.minimumf %745, %750 : vector<2x16xf32>
    %752 = vector.extract_strided_slice %704 {offsets = [0, 18], sizes = [2, 16], strides = [1, 1]} : vector<2x38xf32> to vector<2x16xf32>
    %753 = arith.addf %747, %752 : vector<2x16xf32>
    %754 = vector.extract_strided_slice %701 {offsets = [0, 18], sizes = [2, 16], strides = [1, 1]} : vector<2x38xf32> to vector<2x16xf32>
    %755 = arith.addf %749, %754 : vector<2x16xf32>
    %756 = vector.extract_strided_slice %699 {offsets = [0, 3], sizes = [2, 16], strides = [1, 1]} : vector<2x38xf32> to vector<2x16xf32>
    %757 = arith.minimumf %751, %756 : vector<2x16xf32>
    %758 = vector.extract_strided_slice %704 {offsets = [0, 19], sizes = [2, 16], strides = [1, 1]} : vector<2x38xf32> to vector<2x16xf32>
    %759 = arith.addf %753, %758 : vector<2x16xf32>
    %760 = vector.extract_strided_slice %701 {offsets = [0, 19], sizes = [2, 16], strides = [1, 1]} : vector<2x38xf32> to vector<2x16xf32>
    %761 = arith.addf %755, %760 : vector<2x16xf32>
    %762 = vector.extract_strided_slice %699 {offsets = [0, 2], sizes = [2, 16], strides = [1, 1]} : vector<2x38xf32> to vector<2x16xf32>
    %763 = arith.minimumf %757, %762 : vector<2x16xf32>
    %764 = vector.extract_strided_slice %704 {offsets = [0, 20], sizes = [2, 16], strides = [1, 1]} : vector<2x38xf32> to vector<2x16xf32>
    %765 = arith.addf %759, %764 : vector<2x16xf32>
    %766 = vector.extract_strided_slice %701 {offsets = [0, 20], sizes = [2, 16], strides = [1, 1]} : vector<2x38xf32> to vector<2x16xf32>
    %767 = arith.addf %761, %766 : vector<2x16xf32>
    %768 = vector.extract_strided_slice %699 {offsets = [0, 1], sizes = [2, 16], strides = [1, 1]} : vector<2x38xf32> to vector<2x16xf32>
    %769 = arith.minimumf %763, %768 : vector<2x16xf32>
    %770 = vector.extract_strided_slice %704 {offsets = [0, 21], sizes = [2, 16], strides = [1, 1]} : vector<2x38xf32> to vector<2x16xf32>
    %771 = arith.addf %765, %770 : vector<2x16xf32>
    %772 = vector.extract_strided_slice %701 {offsets = [0, 21], sizes = [2, 16], strides = [1, 1]} : vector<2x38xf32> to vector<2x16xf32>
    %773 = arith.addf %767, %772 : vector<2x16xf32>
    %774 = vector.extract_strided_slice %699 {offsets = [0, 0], sizes = [2, 16], strides = [1, 1]} : vector<2x38xf32> to vector<2x16xf32>
    %775 = arith.minimumf %769, %774 : vector<2x16xf32>
    %776 = vector.extract_strided_slice %704 {offsets = [0, 22], sizes = [2, 16], strides = [1, 1]} : vector<2x38xf32> to vector<2x16xf32>
    %777 = arith.addf %771, %776 : vector<2x16xf32>
    %778 = vector.extract_strided_slice %701 {offsets = [0, 22], sizes = [2, 16], strides = [1, 1]} : vector<2x38xf32> to vector<2x16xf32>
    %779 = arith.addf %773, %778 : vector<2x16xf32>
    %780 = tpu.iota {dimensions = array<i32: 1>} : vector<2x16xi32>
    %781 = vector.broadcast %28 : vector<2x1xi32> to vector<2x16xi32>
    %782 = arith.cmpi slt, %780, %781 : vector<2x16xi32>
    %cst_108 = arith.constant 0.000000e+00 : f32
    %783 = vector.broadcast %cst_108 : f32 to vector<2x16xf32>
    %784 = arith.cmpf ogt, %779, %783 : vector<2x16xf32>
    %cst_109 = arith.constant 1.000000e+00 : f32
    %785 = vector.broadcast %cst_109 : f32 to vector<2x16xf32>
    %786 = arith.select %784, %779, %785 : vector<2x16xi1>, vector<2x16xf32>
    %787 = arith.divf %777, %786 : vector<2x16xf32>
    %cst_110 = arith.constant 0.000000e+00 : f32
    %788 = vector.broadcast %cst_110 : f32 to vector<2x16xf32>
    %789 = arith.select %782, %787, %788 : vector<2x16xi1>, vector<2x16xf32>
    %cst_111 = arith.constant 0.000000e+00 : f32
    %790 = vector.broadcast %cst_111 : f32 to vector<2x16xf32>
    %791 = arith.select %782, %775, %790 : vector<2x16xi1>, vector<2x16xf32>
    %cst_112 = arith.constant 5.000000e-01 : f32
    %792 = vector.broadcast %cst_112 : f32 to vector<2x16xf32>
    %793 = arith.mulf %792, %789 : vector<2x16xf32>
    %cst_113 = arith.constant 5.000000e-01 : f32
    %794 = vector.broadcast %cst_113 : f32 to vector<2x16xf32>
    %795 = arith.mulf %794, %791 : vector<2x16xf32>
    %796 = arith.addf %793, %795 : vector<2x16xf32>
    %c1_i32_114 = arith.constant 1 : i32
    %797 = vector.broadcast %c1_i32_114 : i32 to vector<2x1xi32>
    %798 = arith.maxsi %28, %797 : vector<2x1xi32>
    %799 = arith.sitofp %798 : vector<2x1xi32> to vector<2x1xf32>
    %cst_115 = arith.constant dense<0.000000e+00> : vector<2xf32>
    %800 = vector.multi_reduction <add>, %796, %cst_115 [1] : vector<2x16xf32> to vector<2xf32>
    %801 = vector.shape_cast %800 : vector<2xf32> to vector<2x1xf32>
    %802 = arith.divf %801, %799 : vector<2x1xf32>
    %803 = arith.negf %802 : vector<2x1xf32>
    %804 = math.exp %803 : vector<2x1xf32>
    %cst_116 = arith.constant 1.000000e+00 : f32
    %805 = vector.broadcast %cst_116 : f32 to vector<2x1xf32>
    %806 = arith.addf %805, %804 : vector<2x1xf32>
    %807 = arith.divf %805, %806 : vector<2x1xf32>
    %cst_117 = arith.constant 3.46410155 : f32
    %808 = vector.broadcast %cst_117 : f32 to vector<2x1xf32>
    %809 = arith.mulf %808, %807 : vector<2x1xf32>
    %cst_118 = arith.constant 1.73205078 : f32
    %810 = vector.broadcast %cst_118 : f32 to vector<2x1xf32>
    %811 = arith.subf %809, %810 : vector<2x1xf32>
    %812 = arith.negf %811 : vector<2x1xf32>
    %813 = math.exp %812 : vector<2x1xf32>
    %cst_119 = arith.constant 1.000000e+00 : f32
    %814 = vector.broadcast %cst_119 : f32 to vector<2x1xf32>
    %815 = arith.addf %814, %813 : vector<2x1xf32>
    %816 = arith.divf %814, %815 : vector<2x1xf32>
    %cst_120 = arith.constant 1.000000e+00 : f32
    %817 = vector.broadcast %cst_120 : f32 to vector<2x1xf32>
    %818 = arith.mulf %817, %816 : vector<2x1xf32>
    %cst_121 = arith.constant 0.000000e+00 : f32
    %819 = vector.broadcast %cst_121 : f32 to vector<2x1xf32>
    %820 = arith.addf %818, %819 : vector<2x1xf32>
    %821 = tpu.iota {dimensions = array<i32: 1>} : vector<2x128xi32>
    %c0_i32_122 = arith.constant 0 : i32
    %822 = vector.broadcast %c0_i32_122 : i32 to vector<2x128xi32>
    %823 = arith.cmpi eq, %821, %822 : vector<2x128xi32>
    %c1_i32_123 = arith.constant 1 : i32
    %824 = vector.broadcast %c1_i32_123 : i32 to vector<2x128xi32>
    %825 = arith.cmpi eq, %821, %824 : vector<2x128xi32>
    %826 = vector.shape_cast %816 : vector<2x1xf32> to vector<2x1xf32>
    %827 = vector.broadcast %826 : vector<2x1xf32> to vector<2x128xf32>
    %828 = vector.shape_cast %820 : vector<2x1xf32> to vector<2x1xf32>
    %829 = vector.broadcast %828 : vector<2x1xf32> to vector<2x128xf32>
    %830 = arith.select %825, %827, %829 : vector<2x128xi1>, vector<2x128xf32>
    %831 = vector.shape_cast %807 : vector<2x1xf32> to vector<2x1xf32>
    %832 = vector.broadcast %831 : vector<2x1xf32> to vector<2x128xf32>
    %833 = arith.select %823, %832, %830 : vector<2x128xi1>, vector<2x128xf32>
    %cst_124 = arith.constant 0.000000e+00 : f32
    %834 = vector.broadcast %cst_124 : f32 to vector<6x128xf32>
    %835 = tpu.concatenate %833, %834 in 0 : vector<2x128xf32>, vector<6x128xf32> -> vector<8x128xf32>
    %c0_125 = arith.constant 0 : index
    %c0_126 = arith.constant 0 : index
    %c0_127 = arith.constant 0 : index
    %836 = vector.load %arg9[%c0_125, %c0_126, %c0_127] : memref<1x8x128xf32, #tpu.memory_space<vmem>>, vector<1x8x128xf32>
    %837 = vector.shape_cast %836 : vector<1x8x128xf32> to vector<8x128xf32>
    %838 = vector.shape_cast %835 : vector<8x128xf32> to vector<1x8x128xf32>
    tpu.vector_store %arg9[%c0_125, %c0_126, %c0_127], %838 {strides = array<i32>} : memref<1x8x128xf32, #tpu.memory_space<vmem>>, vector<1x8x128xf32>,
    return
  }
  func.func @transform_0(%arg0: i32, %arg1: memref<4xi32, #tpu.memory_space<smem>>) -> (i32, i32, i32) {
    %c0_i32 = arith.constant 0 : i32
    %c0_i32_0 = arith.constant 0 : i32
    %c0_i32_1 = arith.constant 0 : i32
    return %arg0, %c0_i32, %c0_i32_0 : i32, i32, i32
  }
  func.func @transform_1(%arg0: i32, %arg1: memref<4xi32, #tpu.memory_space<smem>>) -> (i32, i32) {
    %c0_i32 = arith.constant 0 : i32
    %c0_i32_0 = arith.constant 0 : i32
    %c0_i32_1 = arith.constant 0 : i32
    return %c0_i32, %c0_i32_0 : i32, i32
  }
  func.func @transform_2(%arg0: i32, %arg1: memref<4xi32, #tpu.memory_space<smem>>) -> (i32, i32) {
    %c0_i32 = arith.constant 0 : i32
    %c0_i32_0 = arith.constant 0 : i32
    %c0_i32_1 = arith.constant 0 : i32
    return %c0_i32, %c0_i32_0 : i32, i32
  }
  func.func @transform_3(%arg0: i32, %arg1: memref<4xi32, #tpu.memory_space<smem>>) -> (i32, i32) {
    %c0_i32 = arith.constant 0 : i32
    %c0_i32_0 = arith.constant 0 : i32
    %c0_i32_1 = arith.constant 0 : i32
    return %c0_i32, %c0_i32_0 : i32, i32
  }
  func.func @transform_4(%arg0: i32, %arg1: memref<4xi32, #tpu.memory_space<smem>>) -> (i32, i32) {
    %c0_i32 = arith.constant 0 : i32
    %c0_i32_0 = arith.constant 0 : i32
    %c0_i32_1 = arith.constant 0 : i32
    return %c0_i32, %c0_i32_0 : i32, i32
  }
  func.func @transform_5(%arg0: i32, %arg1: memref<4xi32, #tpu.memory_space<smem>>) -> (i32, i32) {
    %c0_i32 = arith.constant 0 : i32
    %c0_i32_0 = arith.constant 0 : i32
    %c0_i32_1 = arith.constant 0 : i32
    return %c0_i32, %c0_i32_0 : i32, i32
  }
  func.func @transform_6(%arg0: i32, %arg1: memref<4xi32, #tpu.memory_space<smem>>) -> i32 {
    %c0_i32 = arith.constant 0 : i32
    %c0_i32_0 = arith.constant 0 : i32
    return %c0_i32 : i32
  }
  func.func @transform_7(%arg0: i32, %arg1: memref<4xi32, #tpu.memory_space<smem>>) -> (i32, i32, i32) {
    %c0_i32 = arith.constant 0 : i32
    %c0_i32_0 = arith.constant 0 : i32
    %c0_i32_1 = arith.constant 0 : i32
    return %arg0, %c0_i32, %c0_i32_0 : i32, i32, i32
  }
}

</mosaic_0001>

<bundles_post_ra>
// kernel: tpu_custom_call.1
= control target key start
LH: loop header
LB: loop body
LE: loop exit
PB: predicated region body
PF: predicated region fallthrough
CT: control target
= control target key end

     0   :  { %s4429_s0 = inlined_call_operand.vmem [shape: s32[4], index: 0, kind: input, shape index: {}]   ;;  %s4430_s1 = inlined_call_operand.hbm [shape: bf16[2,32,256], index: 1, kind: input, shape index: {}]   ;;  %s4431_s2 = inlined_call_operand.hbm [shape: bf16[256,128], index: 2, kind: input, shape index: {}]   ;;  %s4432_s3 = inlined_call_operand.vmem [shape: f32[1,128], index: 3, kind: input, shape index: {}]   ;;  %s4433_s4 = inlined_call_operand.hbm [shape: f32[32,128], index: 4, kind: input, shape index: {}]   ;;  %s4434_s5 = inlined_call_operand.vmem [shape: f32[1,32], index: 5, kind: input, shape index: {}]   ;;  %s4435_s6 = inlined_call_operand.vmem [shape: f32[1,32], index: 6, kind: input, shape index: {}]   ;;  %s4436_s7 = inlined_call_operand.<no memory space> [shape: f32[1], index: 7, kind: input, shape index: {}]   ;;  %s4437_s8 = inlined_call_operand.hbm [shape: f32[2,8,128], index: 8, kind: output, shape index: {}]  }
   0x1   :  { %s13_s29 = sshll.u32 %s4429_s0, 4  ;;  %17 = sst [smem:[#allocation4]] %s4436_s7  ;;  %s14_s29 = int_to_ptr.vmem [resolvable:$true] %s13_s29 }
   0x2   :  { %s3428_s10 = scalar_lea.vmem %s14_s29, 16  ;;  %p3433_p1 = scmp.lt.s32.totalorder %s14_s29, %s14_s29 }
   0x3   :  { %p3429_p0 = scmp.ne.s32.totalorder %s14_s29, %s3428_s10  ;;  %p3434_p2 = scmp.lt.s32.totalorder %s3428_s10, %s3428_s10 }
   0x5   :  { %p3435_p3 = por %p3434_p2, %p3433_p1 }
   0x7   :  { %p3436_p4 = pnand %p3435_p3, %p3429_p0 }
   0x9   :  { %3439 = shalt.err (!%p3436_p4)  }
   0xa   :  { %s3592_s11 = smov [#allocation3]  }
   0xb   :  { %16 = dma.vmem_to_smem %s14_s29, 16, %s3592_s11, [#allocation2] }
   0xc   :  { %3562 = dma.done.wait [#allocation2], 16 }
   0xd   :  { %3563 = vsyncadd [#allocation2], 4294967280 }
   0xe   :  { %19 = sfence }
   0xf   :  { %20 = vsyncpa [#allocation6], 0 }
  0x10   :  { %22 = vsyncpa [#allocation6 + $0x1], 0 }
  0x11   :  { %23 = vsyncpa [#allocation9], 0 }
  0x12   :  { %24 = vsyncpa [#allocation7], 0 }
  0x13   :  { %26 = vsyncpa [#allocation7 + $0x1], 0  ;;  %s3679_s0 = smov 0   ;;  %s3681_s7 = smov 0  }
  0x14   :  { %s3683_s12 = smov 0   ;;  %s3685_s13 = smov 0  }
  0x15 LB: > { %s3700_s14 = sadd.s32 4294967295, %s3590_s13   ;;  %s2832_s15 = sadd.s32 4294967294, %s3590_s13   ;;  %s3590_s13 = sphi %s3685_s13, %s4465_s13   ;;  %s3586_s12 = sphi %s3683_s12, %s4464_s12   ;;  %s3582_s7 = sphi %s3681_s7, %s4463_s7   ;;  %s3578_s0 = sphi %s3679_s0, %s4462_s0  }
  0x16   : > { %p52_p5 = scmp.ne.s32.totalorder %s3582_s7, %s3578_s0  ;;  %p4438_p6 = scmp.eq.s32.totalorder %s3700_s14, 0 }
  0x17   : > { %p208_p8 = scmp.eq.s32.totalorder %s2832_s15, 1  ;;  %p2833_p10 = scmp.ge.s32.totalorder %s3590_s13, 1 }
  0x18   : > { %p3709_p9 = por %p4438_p6, %p52_p5  ;;  %p215_p12 = scmp.lt.s32.totalorder %s3590_s13, 3 }
  0x19   : > { %p3714_p11 = por %p208_p8, %p52_p5  ;;  %s3593_s19 = smov [#allocation8]  }
  0x1a   : > { %s4444_s16 = scalar_select %p3709_p9, 1, 0 }
  0x1b   : > { %s4445_s17 = scalar_select %p3714_p11, 1, 0 }
  0x1c   : > { %p3719_p13 = pnand %p2833_p10, %p215_p12  ;;  %s227_s20 = sshll.u32 %s3593_s19, 4  ;;  %s228_s20 = int_to_ptr.vmem [resolvable:$true] %s227_s20 }
  0x1d   : > { %s3594_s22 = smov [#allocation10]   ;;  %s3451_s24 = scalar_lea.vmem %s228_s20, 2048 }
  0x1e   : > { %s4446_s18 = scalar_select %p3719_p13, 1, 0 }
  0x1f   : > { %p3205_p0 = pneg %p3719_p13  ;;  %s243_s23 = sshll.u32 %s3594_s22, 4  ;;  %s244_s23 = int_to_ptr.vmem [resolvable:$true] %s243_s23 }
  0x20   : > { %p3452_p4 = scmp.ne.s32.totalorder %s228_s20, %s3451_s24  ;;  %p3459_p10 = scmp.lt.s32.totalorder %s228_s20, %s228_s20 }
  0x21   : > { %p3728_p2 = pnand %p3205_p0, %p4438_p6  ;;  %p3460_p12 = scmp.lt.s32.totalorder %s3451_s24, %s3451_s24 }
  0x23   : > { %p3442_p3 = pneg %p3728_p2  ;;  %p3461_p1 = por %p3460_p12, %p3459_p10 }
  0x25   : > { %p3454_p5 = pnand %p3452_p4, %p3442_p3 }
  0x27   : > { %p3455_p8 = pneg %p3454_p5 }
  0x29   : > { %p3462_p0 = pnand %p3461_p1, %p3455_p8 }
  0x2b   : > { %3465 = shalt.err (!%p3462_p0)
}
  0x2c   : > { %s3595_s25 = smov 64   ;;  %s3596_s26 = smov 4  }
  0x2d   : > { %3208 = dma.hbm_to_vmem [thread:$0]  (!%p3728_p2), %s4431_s2, 2048, %s228_s20, [#allocation9], %s3595_s25, %s3595_s25, %s3596_s26  }
  0x2e   : > { %s3477_s29 = scalar_lea.vmem %s244_s23, 512  ;;  %p3485_p7 = scmp.lt.s32.totalorder %s244_s23, %s244_s23 }
  0x2f   : > { %p3478_p6 = scmp.ne.s32.totalorder %s244_s23, %s3477_s29  ;;  %p3486_p11 = scmp.lt.s32.totalorder %s3477_s29, %s3477_s29 }
  0x31   : > { %p3480_p4 = pnand %p3478_p6, %p3442_p3  ;;  %p3487_p10 = por %p3486_p11, %p3485_p7 }
  0x33   : > { %p3481_p5 = pneg %p3480_p4 }
  0x35   : > { %p3488_p1 = pnand %p3487_p10, %p3481_p5 }
  0x37   : > { %3491 = shalt.err (!%p3488_p1)
}
  0x38   : > { %s4439_s30 = smov 128   ;;  %s4440_s9 = smov 8  }
  0x39   : > { %3211 = dma.hbm_to_vmem [thread:$0]  (!%p3728_p2), %s4433_s4, 512, %s244_s23, [#allocation9], %s4439_s30, %s4439_s30, %s4440_s9  }
  0x3a   : > { %s3754_s15 = sadd.s32 1, %s3590_s13   ;;  %s39_s20 = sadd.s32 1, %s3586_s12 }
  0x3b   : > { %s36_s19 = ssub.s32 %s3590_s13, %s3754_s15  ;;  %p46_p7 = scmp.ne.s32.totalorder %s3586_s12, %s3582_s7 }
  0x3c   : > { %p37_p6 = scmp.eq.s32.totalorder %s36_s19, 0  ;;  %p47_p11 = scmp.eq.s32.totalorder %s3590_s13, 0 }
  0x3d   : > { %p4448_p8 = scmp.eq.s32.totalorder %s3700_s14, 1  ;;  %p3222_p0 = scmp.lt.s32.totalorder %s3590_s13, 2 }
  0x3e   : > { %s3763_s22 = scalar_select %p37_p6, %s3586_s12, %s39_s20  }
  0x3f   : > { %p48_p3 = por %p47_p11, %p46_p7  ;;  %p3767_p12 = por %p4448_p8, %p46_p7 }
  0x40   : > { %s266_s24 = sand.u32 1, %s3586_s12   ;;  %s2908_s23 = sshll.u32 %s3590_s13, 9 }
  0x41   : > { %s4449_s21 = scalar_select %p3767_p12, 1, 0 }
  0x42   : > { %s2837_s25 = sshll.u32 %s266_s24, 5  ;;  %s3777_s28 = scalar_lea.hbm %s4430_s1, %s2908_s23 }
  0x43   : > { %s270_s29 = scalar_lea.vmem [#allocation5], %s2837_s25  ;;  %p3781_p2 = pnand %p3222_p0, %p48_p3 }
  0x44   : > { %s277_s10 = sshll.u32 %s270_s29, 4  ;;  %s3785_s19 = scalar_lea.sflag [#allocation6], %s266_s24  ;;  %s3779_s10 = int_to_ptr.vmem [resolvable:$true] %s277_s10 }
  0x45   : > { %s3492_s20 = scalar_lea.hbm %s3777_s28, 512  ;;  %p3494_p5 = pneg %p3781_p2 }
  0x46   : > { %p3493_p4 = scmp.ne.s32.totalorder %s3777_s28, %s3492_s20  ;;  %s3497_s25 = scalar_lea.hbm %s4430_s1, 1024 }
  0x47   : > { %p3498_p6 = scmp.lt.s32.totalorder %s3777_s28, %s4430_s1  ;;  %p3499_p7 = scmp.lt.s32.totalorder %s3497_s25, %s3492_s20 }
  0x48   : > { %p3495_p10 = pnand %p3494_p5, %p3493_p4 }
  0x49   : > { %p3500_p11 = por %p3499_p7, %p3498_p6 }
  0x4a   : > { %p3496_p1 = pneg %p3495_p10 }
  0x4c   : > { %p3501_p3 = pnand %p3500_p11, %p3496_p1 }
  0x4e   : > { %3504 = shalt.err (!%p3501_p3)
}
  0x4f   : > { %s3505_s24 = scalar_lea.vmem %s3779_s10, 512  ;;  %s3599_s30 = smov [#allocation5]  }
  0x50   : > { %p3506_p8 = scmp.ne.s32.totalorder %s3779_s10, %s3505_s24  ;;  %s3510_s9 = sshll.u32 %s3599_s30, 4  ;;  %s3511_s9 = int_to_ptr.vmem [resolvable:$false] %s3510_s9 }
  0x51   : > { %s3512_s23 = scalar_lea.vmem %s3511_s9, 1024  ;;  %p3513_p10 = scmp.lt.s32.totalorder %s3779_s10, %s3511_s9 }
  0x52   : > { %p3508_p0 = pnand %p3506_p8, %p3494_p5  ;;  %p3514_p12 = scmp.lt.s32.totalorder %s3512_s23, %s3505_s24 }
  0x54   : > { %p3509_p4 = pneg %p3508_p0  ;;  %p3515_p9 = por %p3514_p12, %p3513_p10 }
  0x56   : > { %p3516_p13 = pnand %p3515_p9, %p3509_p4 }
  0x58   : > { %3519 = shalt.err (!%p3516_p13)
}
  0x59   : > { %s4451_s20 = smov 8   ;;  %s4452_s26 = smov 128  }
  0x5a   : > { %3215 = dma.hbm_to_vmem [thread:$0]  (!%p3781_p2), %s3777_s28, 512, %s3779_s10, %s3785_s19, %s4452_s26, %s4452_s26, %s4451_s20  }
  0x5b   : > { %p4453_p5 = scmp.ne.s32.totalorder %s4446_s18, 0 }
  0x5c   : > { %s3812_s30 = sand.u32 (!%p4453_p5), 1, %s3582_s7   ;;  %p4454_p9 = scmp.ne.s32.totalorder (!%p4453_p5), %s4444_s16, 0 }
  0x5d   : > { %289 = sbr.rel (%p4453_p5) target bundleno = 11683 (0x2da3), region = 48  ;;  %s2841_s9 = sshll.u32 (!%p4453_p5), %s3812_s30, 5 }
  0x5e   : > { %s292_s25 = scalar_lea.sflag (!%p4453_p5), [#allocation6], %s3812_s30  ;;  %s3816_s27 = scalar_lea.vmem (!%p4453_p5), [#allocation5], %s2841_s9 }
  0x62   : > { %3565 = dma.done.wait (%p4454_p9), %s292_s25, 512  }
  0x63   : > { %3567 = vsyncadd (%p4454_p9), %s292_s25, 4294966784  ;;  %p4455_p13 = scmp.eq.s32.totalorder %s3700_s14, 0 }
  0x65   : > { %3569 = dma.done.wait (%p4455_p13), [#allocation9], 2560   ;;  %p4456_p12 = pmov %p4455_p13 }
  0x66   : > { %v3600_v0 = vmov 0.0   ;;  %vm3601_vm0 = vmmov 0   ;;  %v3829_v1 = vld [vmem:[#allocation10 + $0x18] sm:$0xff]  ;;  %v3832_v3 = vld [vmem:[#allocation10 + $0x10] sm:$0xff]  ;;  %v3835_v5 = vld [vmem:[#allocation10 + $0x8] sm:$0xff]  ;;  %s3602_s28 = smov 64  }
  0x67   : > { %3571 = vsyncadd (%p4456_p12), [#allocation9], 4294964736  ;;  %3017 = vmatprep.subr.mxu1 %v3600_v0  ;;  %3025 = vmatprep.mubr.msk.f32.mxu1 %vm3601_vm0, %v3600_v0  ;;  %v3292_v2 = vld [vmem:[#allocation8 + $0x78] sm:$0xff]   ;;  %v3294_v6 = vld [vmem:[#allocation8 + $0x70] sm:$0xff]   ;;  %s3603_s19 = smov 96   ;;  %vm564_vm1 = vcmask 261120  }
  0x68   : > { %3018 = vmatpush3.msra.mxu1 %v3829_v1  ;;  %v3293_v4 = vld [vmem:[#allocation8 + $0x38] sm:$0xff]   ;;  %2909 = vmatprep.subr.bf16.mxu0 %v3292_v2  ;;  %v3839_v7 = vld [vmem:[#allocation10] sm:$0xff]  ;;  %v3295_v8 = vld [vmem:[#allocation8 + $0x30] sm:$0xff]   ;;  %s3604_s23 = smov 32   ;;  %vm807_vm2 = vcmask 257026   ;;  %vm931_vm3 = vcmask 259076  }
  0x69   : > { %3019 = vmatprep.subr.mxu1 %v3600_v0  ;;  %2910 = vmatpush3.bf16.msra.mxu0 %v3293_v4  ;;  %v3296_v9 = vld [vmem:[#allocation8 + $0x68] sm:$0xff]   ;;  %v3298_v11 = vld [vmem:[#allocation8 + $0x60] sm:$0xff]   ;;  %v3300_v13 = vld [vmem:[#allocation8 + $0x58] sm:$0xff]   ;;  %vm686_vm4 = vcmask 254976   ;;  %vm1055_vm5 = vcmask 261126   ;;  %s549_s20 = sld [smem:[#allocation4]] }
  0x6a   : > { %3020 = vmatpush3.msra.mxu1 %v3832_v3  ;;  %2911 = vmatprep.subr.bf16.mxu0 %v3294_v6  ;;  %v3297_v10 = vld [vmem:[#allocation8 + $0x28] sm:$0xff]   ;;  %v3299_v12 = vld [vmem:[#allocation8 + $0x20] sm:$0xff]   ;;  %v3301_v14 = vld [vmem:[#allocation8 + $0x18] sm:$0xff]   ;;  %s2866_s26 = sshll.u32 %s3700_s14, 1  ;;  %s3605_s16 = smov 4  }
  0x6b   : > { %3021 = vmatprep.subr.mxu1 %v3600_v0  ;;  %v3302_v15 = vld [vmem:[#allocation8 + $0x50] sm:$0xff]   ;;  %v3310_v16 = vld [vmem:[%s3816_s27 + $0x4] ss:$8 sps:$4 sm:$0xff]   ;;  %v2868_v17 = vld [vmem:[%s4434_s5] ss:$0 sm:$0xff]  ;;  %s554_s9 = sld [smem:[#allocation3 + %s2866_s26]] }
  0x6c   : > { %3022 = vmatpush3.msra.mxu1 %v3835_v5  ;;  %650 = vrot.lane.b32.xlu0 %v2868_v17, %s3602_s28  ;;  %v3303_v18 = vld [vmem:[#allocation8 + $0x10] sm:$0xff]   ;;  %v3304_v19 = vld [vmem:[#allocation8 + $0x48] sm:$0xff]   ;;  %v3306_v21 = vld [vmem:[#allocation8 + $0x40] sm:$0xff]   ;;  %s558_s25 = sadd.s32 1, %s2866_s26  ;;  %s3606_s18 = smov 1  }
  0x6d   : > { %3023 = vmatprep.subr.mxu1 %v3600_v0  ;;  %2912 = vmatpush3.bf16.msra.mxu0 %v3295_v8  ;;  %v3305_v20 = vld [vmem:[#allocation8 + $0x8] sm:$0xff]   ;;  %v3307_v22 = vld [vmem:[#allocation8] sm:$0xff]   ;;  %s3608_s10 = smov 2   ;;  %s3609_s11 = smov 8  }
  0x6e   : > { %3024 = vmatpush3.msra.mxu1 %v3839_v7  ;;  %2913 = vmatprep.subr.bf16.mxu0 %v3296_v9  ;;  %v3308_v23 = vld [vmem:[%s3816_s27] ss:$8 sps:$4 sm:$0xff]   ;;  %s3611_s29 = smov 10   ;;  %s3612_s24 = smov 5  }
  0x6f   : > { %3026 = vmatmul.mubr.f32.vlgmr.msra.gmra.mxu1 %v3600_v0  ;;  %3028 = vmatprep.subr.mxu1 %v3600_v0  ;;  %v3878_v31 = vld [vmem:[%s4432_s3] ss:$0 sm:$0xff]  ;;  %s3615_s26 = smov 9   ;;  %p4459_p1 = scmp.ne.s32.totalorder %s4449_s21, 0 }
  0x70   : > { %3029 = vmatpush3.msra.mxu1 %v3829_v1  ;;  %3036 = vmatprep.mubr.msk.f32.mxu1 %vm3601_vm0, %v3600_v0 }
  0x71   : > { %3030 = vmatprep.subr.mxu1 %v3600_v0  ;;  %2914 = vmatpush3.bf16.msra.mxu0 %v3297_v10 }
  0x72   : > { %3031 = vmatpush3.msra.mxu1 %v3832_v3  ;;  %2915 = vmatprep.subr.bf16.mxu0 %v3298_v11 }
  0x73   : > { %3032 = vmatprep.subr.mxu1 %v3600_v0  ;;  %526 = vmatprep.mubr.bf16.mxu0 %v3310_v16 }
  0x74   : > { %3033 = vmatpush3.msra.mxu1 %v3835_v5 }
  0x75   : > { %3034 = vmatprep.subr.mxu1 %v3600_v0  ;;  %2916 = vmatpush3.bf16.msra.mxu0 %v3299_v12 }
  0x76   : > { %3035 = vmatpush3.msra.mxu1 %v3839_v7  ;;  %2917 = vmatprep.subr.bf16.mxu0 %v3300_v13 }
  0x77   : > { %3039 = vmatprep.subr.mxu1 %v3600_v0 }
  0x79   : > { %2918 = vmatpush3.bf16.msra.mxu0 %v3301_v14 }
  0x7a   : > { %2919 = vmatprep.subr.bf16.mxu0 %v3302_v15 }
  0x7d   : > { %2920 = vmatpush3.bf16.msra.mxu0 %v3303_v18 }
  0x7e   : > { %2921 = vmatprep.subr.bf16.mxu0 %v3304_v19 }
  0x81   : > { %2922 = vmatpush3.bf16.msra.mxu0 %v3305_v20 }
  0x82   : > { %2923 = vmatprep.subr.bf16.mxu0 %v3306_v21 }
  0x85   : > { %2924 = vmatpush3.bf16.msra.mxu0 %v3307_v22 }
  0x86   : > { %3072 = vmatprep.subr.mxu0 %v3600_v0 }
  0x88   : > { %527 = vmatmul.mubr.bf16.vlgmr.msra.gmra.mxu0 %v3308_v23 }
  0x89   : > { %3073 = vmatpush3.msra.mxu0 %v3829_v1 }
  0x8a   : > { %3074 = vmatprep.subr.mxu0 %v3600_v0 }
  0x8b   : > { %3075 = vmatpush3.msra.mxu0 %v3832_v3 }
  0x8c   : > { %3076 = vmatprep.subr.mxu0 %v3600_v0 }
  0x8d   : > { %3077 = vmatpush3.msra.mxu0 %v3835_v5 }
  0x8e   : > { %3078 = vmatprep.subr.mxu0 %v3600_v0 }
  0x8f   : > { %3079 = vmatpush3.msra.mxu0 %v3839_v7 }
  0x90   : > { %3094 = vmatprep.subr.mxu0 %v3600_v0 }
  0xde   : > { %v3871_v24 = vpop.permute.xlu0 %650 }
 0x12f   : > { %v634_v25 = vpop.f32.mrf.mxu1 }
 0x130   : > { %v653_v26 = vadd.f32 %v3871_v24, %v634_v25 }
 0x131   : > { %v3027_v27 = vpop.f32.mrf.mxu1 }
 0x132   : > { %655 = vrot.lane.b32.xlu0 %v653_v26, %s3602_s28 }
 0x148   : > { %v2925_v28 = vpop.f32.mrf.mxu0 }
 0x14a   : > { %v2926_v29 = vpop.f32.mrf.mxu0 }
 0x14b   : > { %v2927_v30 = vadd.f32 %v2926_v29, %v2925_v28 }
 0x14d   : > { %v3881_v32 = vadd.f32 %v2927_v30, %v3878_v31 }
 0x14f   : > { %v638_v33 = vadd.f32 %v634_v25, %v3881_v32 }
 0x151   : > { %v2867_v34 = vmul.f32 -1.442695, %v638_v33 }
 0x153   : > { %3314 = vpow2.f32 %v2867_v34 }
 0x160   : > { %v3315_v35 = vpop.eup %3314 }
 0x161   : > { %v642_v36 = vadd.f32 1.0, %v3315_v35 }
 0x163   : > { %3316 = vrcp.f32 %v642_v36 }
 0x170   : > { %v3317_v37 = vpop.eup %3316 }
 0x171   : > { %v665_v43 = vsub.f32 1.0, %v3317_v37  ;;  %v671_v45 = vmul.f32 0.0, %v3317_v37 }
 0x1a4   : > { %v656_v38 = vpop.permute.xlu0 %655 }
 0x1a5   : > { %v658_v39 = vmul.f32 %v3317_v37, %v656_v38 }
 0x1a7   : > { %660 = vrot.lane.b32.xlu1 %v658_v39, %s3602_s28 }
 0x219   : > { %v661_v40 = vpop.permute.xlu1 %660 }
 0x21a   : > { %v663_v41 = vadd.f32 %v661_v40, %v3881_v32 }
 0x21c   : > { %3318 = vtanh.f32 %v663_v41 }
 0x229   : > { %v3319_v42 = vpop.eup %3318 }
 0x22a   : > { %667 = vrot.lane.b32.xlu1 %v3319_v42, %s3603_s19 }
 0x29c   : > { %v668_v44 = vpop.permute.xlu1 %667 }
 0x29d   : > { %v670_v46 = vmul.f32 %v668_v44, %v665_v43 }
 0x29f   : > { %v3887_v47 = vadd.f32 %v671_v45, %v670_v46 }
 0x2a1   : > { %695 = vrot.lane.b32.xlu0 %v3887_v47, %s3603_s19  ;;  %v798_v4 = vrot.slane %v3887_v47, 6 }
 0x313   : > { %v696_v48 = vpop.permute.xlu0 %695 }
 0x314   : > { %3037 = vmatmul.mubr.msk.f32.vlgmr.msra.gmra.mxu1 %vm564_vm1, %v696_v48 }
 0x315   : > { %3040 = vmatpush3.msra.mxu1 %v3829_v1  ;;  %3047 = vmatprep.mubr.msk.f32.mxu1 %vm3601_vm0, %v3600_v0 }
 0x316   : > { %3041 = vmatprep.subr.mxu1 %v3600_v0 }
 0x317   : > { %3042 = vmatpush3.msra.mxu1 %v3832_v3 }
 0x318   : > { %3043 = vmatprep.subr.mxu1 %v3600_v0 }
 0x319   : > { %3044 = vmatpush3.msra.mxu1 %v3835_v5 }
 0x31a   : > { %3045 = vmatprep.subr.mxu1 %v3600_v0 }
 0x31b   : > { %3046 = vmatpush3.msra.mxu1 %v3839_v7 }
 0x31c   : > { %3050 = vmatprep.subr.mxu1 %v3600_v0 }
 0x3d4   : > { %v765_v49 = vpop.f32.mrf.mxu1 }
 0x3d5   : > { %v779_v50 = vadd.f32 %v765_v49, %v3871_v24  ;;  %v770_v53 = vrot.slane %v765_v49, 6 }
 0x3d6   : > { %v3038_v51 = vpop.f32.mrf.mxu1 }
 0x3d7   : > { %v781_v52 = vrot.slane %v779_v50, 6  ;;  %v772_v54 = vadd.f32 %v770_v53, %v3881_v32 }
 0x3d9   : > { %782 = vrot.lane.b32.xlu1 %v781_v52, %s3602_s28  ;;  %v2871_v55 = vmul.f32 -1.442695, %v772_v54 }
 0x3db   : > { %3320 = vpow2.f32 %v2871_v55 }
 0x3e8   : > { %v3321_v56 = vpop.eup %3320 }
 0x3e9   : > { %v776_v57 = vadd.f32 1.0, %v3321_v56 }
 0x3eb   : > { %3322 = vrcp.f32 %v776_v57 }
 0x3f8   : > { %v3323_v58 = vpop.eup %3322 }
 0x3f9   : > { %v792_v2 = vsub.f32 1.0, %v3323_v58  ;;  %v800_v9 = vmul.f32 %v3323_v58, %v798_v4  ;;  %v2928_v4 = vpop.f32.mrf.mxu0 }
 0x44b   : > { %v783_v59 = vpop.permute.xlu1 %782 }
 0x44c   : > { %v785_v60 = vmul.f32 %v3323_v58, %v783_v59 }
 0x44e   : > { %787 = vrot.lane.b32.xlu0 %v785_v60, %s3602_s28 }
 0x4c0   : > { %v788_v61 = vpop.permute.xlu0 %787 }
 0x4c1   : > { %v790_v62 = vadd.f32 %v788_v61, %v3881_v32 }
 0x4c3   : > { %3324 = vtanh.f32 %v790_v62 }
 0x4d0   : > { %v3325_v63 = vpop.eup %3324 }
 0x4d1   : > { %794 = vrot.lane.b32.xlu1 %v3325_v63, %s3603_s19 }
 0x543   : > { %v795_v6 = vpop.permute.xlu1 %794 }
 0x544   : > { %v797_v8 = vmul.f32 %v795_v6, %v792_v2  ;;  %v2929_v6 = vpop.f32.mrf.mxu0 }
 0x546   : > { %v3909_v10 = vadd.f32 %v800_v9, %v797_v8  ;;  %v2930_v8 = vadd.f32 %v2929_v6, %v2928_v4 }
 0x548   : > { %v818_v11 = vrot.slane %v3909_v10, 2  ;;  %v922_v30 = vrot.slane %v3909_v10, 6  ;;  %v3971_v9 = vadd.f32 %v2930_v8, %v3878_v31 }
 0x54a   : > { %819 = vrot.lane.b32.xlu0 %v818_v11, %s3603_s19 }
 0x5bc   : > { %v820_v12 = vpop.permute.xlu0 %819 }
 0x5bd   : > { %3048 = vmatmul.mubr.msk.f32.vlgmr.msra.gmra.mxu1 %vm564_vm1, %v820_v12 }
 0x5be   : > { %3051 = vmatpush3.msra.mxu1 %v3829_v1  ;;  %3058 = vmatprep.mubr.msk.f32.mxu1 %vm3601_vm0, %v3600_v0 }
 0x5bf   : > { %3052 = vmatprep.subr.mxu1 %v3600_v0 }
 0x5c0   : > { %3053 = vmatpush3.msra.mxu1 %v3832_v3 }
 0x5c1   : > { %3054 = vmatprep.subr.mxu1 %v3600_v0 }
 0x5c2   : > { %3055 = vmatpush3.msra.mxu1 %v3835_v5 }
 0x5c3   : > { %3056 = vmatprep.subr.mxu1 %v3600_v0 }
 0x5c4   : > { %3057 = vmatpush3.msra.mxu1 %v3839_v7 }
 0x5c5   : > { %3061 = vmatprep.subr.mxu1 %v3600_v0 }
 0x67d   : > { %v889_v13 = vpop.f32.mrf.mxu1 }
 0x67e   : > { %v903_v14 = vadd.f32 %v889_v13, %v3871_v24  ;;  %v894_v17 = vrot.slane %v889_v13, 4 }
 0x67f   : > { %v3049_v15 = vpop.f32.mrf.mxu1 }
 0x680   : > { %v905_v16 = vrot.slane %v903_v14, 4  ;;  %v896_v18 = vadd.f32 %v894_v17, %v3881_v32 }
 0x682   : > { %906 = vrot.lane.b32.xlu1 %v905_v16, %s3602_s28  ;;  %v2873_v19 = vmul.f32 -1.442695, %v896_v18 }
 0x684   : > { %3326 = vpow2.f32 %v2873_v19 }
 0x691   : > { %v3327_v20 = vpop.eup %3326 }
 0x692   : > { %v900_v21 = vadd.f32 1.0, %v3327_v20  ;;  %v3311_v20 = vld [vmem:[%s3816_s27 + $0x14] ss:$8 sps:$4 sm:$0xff]  }
 0x693   : > { %534 = vmatprep.mubr.bf16.mxu0 %v3311_v20 }
 0x694   : > { %3328 = vrcp.f32 %v900_v21  ;;  %v3313_v21 = vld [vmem:[%s3816_s27 + $0x10] ss:$8 sps:$4 sm:$0xff]   ;;  %s559_s27 = sld [smem:[#allocation3 + %s558_s25]]  ;;  %s3617_s25 = smov 11  }
 0x695   : > { %535 = vmatmul.mubr.bf16.gmra.mxu0 %v3313_v21 }
 0x696   : > { %3080 = vmatprep.mubr.msk.f32.mxu0 %vm3601_vm0, %v3600_v0 }
 0x6a1   : > { %v3329_v22 = vpop.eup %3328 }
 0x6a2   : > { %v916_v29 = vsub.f32 1.0, %v3329_v22  ;;  %v924_v34 = vmul.f32 %v3329_v22, %v922_v30 }
 0x6f4   : > { %v907_v23 = vpop.permute.xlu1 %906 }
 0x6f5   : > { %v909_v25 = vmul.f32 %v3329_v22, %v907_v23 }
 0x6f7   : > { %911 = vrot.lane.b32.xlu0 %v909_v25, %s3602_s28 }
 0x769   : > { %v912_v26 = vpop.permute.xlu0 %911 }
 0x76a   : > { %v914_v27 = vadd.f32 %v912_v26, %v3881_v32 }
 0x76c   : > { %3330 = vtanh.f32 %v914_v27 }
 0x779   : > { %v3331_v28 = vpop.eup %3330 }
 0x77a   : > { %918 = vrot.lane.b32.xlu1 %v3331_v28, %s3603_s19 }
 0x7ec   : > { %v919_v33 = vpop.permute.xlu1 %918 }
 0x7ed   : > { %v921_v35 = vmul.f32 %v919_v33, %v916_v29  ;;  %v2931_v29 = vpop.f32.mrf.mxu0 }
 0x7ef   : > { %v3931_v36 = vadd.f32 %v924_v34, %v921_v35  ;;  %v2932_v30 = vpop.f32.mrf.mxu0 }
 0x7f0   : > { %v3985_v33 = vadd.f32 %v2932_v30, %v2931_v29 }
 0x7f1   : > { %v942_v37 = vrot.slane %v3931_v36, 4  ;;  %v1046_v56 = vrot.slane %v3931_v36, 6  ;;  %v3998_v35 = vpop.f32.mrf.mxu0 }
 0x7f3   : > { %943 = vrot.lane.b32.xlu0 %v942_v37, %s3603_s19  ;;  %v4000_v37 = vpop.f32.mrf.mxu0 }
 0x865   : > { %v944_v38 = vpop.permute.xlu0 %943 }
 0x866   : > { %3059 = vmatmul.mubr.msk.f32.vlgmr.msra.gmra.mxu1 %vm564_vm1, %v944_v38 }
 0x867   : > { %3062 = vmatpush3.msra.mxu1 %v3829_v1  ;;  %3069 = vmatprep.mubr.msk.f32.mxu1 %vm3601_vm0, %v3600_v0 }
 0x868   : > { %3063 = vmatprep.subr.mxu1 %v3600_v0 }
 0x869   : > { %3064 = vmatpush3.msra.mxu1 %v3832_v3 }
 0x86a   : > { %3065 = vmatprep.subr.mxu1 %v3600_v0 }
 0x86b   : > { %3066 = vmatpush3.msra.mxu1 %v3835_v5 }
 0x86c   : > { %3067 = vmatprep.subr.mxu1 %v3600_v0 }
 0x86d   : > { %3068 = vmatpush3.msra.mxu1 %v3839_v7 }
 0x86e   : > { %3083 = vmatprep.subr.mxu1 %v3600_v0 }
 0x926   : > { %v1013_v39 = vpop.f32.mrf.mxu1 }
 0x927   : > { %v1027_v40 = vadd.f32 %v1013_v39, %v3871_v24  ;;  %v1018_v43 = vrot.slane %v1013_v39, 2 }
 0x928   : > { %v3060_v41 = vpop.f32.mrf.mxu1 }
 0x929   : > { %v1029_v42 = vrot.slane %v1027_v40, 2  ;;  %v1020_v44 = vadd.f32 %v1018_v43, %v3881_v32 }
 0x92b   : > { %1030 = vrot.lane.b32.xlu1 %v1029_v42, %s3602_s28  ;;  %v2875_v45 = vmul.f32 -1.442695, %v1020_v44 }
 0x92d   : > { %3332 = vpow2.f32 %v2875_v45 }
 0x93a   : > { %v3333_v46 = vpop.eup %3332 }
 0x93b   : > { %v1024_v48 = vadd.f32 1.0, %v3333_v46 }
 0x93d   : > { %3334 = vrcp.f32 %v1024_v48 }
 0x94a   : > { %v3335_v49 = vpop.eup %3334 }
 0x94b   : > { %v1040_v55 = vsub.f32 1.0, %v3335_v49  ;;  %v1048_v58 = vmul.f32 %v3335_v49, %v1046_v56 }
 0x99d   : > { %v1031_v50 = vpop.permute.xlu1 %1030 }
 0x99e   : > { %v1033_v51 = vmul.f32 %v3335_v49, %v1031_v50 }
 0x9a0   : > { %1035 = vrot.lane.b32.xlu0 %v1033_v51, %s3602_s28 }
 0xa12   : > { %v1036_v52 = vpop.permute.xlu0 %1035 }
 0xa13   : > { %v1038_v53 = vadd.f32 %v1036_v52, %v3881_v32 }
 0xa15   : > { %3336 = vtanh.f32 %v1038_v53 }
 0xa22   : > { %v3337_v54 = vpop.eup %3336 }
 0xa23   : > { %1042 = vrot.lane.b32.xlu1 %v3337_v54, %s3603_s19 }
 0xa95   : > { %v1043_v57 = vpop.permute.xlu1 %1042 }
 0xa96   : > { %v1045_v59 = vmul.f32 %v1043_v57, %v1040_v55 }
 0xa98   : > { %v3953_v60 = vadd.f32 %v1048_v58, %v1045_v59 }
 0xa9a   : > { %v1066_v61 = vrot.slane %v3953_v60, 6 }
 0xa9c   : > { %1067 = vrot.lane.b32.xlu0 %v1066_v61, %s3603_s19 }
 0xb0e   : > { %v1068_v62 = vpop.permute.xlu0 %1067 }
 0xb0f   : > { %3070 = vmatmul.mubr.msk.f32.vlgmr.msra.gmra.mxu1 %vm564_vm1, %v1068_v62 }
 0xb10   : > { %3084 = vmatpush3.msra.mxu1 %v3829_v1  ;;  %3091 = vmatprep.mubr.msk.f32.mxu1 %vm3601_vm0, %v3600_v0 }
 0xb11   : > { %3085 = vmatprep.subr.mxu1 %v3600_v0 }
 0xb12   : > { %3086 = vmatpush3.msra.mxu1 %v3832_v3 }
 0xb13   : > { %3087 = vmatprep.subr.mxu1 %v3600_v0 }
 0xb14   : > { %3088 = vmatpush3.msra.mxu1 %v3835_v5 }
 0xb15   : > { %3089 = vmatprep.subr.mxu1 %v3600_v0 }
 0xb16   : > { %3090 = vmatpush3.msra.mxu1 %v3839_v7 }
 0xb17   : > { %3105 = vmatprep.subr.mxu1 %v3600_v0 }
 0xbcf   : > { %v1137_v32 = vpop.f32.mrf.mxu1 }
 0xbd0   : > { %v1148_v63 = vadd.f32 %v1137_v32, %v3871_v24  ;;  %v1141_v11 = vadd.f32 %v1137_v32, %v3971_v9 }
 0xbd1   : > { %v3071_v2 = vpop.f32.mrf.mxu1 }
 0xbd2   : > { %1150 = vrot.lane.b32.xlu1 %v1148_v63, %s3602_s28  ;;  %v2877_v12 = vmul.f32 -1.442695, %v1141_v11 }
 0xbd4   : > { %3338 = vpow2.f32 %v2877_v12 }
 0xbe1   : > { %v3339_v13 = vpop.eup %3338 }
 0xbe2   : > { %v1145_v14 = vadd.f32 1.0, %v3339_v13 }
 0xbe4   : > { %3340 = vrcp.f32 %v1145_v14 }
 0xbf1   : > { %v3341_v15 = vpop.eup %3340 }
 0xbf2   : > { %v1160_v23 = vsub.f32 1.0, %v3341_v15  ;;  %v1167_v26 = vmul.f32 %v3341_v15, %v1066_v61 }
 0xc44   : > { %v1151_v16 = vpop.permute.xlu1 %1150 }
 0xc45   : > { %v1153_v17 = vmul.f32 %v3341_v15, %v1151_v16 }
 0xc47   : > { %1155 = vrot.lane.b32.xlu0 %v1153_v17, %s3602_s28 }
 0xcb9   : > { %v1156_v18 = vpop.permute.xlu0 %1155 }
 0xcba   : > { %v1158_v19 = vadd.f32 %v1156_v18, %v3971_v9 }
 0xcbc   : > { %3342 = vtanh.f32 %v1158_v19 }
 0xcc9   : > { %v3343_v22 = vpop.eup %3342 }
 0xcca   : > { %1162 = vrot.lane.b32.xlu1 %v3343_v22, %s3603_s19 }
 0xd3c   : > { %v1163_v25 = vpop.permute.xlu1 %1162 }
 0xd3d   : > { %v1165_v27 = vmul.f32 %v1163_v25, %v1160_v23 }
 0xd3f   : > { %v3981_v28 = vadd.f32 %v1167_v26, %v1165_v27 }
 0xd41   : > { %1184 = vrot.lane.b32.xlu0 %v3981_v28, %s3603_s19  ;;  %v1287_v55 = vrot.slane %v3981_v28, 6 }
 0xdb3   : > { %v1185_v34 = vpop.permute.xlu0 %1184 }
 0xdb4   : > { %3081 = vmatmul.mubr.msk.f32.vlgmr.msra.gmra.mxu0 %vm564_vm1, %v1185_v34 }
 0xdb5   : > { %3095 = vmatpush3.msra.mxu0 %v3829_v1  ;;  %3102 = vmatprep.mubr.msk.f32.mxu0 %vm3601_vm0, %v3600_v0 }
 0xdb6   : > { %3096 = vmatprep.subr.mxu0 %v3600_v0 }
 0xdb7   : > { %3097 = vmatpush3.msra.mxu0 %v3832_v3 }
 0xdb8   : > { %3098 = vmatprep.subr.mxu0 %v3600_v0 }
 0xdb9   : > { %3099 = vmatpush3.msra.mxu0 %v3835_v5 }
 0xdba   : > { %3100 = vmatprep.subr.mxu0 %v3600_v0 }
 0xdbb   : > { %3101 = vmatpush3.msra.mxu0 %v3839_v7 }
 0xdbc   : > { %3116 = vmatprep.subr.mxu0 %v3600_v0 }
 0xe74   : > { %v1254_v38 = vpop.f32.mrf.mxu0 }
 0xe75   : > { %v1268_v39 = vadd.f32 %v1254_v38, %v3871_v24  ;;  %v1259_v42 = vrot.slane %v1254_v38, 6 }
 0xe76   : > { %v3082_v40 = vpop.f32.mrf.mxu0 }
 0xe77   : > { %v1270_v41 = vrot.slane %v1268_v39, 6  ;;  %v1261_v43 = vadd.f32 %v1259_v42, %v3971_v9 }
 0xe79   : > { %1271 = vrot.lane.b32.xlu1 %v1270_v41, %s3602_s28  ;;  %v2879_v44 = vmul.f32 -1.442695, %v1261_v43 }
 0xe7b   : > { %3344 = vpow2.f32 %v2879_v44 }
 0xe88   : > { %v3345_v45 = vpop.eup %3344 }
 0xe89   : > { %v1265_v46 = vadd.f32 1.0, %v3345_v45 }
 0xe8b   : > { %3346 = vrcp.f32 %v1265_v46 }
 0xe98   : > { %v3347_v48 = vpop.eup %3346 }
 0xe99   : > { %v1281_v54 = vsub.f32 1.0, %v3347_v48  ;;  %v1289_v58 = vmul.f32 %v3347_v48, %v1287_v55 }
 0xeeb   : > { %v1272_v49 = vpop.permute.xlu1 %1271 }
 0xeec   : > { %v1274_v50 = vmul.f32 %v3347_v48, %v1272_v49 }
 0xeee   : > { %1276 = vrot.lane.b32.xlu0 %v1274_v50, %s3602_s28 }
 0xf60   : > { %v1277_v51 = vpop.permute.xlu0 %1276 }
 0xf61   : > { %v1279_v52 = vadd.f32 %v1277_v51, %v3971_v9 }
 0xf63   : > { %3348 = vtanh.f32 %v1279_v52 }
 0xf70   : > { %v3349_v53 = vpop.eup %3348 }
 0xf71   : > { %1283 = vrot.lane.b32.xlu1 %v3349_v53, %s3603_s19 }
 0xfe3   : > { %v1284_v56 = vpop.permute.xlu1 %1283 }
 0xfe4   : > { %v1286_v57 = vmul.f32 %v1284_v56, %v1281_v54 }
 0xfe6   : > { %v4009_v59 = vadd.f32 %v1289_v58, %v1286_v57 }
 0xfe8   : > { %v1306_v61 = vrot.slane %v4009_v59, 2  ;;  %v1410_v21 = vrot.slane %v4009_v59, 6 }
 0xfea   : > { %1307 = vrot.lane.b32.xlu0 %v1306_v61, %s3603_s19 }
0x105c   : > { %v1308_v62 = vpop.permute.xlu0 %1307 }
0x105d   : > { %3092 = vmatmul.mubr.msk.f32.vlgmr.msra.gmra.mxu1 %vm564_vm1, %v1308_v62 }
0x105e   : > { %3106 = vmatpush3.msra.mxu1 %v3829_v1  ;;  %3113 = vmatprep.mubr.msk.f32.mxu1 %vm3601_vm0, %v3600_v0 }
0x105f   : > { %3107 = vmatprep.subr.mxu1 %v3600_v0 }
0x1060   : > { %3108 = vmatpush3.msra.mxu1 %v3832_v3 }
0x1061   : > { %3109 = vmatprep.subr.mxu1 %v3600_v0 }
0x1062   : > { %3110 = vmatpush3.msra.mxu1 %v3835_v5 }
0x1063   : > { %3111 = vmatprep.subr.mxu1 %v3600_v0 }
0x1064   : > { %3112 = vmatpush3.msra.mxu1 %v3839_v7 }
0x1065   : > { %3127 = vmatprep.subr.mxu1 %v3600_v0 }
0x111d   : > { %v1377_v32 = vpop.f32.mrf.mxu1 }
0x111e   : > { %v1391_v63 = vadd.f32 %v1377_v32, %v3871_v24  ;;  %v1382_v6 = vrot.slane %v1377_v32, 4 }
0x111f   : > { %v3093_v2 = vpop.f32.mrf.mxu1 }
0x1120   : > { %v1393_v4 = vrot.slane %v1391_v63, 4  ;;  %v1384_v8 = vadd.f32 %v1382_v6, %v3971_v9  ;;  %v4072_v63 = vadd.f32 %v3985_v33, %v3878_v31 }
0x1122   : > { %1394 = vrot.lane.b32.xlu1 %v1393_v4, %s3602_s28  ;;  %v2881_v11 = vmul.f32 -1.442695, %v1384_v8 }
0x1124   : > { %3350 = vpow2.f32 %v2881_v11 }
0x1131   : > { %v3351_v12 = vpop.eup %3350 }
0x1132   : > { %v1388_v13 = vadd.f32 1.0, %v3351_v12 }
0x1134   : > { %3352 = vrcp.f32 %v1388_v13 }
0x1141   : > { %v3353_v14 = vpop.eup %3352 }
0x1142   : > { %v1404_v20 = vsub.f32 1.0, %v3353_v14  ;;  %v1412_v23 = vmul.f32 %v3353_v14, %v1410_v21 }
0x1194   : > { %v1395_v15 = vpop.permute.xlu1 %1394 }
0x1195   : > { %v1397_v16 = vmul.f32 %v3353_v14, %v1395_v15 }
0x1197   : > { %1399 = vrot.lane.b32.xlu0 %v1397_v16, %s3602_s28 }
0x1209   : > { %v1400_v17 = vpop.permute.xlu0 %1399 }
0x120a   : > { %v1402_v18 = vadd.f32 %v1400_v17, %v3971_v9 }
0x120c   : > { %3354 = vtanh.f32 %v1402_v18 }
0x1219   : > { %v3355_v19 = vpop.eup %3354 }
0x121a   : > { %1406 = vrot.lane.b32.xlu1 %v3355_v19, %s3603_s19 }
0x128c   : > { %v1407_v22 = vpop.permute.xlu1 %1406 }
0x128d   : > { %v1409_v25 = vmul.f32 %v1407_v22, %v1404_v20 }
0x128f   : > { %v4031_v26 = vadd.f32 %v1412_v23, %v1409_v25 }
0x1291   : > { %v1429_v27 = vrot.slane %v4031_v26, 4  ;;  %v1533_v53 = vrot.slane %v4031_v26, 6 }
0x1293   : > { %1430 = vrot.lane.b32.xlu0 %v1429_v27, %s3603_s19 }
0x1305   : > { %v1431_v29 = vpop.permute.xlu0 %1430 }
0x1306   : > { %3103 = vmatmul.mubr.msk.f32.vlgmr.msra.gmra.mxu0 %vm564_vm1, %v1431_v29 }
0x1307   : > { %3117 = vmatpush3.msra.mxu0 %v3829_v1  ;;  %3124 = vmatprep.mubr.msk.f32.mxu0 %vm3601_vm0, %v3600_v0 }
0x1308   : > { %3118 = vmatprep.subr.mxu0 %v3600_v0 }
0x1309   : > { %3119 = vmatpush3.msra.mxu0 %v3832_v3 }
0x130a   : > { %3120 = vmatprep.subr.mxu0 %v3600_v0 }
0x130b   : > { %3121 = vmatpush3.msra.mxu0 %v3835_v5 }
0x130c   : > { %3122 = vmatprep.subr.mxu0 %v3600_v0 }
0x130d   : > { %3123 = vmatpush3.msra.mxu0 %v3839_v7 }
0x130e   : > { %3138 = vmatprep.subr.mxu0 %v3600_v0 }
0x13c6   : > { %v1500_v30 = vpop.f32.mrf.mxu0 }
0x13c7   : > { %v1514_v34 = vadd.f32 %v1500_v30, %v3871_v24  ;;  %v1505_v40 = vrot.slane %v1500_v30, 2 }
0x13c8   : > { %v3104_v38 = vpop.f32.mrf.mxu0 }
0x13c9   : > { %v1516_v39 = vrot.slane %v1514_v34, 2  ;;  %v1507_v41 = vadd.f32 %v1505_v40, %v3971_v9 }
0x13cb   : > { %1517 = vrot.lane.b32.xlu1 %v1516_v39, %s3602_s28  ;;  %v2883_v42 = vmul.f32 -1.442695, %v1507_v41 }
0x13cd   : > { %3356 = vpow2.f32 %v2883_v42 }
0x13da   : > { %v3357_v43 = vpop.eup %3356 }
0x13db   : > { %v1511_v44 = vadd.f32 1.0, %v3357_v43 }
0x13dd   : > { %3358 = vrcp.f32 %v1511_v44 }
0x13ea   : > { %v3359_v45 = vpop.eup %3358 }
0x13eb   : > { %v1527_v52 = vsub.f32 1.0, %v3359_v45  ;;  %v1535_v55 = vmul.f32 %v3359_v45, %v1533_v53 }
0x143d   : > { %v1518_v46 = vpop.permute.xlu1 %1517 }
0x143e   : > { %v1520_v48 = vmul.f32 %v3359_v45, %v1518_v46 }
0x1440   : > { %1522 = vrot.lane.b32.xlu0 %v1520_v48, %s3602_s28 }
0x14b2   : > { %v1523_v49 = vpop.permute.xlu0 %1522 }
0x14b3   : > { %v1525_v50 = vadd.f32 %v1523_v49, %v3971_v9 }
0x14b5   : > { %3360 = vtanh.f32 %v1525_v50 }
0x14c2   : > { %v3361_v51 = vpop.eup %3360 }
0x14c3   : > { %1529 = vrot.lane.b32.xlu1 %v3361_v51, %s3603_s19 }
0x1535   : > { %v1530_v54 = vpop.permute.xlu1 %1529 }
0x1536   : > { %v1532_v56 = vmul.f32 %v1530_v54, %v1527_v52 }
0x1538   : > { %v4053_v57 = vadd.f32 %v1535_v55, %v1532_v56 }
0x153a   : > { %v1552_v58 = vrot.slane %v4053_v57, 6 }
0x153c   : > { %1553 = vrot.lane.b32.xlu0 %v1552_v58, %s3603_s19 }
0x15ae   : > { %v1554_v61 = vpop.permute.xlu0 %1553 }
0x15af   : > { %3114 = vmatmul.mubr.msk.f32.vlgmr.msra.gmra.mxu1 %vm564_vm1, %v1554_v61 }
0x15b0   : > { %3128 = vmatpush3.msra.mxu1 %v3829_v1  ;;  %3135 = vmatprep.mubr.msk.f32.mxu1 %vm3601_vm0, %v3600_v0 }
0x15b1   : > { %3129 = vmatprep.subr.mxu1 %v3600_v0 }
0x15b2   : > { %3130 = vmatpush3.msra.mxu1 %v3832_v3 }
0x15b3   : > { %3131 = vmatprep.subr.mxu1 %v3600_v0 }
0x15b4   : > { %3132 = vmatpush3.msra.mxu1 %v3835_v5 }
0x15b5   : > { %3133 = vmatprep.subr.mxu1 %v3600_v0 }
0x15b6   : > { %3134 = vmatpush3.msra.mxu1 %v3839_v7 }
0x15b7   : > { %3149 = vmatprep.subr.mxu1 %v3600_v0 }
0x166f   : > { %v1623_v9 = vpop.f32.mrf.mxu1 }
0x1670   : > { %v1634_v62 = vadd.f32 %v1623_v9, %v3871_v24  ;;  %v1627_v2 = vadd.f32 %v1623_v9, %v4072_v63 }
0x1671   : > { %v3115_v32 = vpop.f32.mrf.mxu1 }
0x1672   : > { %1636 = vrot.lane.b32.xlu1 %v1634_v62, %s3602_s28  ;;  %v2885_v4 = vmul.f32 -1.442695, %v1627_v2 }
0x1674   : > { %3362 = vpow2.f32 %v2885_v4 }
0x1681   : > { %v3363_v6 = vpop.eup %3362 }
0x1682   : > { %v1631_v8 = vadd.f32 1.0, %v3363_v6 }
0x1684   : > { %3364 = vrcp.f32 %v1631_v8 }
0x1691   : > { %v3365_v11 = vpop.eup %3364 }
0x1692   : > { %v1646_v33 = vsub.f32 1.0, %v3365_v11  ;;  %v1653_v18 = vmul.f32 %v3365_v11, %v1552_v58 }
0x16e4   : > { %v1637_v12 = vpop.permute.xlu1 %1636 }
0x16e5   : > { %v1639_v13 = vmul.f32 %v3365_v11, %v1637_v12 }
0x16e7   : > { %1641 = vrot.lane.b32.xlu0 %v1639_v13, %s3602_s28 }
0x1759   : > { %v1642_v14 = vpop.permute.xlu0 %1641 }
0x175a   : > { %v1644_v15 = vadd.f32 %v1642_v14, %v4072_v63 }
0x175c   : > { %3366 = vtanh.f32 %v1644_v15 }
0x1769   : > { %v3367_v16 = vpop.eup %3366 }
0x176a   : > { %1648 = vrot.lane.b32.xlu1 %v3367_v16, %s3603_s19 }
0x17dc   : > { %v1649_v17 = vpop.permute.xlu1 %1648 }
0x17dd   : > { %v1651_v19 = vmul.f32 %v1649_v17, %v1646_v33 }
0x17df   : > { %v4078_v20 = vadd.f32 %v1653_v18, %v1651_v19  ;;  %v4127_v18 = vld [vmem:[#allocation10 + $0x18] sm:$0xff]  ;;  %v4133_v19 = vld [vmem:[#allocation10 + $0x10] sm:$0xff] }
0x17e1   : > { %1670 = vrot.lane.b32.xlu0 %v4078_v20, %s3603_s19  ;;  %v1773_v48 = vrot.slane %v4078_v20, 6 }
0x1853   : > { %v1671_v21 = vpop.permute.xlu0 %1670 }
0x1854   : > { %3125 = vmatmul.mubr.msk.f32.vlgmr.msra.gmra.mxu0 %vm564_vm1, %v1671_v21  ;;  %v4137_v21 = vld [vmem:[#allocation10 + $0x8] sm:$0xff] }
0x1855   : > { %3139 = vmatpush3.msra.mxu0 %v3829_v1  ;;  %3146 = vmatprep.mubr.msk.f32.mxu0 %vm3601_vm0, %v3600_v0 }
0x1856   : > { %3140 = vmatprep.subr.mxu0 %v3600_v0 }
0x1857   : > { %3141 = vmatpush3.msra.mxu0 %v3832_v3 }
0x1858   : > { %3142 = vmatprep.subr.mxu0 %v3600_v0 }
0x1859   : > { %3143 = vmatpush3.msra.mxu0 %v3835_v5 }
0x185a   : > { %3144 = vmatprep.subr.mxu0 %v3600_v0 }
0x185b   : > { %3145 = vmatpush3.msra.mxu0 %v3839_v7 }
0x185c   : > { %3160 = vmatprep.subr.mxu0 %v3600_v0 }
0x1914   : > { %v1740_v22 = vpop.f32.mrf.mxu0 }
0x1915   : > { %v1754_v23 = vadd.f32 %v1740_v22, %v3871_v24  ;;  %v1745_v29 = vrot.slane %v1740_v22, 6  ;;  %v4141_v22 = vld [vmem:[#allocation10] sm:$0xff] }
0x1916   : > { %v3126_v25 = vpop.f32.mrf.mxu0 }
0x1917   : > { %v1756_v27 = vrot.slane %v1754_v23, 6  ;;  %v1747_v30 = vadd.f32 %v1745_v29, %v4072_v63 }
0x1919   : > { %1757 = vrot.lane.b32.xlu1 %v1756_v27, %s3602_s28  ;;  %v2887_v34 = vmul.f32 -1.442695, %v1747_v30 }
0x191b   : > { %3368 = vpow2.f32 %v2887_v34 }
0x1928   : > { %v3369_v38 = vpop.eup %3368 }
0x1929   : > { %v1751_v39 = vadd.f32 1.0, %v3369_v38 }
0x192b   : > { %3370 = vrcp.f32 %v1751_v39 }
0x1938   : > { %v3371_v40 = vpop.eup %3370 }
0x1939   : > { %v1767_v46 = vsub.f32 1.0, %v3371_v40  ;;  %v1775_v51 = vmul.f32 %v3371_v40, %v1773_v48 }
0x198b   : > { %v1758_v41 = vpop.permute.xlu1 %1757 }
0x198c   : > { %v1760_v42 = vmul.f32 %v3371_v40, %v1758_v41 }
0x198e   : > { %1762 = vrot.lane.b32.xlu0 %v1760_v42, %s3602_s28 }
0x1a00   : > { %v1763_v43 = vpop.permute.xlu0 %1762 }
0x1a01   : > { %v1765_v44 = vadd.f32 %v1763_v43, %v4072_v63 }
0x1a03   : > { %3372 = vtanh.f32 %v1765_v44 }
0x1a10   : > { %v3373_v45 = vpop.eup %3372 }
0x1a11   : > { %1769 = vrot.lane.b32.xlu1 %v3373_v45, %s3603_s19 }
0x1a83   : > { %v1770_v49 = vpop.permute.xlu1 %1769 }
0x1a84   : > { %v1772_v50 = vmul.f32 %v1770_v49, %v1767_v46 }
0x1a86   : > { %v4100_v52 = vadd.f32 %v1775_v51, %v1772_v50 }
0x1a88   : > { %v1792_v53 = vrot.slane %v4100_v52, 2  ;;  %v1896_v12 = vrot.slane %v4100_v52, 6 }
0x1a8a   : > { %1793 = vrot.lane.b32.xlu0 %v1792_v53, %s3603_s19 }
0x1afc   : > { %v1794_v54 = vpop.permute.xlu0 %1793 }
0x1afd   : > { %3136 = vmatmul.mubr.msk.f32.vlgmr.msra.gmra.mxu1 %vm564_vm1, %v1794_v54 }
0x1afe   : > { %3150 = vmatpush3.msra.mxu1 %v3829_v1  ;;  %3157 = vmatprep.mubr.msk.f32.mxu1 %vm3601_vm0, %v3600_v0 }
0x1aff   : > { %3151 = vmatprep.subr.mxu1 %v3600_v0 }
0x1b00   : > { %3152 = vmatpush3.msra.mxu1 %v3832_v3 }
0x1b01   : > { %3153 = vmatprep.subr.mxu1 %v3600_v0 }
0x1b02   : > { %3154 = vmatpush3.msra.mxu1 %v3835_v5 }
0x1b03   : > { %3155 = vmatprep.subr.mxu1 %v3600_v0 }
0x1b04   : > { %3156 = vmatpush3.msra.mxu1 %v3839_v7 }
0x1b05   : > { %3171 = vmatprep.subr.mxu1 %v3600_v0 }
0x1bbd   : > { %v1863_v55 = vpop.f32.mrf.mxu1 }
0x1bbe   : > { %v1877_v1 = vadd.f32 %v1863_v55, %v3871_v24  ;;  %v1868_v61 = vrot.slane %v1863_v55, 4 }
0x1bbf   : > { %v3137_v56 = vpop.f32.mrf.mxu1 }
0x1bc0   : > { %v1879_v58 = vrot.slane %v1877_v1, 4  ;;  %v1870_v3 = vadd.f32 %v1868_v61, %v4072_v63  ;;  %v2936_v61 = vadd.f32 %v4000_v37, %v3998_v35 }
0x1bc2   : > { %1880 = vrot.lane.b32.xlu1 %v1879_v58, %s3602_s28  ;;  %v2889_v9 = vmul.f32 -1.442695, %v1870_v3  ;;  %v4171_v3 = vadd.f32 %v2936_v61, %v3878_v31 }
0x1bc4   : > { %3374 = vpow2.f32 %v2889_v9 }
0x1bd1   : > { %v3375_v62 = vpop.eup %3374 }
0x1bd2   : > { %v1874_v5 = vadd.f32 1.0, %v3375_v62 }
0x1bd4   : > { %3376 = vrcp.f32 %v1874_v5 }
0x1be1   : > { %v3377_v32 = vpop.eup %3376 }
0x1be2   : > { %v1890_v11 = vsub.f32 1.0, %v3377_v32  ;;  %v1898_v14 = vmul.f32 %v3377_v32, %v1896_v12 }
0x1c34   : > { %v1881_v2 = vpop.permute.xlu1 %1880 }
0x1c35   : > { %v1883_v7 = vmul.f32 %v3377_v32, %v1881_v2 }
0x1c37   : > { %1885 = vrot.lane.b32.xlu0 %v1883_v7, %s3602_s28 }
0x1ca9   : > { %v1886_v4 = vpop.permute.xlu0 %1885 }
0x1caa   : > { %v1888_v6 = vadd.f32 %v1886_v4, %v4072_v63 }
0x1cac   : > { %3378 = vtanh.f32 %v1888_v6 }
0x1cb9   : > { %v3379_v8 = vpop.eup %3378 }
0x1cba   : > { %1892 = vrot.lane.b32.xlu1 %v3379_v8, %s3603_s19 }
0x1d2c   : > { %v1893_v13 = vpop.permute.xlu1 %1892 }
0x1d2d   : > { %v1895_v15 = vmul.f32 %v1893_v13, %v1890_v11 }
0x1d2f   : > { %v4122_v16 = vadd.f32 %v1898_v14, %v1895_v15 }
0x1d31   : > { %v1915_v33 = vrot.slane %v4122_v16, 4  ;;  %v2019_v49 = vrot.slane %v4122_v16, 6 }
0x1d33   : > { %1916 = vrot.lane.b32.xlu0 %v1915_v33, %s3603_s19 }
0x1da5   : > { %v1917_v17 = vpop.permute.xlu0 %1916 }
0x1da6   : > { %3147 = vmatmul.mubr.msk.f32.vlgmr.msra.gmra.mxu0 %vm564_vm1, %v1917_v17 }
0x1da7   : > { %3161 = vmatpush3.msra.mxu0 %v4127_v18  ;;  %3168 = vmatprep.mubr.msk.f32.mxu0 %vm3601_vm0, %v3600_v0 }
0x1da8   : > { %3162 = vmatprep.subr.mxu0 %v3600_v0 }
0x1da9   : > { %3163 = vmatpush3.msra.mxu0 %v4133_v19 }
0x1daa   : > { %3164 = vmatprep.subr.mxu0 %v3600_v0 }
0x1dab   : > { %3165 = vmatpush3.msra.mxu0 %v4137_v21 }
0x1dac   : > { %3166 = vmatprep.subr.mxu0 %v3600_v0 }
0x1dad   : > { %3167 = vmatpush3.msra.mxu0 %v4141_v22 }
0x1dae   : > { %3182 = vmatprep.subr.mxu0 %v3600_v0 }
0x1e66   : > { %v1986_v23 = vpop.f32.mrf.mxu0 }
0x1e67   : > { %v2000_v25 = vadd.f32 %v1986_v23, %v3871_v24  ;;  %v1991_v30 = vrot.slane %v1986_v23, 2 }
0x1e68   : > { %v3148_v27 = vpop.f32.mrf.mxu0 }
0x1e69   : > { %v2002_v29 = vrot.slane %v2000_v25, 2  ;;  %v1993_v34 = vadd.f32 %v1991_v30, %v4072_v63 }
0x1e6b   : > { %2003 = vrot.lane.b32.xlu1 %v2002_v29, %s3602_s28  ;;  %v2891_v38 = vmul.f32 -1.442695, %v1993_v34 }
0x1e6d   : > { %3380 = vpow2.f32 %v2891_v38 }
0x1e7a   : > { %v3381_v39 = vpop.eup %3380 }
0x1e7b   : > { %v1997_v40 = vadd.f32 1.0, %v3381_v39 }
0x1e7d   : > { %3382 = vrcp.f32 %v1997_v40 }
0x1e8a   : > { %v3383_v41 = vpop.eup %3382 }
0x1e8b   : > { %v2013_v48 = vsub.f32 1.0, %v3383_v41  ;;  %v2021_v51 = vmul.f32 %v3383_v41, %v2019_v49 }
0x1edd   : > { %v2004_v42 = vpop.permute.xlu1 %2003 }
0x1ede   : > { %v2006_v43 = vmul.f32 %v3383_v41, %v2004_v42 }
0x1ee0   : > { %2008 = vrot.lane.b32.xlu0 %v2006_v43, %s3602_s28 }
0x1f52   : > { %v2009_v44 = vpop.permute.xlu0 %2008 }
0x1f53   : > { %v2011_v45 = vadd.f32 %v2009_v44, %v4072_v63 }
0x1f55   : > { %3384 = vtanh.f32 %v2011_v45 }
0x1f62   : > { %v3385_v46 = vpop.eup %3384 }
0x1f63   : > { %2015 = vrot.lane.b32.xlu1 %v3385_v46, %s3603_s19 }
0x1fd5   : > { %v2016_v50 = vpop.permute.xlu1 %2015 }
0x1fd6   : > { %v2018_v53 = vmul.f32 %v2016_v50, %v2013_v48 }
0x1fd8   : > { %v4152_v54 = vadd.f32 %v2021_v51, %v2018_v53 }
0x1fda   : > { %v2038_v55 = vrot.slane %v4152_v54, 6 }
0x1fdc   : > { %2039 = vrot.lane.b32.xlu0 %v2038_v55, %s3603_s19 }
0x204e   : > { %v2040_v1 = vpop.permute.xlu0 %2039 }
0x204f   : > { %3158 = vmatmul.mubr.msk.f32.vlgmr.msra.gmra.mxu1 %vm564_vm1, %v2040_v1 }
0x2050   : > { %3172 = vmatpush3.msra.mxu1 %v4127_v18  ;;  %3179 = vmatprep.mubr.msk.f32.mxu1 %vm3601_vm0, %v3600_v0 }
0x2051   : > { %3173 = vmatprep.subr.mxu1 %v3600_v0 }
0x2052   : > { %3174 = vmatpush3.msra.mxu1 %v4133_v19 }
0x2053   : > { %3175 = vmatprep.subr.mxu1 %v3600_v0 }
0x2054   : > { %3176 = vmatpush3.msra.mxu1 %v4137_v21 }
0x2055   : > { %3177 = vmatprep.subr.mxu1 %v3600_v0 }
0x2056   : > { %3178 = vmatpush3.msra.mxu1 %v4141_v22 }
0x210f   : > { %v2109_v63 = vpop.f32.mrf.mxu1 }
0x2110   : > { %v2120_v56 = vadd.f32 %v2109_v63, %v3871_v24  ;;  %v2113_v9 = vadd.f32 %v2109_v63, %v4171_v3 }
0x2111   : > { %v3159_v58 = vpop.f32.mrf.mxu1 }
0x2112   : > { %2122 = vrot.lane.b32.xlu1 %v2120_v56, %s3602_s28  ;;  %v2893_v62 = vmul.f32 -1.442695, %v2113_v9 }
0x2114   : > { %3386 = vpow2.f32 %v2893_v62 }
0x2121   : > { %v3387_v5 = vpop.eup %3386 }
0x2122   : > { %v2117_v32 = vadd.f32 1.0, %v3387_v5 }
0x2124   : > { %3388 = vrcp.f32 %v2117_v32 }
0x2131   : > { %v3389_v2 = vpop.eup %3388 }
0x2132   : > { %v2132_v31 = vsub.f32 1.0, %v3389_v2  ;;  %v2139_v11 = vmul.f32 %v3389_v2, %v2038_v55 }
0x2184   : > { %v2123_v7 = vpop.permute.xlu1 %2122 }
0x2185   : > { %v2125_v4 = vmul.f32 %v3389_v2, %v2123_v7 }
0x2187   : > { %2127 = vrot.lane.b32.xlu0 %v2125_v4, %s3602_s28 }
0x21f9   : > { %v2128_v6 = vpop.permute.xlu0 %2127 }
0x21fa   : > { %v2130_v8 = vadd.f32 %v2128_v6, %v4171_v3 }
0x21fc   : > { %3390 = vtanh.f32 %v2130_v8 }
0x2209   : > { %v3391_v35 = vpop.eup %3390 }
0x220a   : > { %2134 = vrot.lane.b32.xlu1 %v3391_v35, %s3603_s19 }
0x227c   : > { %v2135_v37 = vpop.permute.xlu1 %2134 }
0x227d   : > { %v2137_v12 = vmul.f32 %v2135_v37, %v2132_v31 }
0x227f   : > { %v4177_v13 = vadd.f32 %v2139_v11, %v2137_v12 }
0x2281   : > { %2156 = vrot.lane.b32.xlu0 %v4177_v13, %s3603_s19  ;;  %v2259_v40 = vrot.slane %v4177_v13, 6 }
0x22f3   : > { %v2157_v14 = vpop.permute.xlu0 %2156 }
0x22f4   : > { %3169 = vmatmul.mubr.msk.f32.vlgmr.msra.gmra.mxu0 %vm564_vm1, %v2157_v14 }
0x22f5   : > { %3183 = vmatpush3.msra.mxu0 %v4127_v18  ;;  %3190 = vmatprep.mubr.msk.f32.mxu0 %vm3601_vm0, %v3600_v0 }
0x22f6   : > { %3184 = vmatprep.subr.mxu0 %v3600_v0 }
0x22f7   : > { %3185 = vmatpush3.msra.mxu0 %v4133_v19 }
0x22f8   : > { %3186 = vmatprep.subr.mxu0 %v3600_v0 }
0x22f9   : > { %3187 = vmatpush3.msra.mxu0 %v4137_v21 }
0x22fa   : > { %3188 = vmatprep.subr.mxu0 %v3600_v0 }
0x22fb   : > { %3189 = vmatpush3.msra.mxu0 %v4141_v22 }
0x23b4   : > { %v2226_v15 = vpop.f32.mrf.mxu0 }
0x23b5   : > { %v2240_v33 = vadd.f32 %v2226_v15, %v3871_v24  ;;  %v2231_v23 = vrot.slane %v2226_v15, 6 }
0x23b6   : > { %v3170_v17 = vpop.f32.mrf.mxu0 }
0x23b7   : > { %v2242_v18 = vrot.slane %v2240_v33, 6  ;;  %v2233_v25 = vadd.f32 %v2231_v23, %v4171_v3  ;;  %v2869_v33 = vld [vmem:[%s4435_s6] ss:$0 sm:$0xff] }
0x23b9   : > { %2243 = vrot.lane.b32.xlu1 %v2242_v18, %s3602_s28  ;;  %v2895_v27 = vmul.f32 -1.442695, %v2233_v25 }
0x23bb   : > { %3392 = vpow2.f32 %v2895_v27 }
0x23c8   : > { %v3393_v19 = vpop.eup %3392 }
0x23c9   : > { %v2237_v29 = vadd.f32 1.0, %v3393_v19 }
0x23cb   : > { %3394 = vrcp.f32 %v2237_v29 }
0x23d8   : > { %v3395_v21 = vpop.eup %3394 }
0x23d9   : > { %v2253_v39 = vsub.f32 1.0, %v3395_v21  ;;  %v2261_v43 = vmul.f32 %v3395_v21, %v2259_v40 }
0x242b   : > { %v2244_v30 = vpop.permute.xlu1 %2243 }
0x242c   : > { %v2246_v0 = vmul.f32 %v3395_v21, %v2244_v30 }
0x242e   : > { %2248 = vrot.lane.b32.xlu0 %v2246_v0, %s3602_s28 }
0x24a0   : > { %v2249_v22 = vpop.permute.xlu0 %2248 }
0x24a1   : > { %v2251_v34 = vadd.f32 %v2249_v22, %v4171_v3 }
0x24a3   : > { %3396 = vtanh.f32 %v2251_v34 }
0x24b0   : > { %v3397_v38 = vpop.eup %3396 }
0x24b1   : > { %2255 = vrot.lane.b32.xlu1 %v3397_v38, %s3603_s19 }
0x2523   : > { %v2256_v41 = vpop.permute.xlu1 %2255 }
0x2524   : > { %v2258_v42 = vmul.f32 %v2256_v41, %v2253_v39 }
0x2526   : > { %v4198_v44 = vadd.f32 %v2261_v43, %v2258_v42 }
0x2528   : > { %v2278_v45 = vrot.slane %v4198_v44, 2  ;;  %v2382_v7 = vrot.slane %v4198_v44, 6 }
0x252a   : > { %2279 = vrot.lane.b32.xlu0 %v2278_v45, %s3603_s19 }
0x259c   : > { %v2280_v46 = vpop.permute.xlu0 %2279 }
0x259d   : > { %3180 = vmatmul.mubr.msk.f32.vlgmr.msra.gmra.mxu1 %vm564_vm1, %v2280_v46 }
0x265d   : > { %v2349_v48 = vpop.f32.mrf.mxu1 }
0x265e   : > { %v2363_v49 = vadd.f32 %v2349_v48, %v3871_v24  ;;  %v2354_v53 = vrot.slane %v2349_v48, 4 }
0x265f   : > { %v3181_v50 = vpop.f32.mrf.mxu1 }
0x2660   : > { %v2365_v51 = vrot.slane %v2363_v49, 4  ;;  %v2356_v55 = vadd.f32 %v2354_v53, %v4171_v3 }
0x2662   : > { %2366 = vrot.lane.b32.xlu1 %v2365_v51, %s3602_s28  ;;  %v2897_v1 = vmul.f32 -1.442695, %v2356_v55 }
0x2664   : > { %3398 = vpow2.f32 %v2897_v1 }
0x2671   : > { %v3399_v63 = vpop.eup %3398 }
0x2672   : > { %v2360_v56 = vadd.f32 1.0, %v3399_v63 }
0x2674   : > { %3400 = vrcp.f32 %v2360_v56 }
0x2681   : > { %v3401_v58 = vpop.eup %3400 }
0x2682   : > { %v2376_v2 = vsub.f32 1.0, %v3401_v58  ;;  %v2384_v6 = vmul.f32 %v3401_v58, %v2382_v7 }
0x26d4   : > { %v2367_v61 = vpop.permute.xlu1 %2366 }
0x26d5   : > { %v2369_v9 = vmul.f32 %v3401_v58, %v2367_v61 }
0x26d7   : > { %2371 = vrot.lane.b32.xlu0 %v2369_v9, %s3602_s28 }
0x2749   : > { %v2372_v62 = vpop.permute.xlu0 %2371 }
0x274a   : > { %v2374_v5 = vadd.f32 %v2372_v62, %v4171_v3 }
0x274c   : > { %3402 = vtanh.f32 %v2374_v5 }
0x2759   : > { %v3403_v32 = vpop.eup %3402 }
0x275a   : > { %2378 = vrot.lane.b32.xlu1 %v3403_v32, %s3603_s19 }
0x27cc   : > { %v2379_v4 = vpop.permute.xlu1 %2378 }
0x27cd   : > { %v2381_v8 = vmul.f32 %v2379_v4, %v2376_v2 }
0x27cf   : > { %v4210_v35 = vadd.f32 %v2384_v6, %v2381_v8 }
0x27d1   : > { %v2401_v31 = vrot.slane %v4210_v35, 4 }
0x27d3   : > { %2402 = vrot.lane.b32.xlu0 %v2401_v31, %s3603_s19 }
0x2845   : > { %v2403_v37 = vpop.permute.xlu0 %2402 }
0x2846   : > { %3191 = vmatmul.mubr.msk.f32.vlgmr.msra.gmra.mxu0 %vm564_vm1, %v2403_v37 }
0x2906   : > { %v2472_v11 = vpop.f32.mrf.mxu0 }
0x2907   : > { %v2486_v12 = vadd.f32 %v2472_v11, %v3871_v24  ;;  %v2477_v17 = vrot.slane %v2472_v11, 2 }
0x2908   : > { %v3192_v14 = vpop.f32.mrf.mxu0 }
0x2909   : > { %v2488_v15 = vrot.slane %v2486_v12, 2  ;;  %v2479_v18 = vadd.f32 %v2477_v17, %v4171_v3 }
0x290b   : > { %2489 = vrot.lane.b32.xlu1 %v2488_v15, %s3602_s28  ;;  %v2899_v23 = vmul.f32 -1.442695, %v2479_v18 }
0x290d   : > { %3404 = vpow2.f32 %v2899_v23 }
0x290f   : > { %678 = vrot.lane.b32.xlu1 %v2869_v33, %s3604_s23  ;;  %s3613_s23 = smov 7  }
0x291a   : > { %v3405_v25 = vpop.eup %3404 }
0x291b   : > { %v2483_v27 = vadd.f32 1.0, %v3405_v25  ;;  %v550_v25 = vlaneseq }
0x291d   : > { %3406 = vrcp.f32 %v2483_v27  ;;  %v4296_v27 = vand.u32 127, %v550_v25 }
0x291f   : > { %vm692_vm6 = vcmp.eq.s32.totalorder %v4296_v27, 11  ;;  %vm812_vm7 = vcmp.eq.s32.totalorder %v4296_v27, 12  ;;  %vm936_vm8 = vcmp.eq.s32.totalorder %v4296_v27, 13  ;;  %vm1060_vm9 = vcmp.eq.s32.totalorder %v4296_v27, 14 }
0x2920   : > { %vm1178_vm10 = vcmp.eq.s32.totalorder %v4296_v27, 15  ;;  %vm1300_vm11 = vcmp.eq.s32.totalorder %v4296_v27, 16  ;;  %vm1423_vm12 = vcmp.eq.s32.totalorder %v4296_v27, 17  ;;  %vm1546_vm13 = vcmp.eq.s32.totalorder %v4296_v27, 18 }
0x2921   : > { %vm1664_vm14 = vcmp.eq.s32.totalorder %v4296_v27, 19  ;;  %vm1786_vm15 = vcmp.eq.s32.totalorder %v4296_v27, 20  ;;  %vm1909_vm0 = vcmp.eq.s32.totalorder %v4296_v27, 21  ;;  %vm2032_vm1 = vcmp.eq.s32.totalorder %v4296_v27, 22 }
0x292a   : > { %v4221_v19 = vpop.eup %3406 }
0x292b   : > { %v2499_v9 = vsub.f32 1.0, %v4221_v19 }
0x297d   : > { %v2490_v24 = vpop.permute.xlu1 %2489 }
0x297e   : > { %v2492_v29 = vmul.f32 %v4221_v19, %v2490_v24 }
0x2980   : > { %2494 = vrot.lane.b32.xlu0 %v2492_v29, %s3602_s28  ;;  %s3607_s28 = smov 6  }
0x2981   : > { %v4225_v21 = vpop.permute.xlu1 %678 }
0x2982   : > { %v681_v30 = vmul.f32 %v4225_v21, %v3887_v47  ;;  %v802_v0 = vmul.f32 %v3909_v10, %v4225_v21  ;;  %v926_v22 = vmul.f32 %v3931_v36, %v4225_v21  ;;  %v1050_v34 = vmul.f32 %v3953_v60, %v4225_v21 }
0x2983   : > { %v1169_v47 = vmul.f32 %v3981_v28, %v4225_v21  ;;  %v1291_v10 = vmul.f32 %v4009_v59, %v4225_v21  ;;  %v1414_v36 = vmul.f32 %v4031_v26, %v4225_v21  ;;  %v1537_v60 = vmul.f32 %v4053_v57, %v4225_v21 }
0x2984   : > { %683 = vrot.lane.b32.xlu1 %v681_v30, %s3603_s19  ;;  %v1655_v28 = vmul.f32 %v4078_v20, %v4225_v21  ;;  %v1900_v59 = vmul.f32 %v4122_v16, %v4225_v21  ;;  %v1777_v63 = vmul.f32 %v4100_v52, %v4225_v21  ;;  %v2023_v56 = vmul.f32 %v4152_v54, %v4225_v21 }
0x2985   : > { %v2141_v58 = vmul.f32 %v4177_v13, %v4225_v21  ;;  %v2263_v61 = vmul.f32 %v4198_v44, %v4225_v21  ;;  %v2386_v52 = vmul.f32 %v4210_v35, %v4225_v21  ;;  %v2505_v54 = vrot.slane %v4210_v35, 6 }
0x2987   : > { %v2507_v5 = vmul.f32 %v4221_v19, %v2505_v54  ;;  %v4298_v19 = vstv %s549_s20  ;;  %s3614_s20 = smov 126  }
0x2988   : > { %804 = vrot.lane.b32.xlu1 %v802_v0, %s3603_s19 }
0x298c   : > { %928 = vrot.lane.b32.xlu1 %v926_v22, %s3603_s19 }
0x2990   : > { %1052 = vrot.lane.b32.xlu1 %v1050_v34, %s3603_s19 }
0x2994   : > { %1171 = vrot.lane.b32.xlu1 %v1169_v47, %s3603_s19 }
0x2998   : > { %1293 = vrot.lane.b32.xlu1 %v1291_v10, %s3603_s19 }
0x299c   : > { %1416 = vrot.lane.b32.xlu1 %v1414_v36, %s3603_s19 }
0x29a0   : > { %1539 = vrot.lane.b32.xlu1 %v1537_v60, %s3603_s19 }
0x29a4   : > { %1657 = vrot.lane.b32.xlu1 %v1655_v28, %s3603_s19 }
0x29a8   : > { %1902 = vrot.lane.b32.xlu1 %v1900_v59, %s3603_s19 }
0x29f2   : > { %v2495_v38 = vpop.permute.xlu0 %2494 }
0x29f3   : > { %v2497_v26 = vadd.f32 %v2495_v38, %v4171_v3 }
0x29f5   : > { %3408 = vtanh.f32 %v2497_v26 }
0x29f6   : > { %v684_v39 = vpop.permute.xlu1 %683 }
0x29f7   : > { %v687_v1 = vsel %vm686_vm4, %v684_v39, 0.0 }
0x29fa   : > { %v805_v40 = vpop.permute.xlu1 %804 }
0x29fb   : > { %v808_v57 = vsel %vm807_vm2, %v805_v40, 0.0 }
0x29fc   : > { %809 = vadd.xlane.f32.xlu1 %v808_v57 }
0x29fe   : > { %v929_v41 = vpop.permute.xlu1 %928 }
0x29ff   : > { %v932_v20 = vsel %vm931_vm3, %v929_v41, 0.0 }
0x2a00   : > { %933 = vadd.xlane.f32.xlu1 %v932_v20 }
0x2a02   : > { %v3409_v42 = vpop.eup %3408  ;;  %v1053_v43 = vpop.permute.xlu1 %1052 }
0x2a03   : > { %2501 = vrot.lane.b32.xlu0 %v3409_v42, %s3603_s19  ;;  %v1056_v44 = vsel %vm1055_vm5, %v1053_v43, 0.0 }
0x2a06   : > { %v1172_v16 = vpop.permute.xlu1 %1171 }
0x2a07   : > { %v1174_v3 = vsel %vm686_vm4, %v1172_v16, 0.0 }
0x2a08   : > { %1175 = vadd.xlane.f32.xlu1 %v1174_v3 }
0x2a0a   : > { %v1294_v45 = vpop.permute.xlu1 %1293 }
0x2a0b   : > { %v1296_v46 = vsel %vm807_vm2, %v1294_v45, 0.0 }
0x2a0c   : > { %1297 = vadd.xlane.f32.xlu1 %v1296_v46 }
0x2a0e   : > { %v1417_v48 = vpop.permute.xlu1 %1416 }
0x2a0f   : > { %v1419_v49 = vsel %vm931_vm3, %v1417_v48, 0.0 }
0x2a10   : > { %1420 = vadd.xlane.f32.xlu1 %v1419_v49 }
0x2a12   : > { %v1540_v50 = vpop.permute.xlu1 %1539 }
0x2a13   : > { %v1542_v51 = vsel %vm1055_vm5, %v1540_v50, 0.0 }
0x2a14   : > { %1543 = vadd.xlane.f32.xlu1 %v1542_v51 }
0x2a16   : > { %v1658_v53 = vpop.permute.xlu1 %1657 }
0x2a17   : > { %v1660_v55 = vsel %vm686_vm4, %v1658_v53, 0.0 }
0x2a18   : > { %1661 = vadd.xlane.f32.xlu1 %v1660_v55 }
0x2a1a   : > { %v1903_v8 = vpop.permute.xlu1 %1902 }
0x2a1b   : > { %v1905_v35 = vsel %vm931_vm3, %v1903_v8, 0.0 }
0x2a22   : > { %688 = vadd.xlane.f32.xlu0 %v687_v1 }
0x2a38   : > { %1779 = vrot.lane.b32.xlu0 %v1777_v63, %s3603_s19 }
0x2a3c   : > { %2025 = vrot.lane.b32.xlu0 %v2023_v56, %s3603_s19 }
0x2a40   : > { %2143 = vrot.lane.b32.xlu0 %v2141_v58, %s3603_s19 }
0x2a44   : > { %2265 = vrot.lane.b32.xlu0 %v2263_v61, %s3603_s19 }
0x2a48   : > { %2388 = vrot.lane.b32.xlu0 %v2386_v52, %s3603_s19 }
0x2a75   : > { %v2502_v62 = vpop.permute.xlu0 %2501 }
0x2a76   : > { %v2504_v13 = vmul.f32 %v2502_v62, %v2499_v9 }
0x2a78   : > { %v2508_v32 = vadd.f32 %v2507_v5, %v2504_v13 }
0x2a7a   : > { %v2509_v2 = vmul.f32 %v2508_v32, %v4225_v21 }
0x2a7c   : > { %2511 = vrot.lane.b32.xlu0 %v2509_v2, %s3603_s19  ;;  %s3610_s19 = smov 3  }
0x2a85   : > { %v810_v21 = vpop.xlane.xlu1 %809 }
0x2a86   : > { %v811_v0 = vadd.f32 %v810_v21, %v4298_v19 }
0x2a89   : > { %v934_v34 = vpop.xlane.xlu1 %933 }
0x2a8a   : > { %v935_v10 = vadd.f32 %v934_v34, %v4298_v19 }
0x2a91   : > { %v1176_v26 = vpop.xlane.xlu1 %1175 }
0x2a92   : > { %v1177_v40 = vadd.f32 %v1176_v26, %v4298_v19 }
0x2a95   : > { %v1298_v41 = vpop.xlane.xlu1 %1297 }
0x2a96   : > { %v1299_v42 = vadd.f32 %v1298_v41, %v4298_v19 }
0x2a99   : > { %v1421_v16 = vpop.xlane.xlu1 %1420 }
0x2a9a   : > { %v1422_v45 = vadd.f32 %v1421_v16, %v4298_v19 }
0x2a9b   : > { %1057 = vadd.xlane.f32.xlu0 %v1056_v44 }
0x2a9d   : > { %v1544_v48 = vpop.xlane.xlu1 %1543 }
0x2a9e   : > { %v1545_v50 = vadd.f32 %v1544_v48, %v4298_v19 }
0x2aa1   : > { %v1662_v53 = vpop.xlane.xlu1 %1661 }
0x2aa2   : > { %v1663_v1 = vadd.f32 %v1662_v53, %v4298_v19 }
0x2aab   : > { %v689_v7 = vpop.xlane.xlu0 %688 }
0x2aac   : > { %v691_v24 = vadd.f32 %v4298_v19, %v689_v7 }
0x2aae   : > { %v693_v29 = vsel %vm692_vm6, %v691_v24, 0.0  ;;  %vm2395_vm6 = vcmp.eq.s32.totalorder %v4296_v27, 25  ;;  %v2900_v24 = vadd.s32 4294967285, %v4296_v27 }
0x2aaf   : > { %v1780_v4 = vpop.permute.xlu0 %1779  ;;  %v814_v30 = vrot.slane %v693_v29, 6 }
0x2ab0   : > { %v1782_v6 = vsel %vm807_vm2, %v1780_v4, 0.0 }
0x2ab1   : > { %1783 = vadd.xlane.f32.xlu1 %v1782_v6  ;;  %v816_v22 = vsel %vm812_vm7, %v811_v0, %v814_v30  ;;  %vm2518_vm7 = vcmp.eq.s32.totalorder %v4296_v27, 26 }
0x2ab2   : > { %v938_v47 = vrot.slane %v816_v22, 6 }
0x2ab3   : > { %v2026_v31 = vpop.permute.xlu0 %2025 }
0x2ab4   : > { %v2028_v37 = vsel %vm1055_vm5, %v2026_v31, 0.0  ;;  %v940_v60 = vsel %vm936_vm8, %v935_v10, %v938_v47  ;;  %vm2524_vm8 = vcmp.ge.s32.totalorder %v2900_v24, 0 }
0x2ab5   : > { %1906 = vadd.xlane.f32.xlu1 %v1905_v35  ;;  %2029 = vadd.xlane.f32.xlu0 %v2028_v37  ;;  %v1062_v59 = vrot.slane %v940_v60, 6 }
0x2ab7   : > { %v2144_v11 = vpop.permute.xlu0 %2143 }
0x2ab8   : > { %v2146_v12 = vsel %vm686_vm4, %v2144_v11, 0.0  ;;  %v551_v11 = vshrl.u32 %v550_v25, 7 }
0x2ab9   : > { %2147 = vadd.xlane.f32.xlu1 %v2146_v12 }
0x2aba   : > { %vm552_vm4 = vcmp.eq.s32.totalorder %v551_v11, 0 }
0x2abb   : > { %v2266_v14 = vpop.permute.xlu0 %2265 }
0x2abc   : > { %v2268_v15 = vsel %vm807_vm2, %v2266_v14, 0.0  ;;  %vm2150_vm2 = vcmp.eq.s32.totalorder %v4296_v27, 23 }
0x2abd   : > { %2269 = vadd.xlane.f32.xlu0 %v2268_v15  ;;  %v555_v15 = vstv %s554_s9  ;;  %s3616_s9 = smov 124  }
0x2abf   : > { %v2389_v33 = vpop.permute.xlu0 %2388 }
0x2ac0   : > { %v2391_v17 = vsel %vm931_vm3, %v2389_v33, 0.0  ;;  %vm2272_vm3 = vcmp.eq.s32.totalorder %v4296_v27, 24 }
0x2ac1   : > { %2392 = vadd.xlane.f32.xlu1 %v2391_v17 }
0x2aee   : > { %v2512_v18 = vpop.permute.xlu0 %2511 }
0x2aef   : > { %v2514_v23 = vsel %vm1055_vm5, %v2512_v18, 0.0  ;;  %vm557_vm5 = vcmp.eq.s32.totalorder %v551_v11, 1  ;;  %v556_v18 = vsel %vm552_vm4, %v555_v15, 0 }
0x2af0   : > { %2515 = vadd.xlane.f32.xlu0 %v2514_v23  ;;  %v560_v23 = vstv %s559_s27  ;;  %s3618_s27 = smov 122  }
0x2af1   : > { %v4333_v29 = vsel %vm557_vm5, %v560_v23, %v556_v18 }
0x2b24   : > { %v1058_v36 = vpop.xlane.xlu0 %1057 }
0x2b25   : > { %v1059_v28 = vadd.f32 %v1058_v36, %v4298_v19 }
0x2b27   : > { %v1064_v38 = vsel %vm1060_vm9, %v1059_v28, %v1062_v59  ;;  %vm2525_vm9 = vcmp.lt.s32.totalorder %v2900_v24, %v4333_v29 }
0x2b28   : > { %v1180_v39 = vrot.slane %v1064_v38, 6 }
0x2b2a   : > { %v1182_v57 = vsel %vm1178_vm10, %v1177_v40, %v1180_v39  ;;  %vm4338_vm10 = vmand %vm2524_vm8, %vm2525_vm9 }
0x2b2b   : > { %v1302_v20 = vrot.slane %v1182_v57, 6 }
0x2b2d   : > { %v1304_v43 = vsel %vm1300_vm11, %v1299_v42, %v1302_v20 }
0x2b2e   : > { %v1425_v3 = vrot.slane %v1304_v43, 6 }
0x2b30   : > { %v1427_v46 = vsel %vm1423_vm12, %v1422_v45, %v1425_v3  ;;  %vm2680_vm12 = vcmp.lt.s32.totalorder %v4296_v27, %v4333_v29 }
0x2b31   : > { %v1548_v49 = vrot.slane %v1427_v46, 6 }
0x2b33   : > { %v1550_v51 = vsel %vm1546_vm13, %v1545_v50, %v1548_v49  ;;  %vm2701_vm13 = vcmask 123904  }
0x2b34   : > { %v1666_v55 = vrot.slane %v1550_v51, 6 }
0x2b36   : > { %v1668_v56 = vsel %vm1664_vm14, %v1663_v1, %v1666_v55  ;;  %vm2698_vm14 = vcmp.gt.s32.totalorder %v4333_v29, 1 }
0x2b37   : > { %v1788_v61 = vrot.slane %v1668_v56, 6 }
0x2b3a   : > { %v1784_v63 = vpop.xlane.xlu1 %1783 }
0x2b3b   : > { %v1785_v58 = vadd.f32 %v1784_v63, %v4298_v19 }
0x2b3d   : > { %v1790_v52 = vsel %vm1786_vm15, %v1785_v58, %v1788_v61  ;;  %vm2722_vm15 = vcmp.eq.s32.totalorder %v4296_v27, 0 }
0x2b3e   : > { %v1907_v9 = vpop.xlane.xlu1 %1906  ;;  %v1911_v54 = vrot.slane %v1790_v52, 6  ;;  %v2030_v13 = vpop.xlane.xlu0 %2029 }
0x2b3f   : > { %v1908_v62 = vadd.f32 %v1907_v9, %v4298_v19  ;;  %v2031_v2 = vadd.f32 %v2030_v13, %v4298_v19 }
0x2b41   : > { %v1913_v5 = vsel %vm1909_vm0, %v1908_v62, %v1911_v54  ;;  %vm2726_vm0 = vcmask 1041408  }
0x2b42   : > { %v2034_v32 = vrot.slane %v1913_v5, 6  ;;  %v2148_v7 = vpop.xlane.xlu1 %2147 }
0x2b43   : > { %v2149_v6 = vadd.f32 %v2148_v7, %v4298_v19 }
0x2b44   : > { %v2036_v44 = vsel %vm2032_vm1, %v2031_v2, %v2034_v32 }
0x2b45   : > { %v2152_v4 = vrot.slane %v2036_v44, 6 }
0x2b46   : > { %v2270_v31 = vpop.xlane.xlu0 %2269 }
0x2b47   : > { %v2154_v8 = vsel %vm2150_vm2, %v2149_v6, %v2152_v4  ;;  %v2271_v37 = vadd.f32 %v2270_v31, %v4298_v19 }
0x2b48   : > { %v2274_v35 = vrot.slane %v2154_v8, 6 }
0x2b4a   : > { %v2276_v12 = vsel %vm2272_vm3, %v2271_v37, %v2274_v35  ;;  %v2393_v14 = vpop.xlane.xlu1 %2392 }
0x2b4b   : > { %v2397_v33 = vrot.slane %v2276_v12, 6  ;;  %v2394_v17 = vadd.f32 %v2393_v14, %v4298_v19 }
0x2b4d   : > { %v2399_v21 = vsel %vm2395_vm6, %v2394_v17, %v2397_v33 }
0x2b4e   : > { %v2520_v30 = vrot.slane %v2399_v21, 6 }
0x2b79   : > { %v2516_v25 = vpop.xlane.xlu0 %2515 }
0x2b7a   : > { %v2517_v0 = vadd.f32 %v2516_v25, %v4298_v19 }
0x2b7c   : > { %v2522_v34 = vsel %vm2518_vm7, %v2517_v0, %v2520_v30 }
0x2b7d   : > { %v2527_v47 = vsub.f32 0.0, %v2522_v34  ;;  %v2531_v10 = vrot.slane %v2522_v34, 6 }
0x2b7f   : > { %v2528_v36 = vmul.f32 1.442695, %v2527_v47  ;;  %v4344_v60 = vsel %vm4338_vm10, %v2531_v10, inf }
0x2b80   : > { %2584 = vrot.lane.b32.xlu0 %v4344_v60, %s3605_s16  ;;  %2546 = vrot.lane.b32.xlu1 %v4344_v60, %s3606_s18  ;;  %s3619_s16 = smov 127   ;;  %s3620_s18 = smov 120  }
0x2b81   : > { %3410 = vpow2.f32 %v2528_v36 }
0x2b84   : > { %2608 = vrot.lane.b32.xlu0 %v4344_v60, %s3607_s28  ;;  %2560 = vrot.lane.b32.xlu1 %v4344_v60, %s3608_s10  ;;  %s3621_s28 = smov 125   ;;  %s3622_s10 = smov 118  }
0x2b88   : > { %2632 = vrot.lane.b32.xlu0 %v4344_v60, %s3609_s11  ;;  %2572 = vrot.lane.b32.xlu1 %v4344_v60, %s3610_s19  ;;  %s3623_s11 = smov 123   ;;  %s3624_s19 = smov 121  }
0x2b8c   : > { %2656 = vrot.lane.b32.xlu0 %v4344_v60, %s3611_s29  ;;  %2596 = vrot.lane.b32.xlu1 %v4344_v60, %s3612_s24  ;;  %s3625_s29 = smov 119   ;;  %s3626_s24 = smov 117  }
0x2b8e   : > { %v3411_v19 = vpop.eup %3410 }
0x2b8f   : > { %v2535_v28 = vrot.slane %v3411_v19, 6  ;;  %v2538_v38 = vmul.f32 %v3411_v19, %v2522_v34 }
0x2b90   : > { %2620 = vrot.lane.b32.xlu1 %v4344_v60, %s3613_s23  ;;  %s2844_s23 = sshll.u32 %s3812_s30, 3 }
0x2b91   : > { %v4357_v59 = vsel %vm4338_vm10, %v2535_v28, 0.0  ;;  %v2540_v26 = vrot.slane %v2538_v38, 6 }
0x2b92   : > { %2568 = vrot.lane.b32.xlu0 %v4357_v59, %s3614_s20 }
0x2b93   : > { %v2542_v39 = vsel %vm4338_vm10, %v2540_v26, 0.0 }
0x2b94   : > { %2644 = vrot.lane.b32.xlu1 %v4344_v60, %s3615_s26  ;;  %s333_s26 = scalar_lea.vmem [#allocation11], %s2844_s23 }
0x2b96   : > { %2592 = vrot.lane.b32.xlu0 %v4357_v59, %s3616_s9 }
0x2b98   : > { %2668 = vrot.lane.b32.xlu1 %v4344_v60, %s3617_s25 }
0x2b9a   : > { %2616 = vrot.lane.b32.xlu0 %v4357_v59, %s3618_s27 }
0x2b9c   : > { %2556 = vrot.lane.b32.xlu1 %v4357_v59, %s3619_s16 }
0x2b9e   : > { %2640 = vrot.lane.b32.xlu0 %v4357_v59, %s3620_s18 }
0x2ba0   : > { %2580 = vrot.lane.b32.xlu1 %v4357_v59, %s3621_s28 }
0x2ba2   : > { %2664 = vrot.lane.b32.xlu0 %v4357_v59, %s3622_s10 }
0x2ba4   : > { %2604 = vrot.lane.b32.xlu1 %v4357_v59, %s3623_s11 }
0x2ba6   : > { %2551 = vrot.lane.b32.xlu0 %v2542_v39, %s3619_s16 }
0x2ba8   : > { %2628 = vrot.lane.b32.xlu1 %v4357_v59, %s3624_s19 }
0x2baa   : > { %2576 = vrot.lane.b32.xlu0 %v2542_v39, %s3621_s28 }
0x2bac   : > { %2652 = vrot.lane.b32.xlu1 %v4357_v59, %s3625_s29 }
0x2bae   : > { %2600 = vrot.lane.b32.xlu0 %v2542_v39, %s3623_s11 }
0x2bb0   : > { %2564 = vrot.lane.b32.xlu1 %v2542_v39, %s3614_s20  ;;  %s2905_s20 = sshll.u32 %s3700_s14, 7  ;;  %s3627_s14 = smov [#allocation11]  }
0x2bb1   : > { %s4392_s16 = scalar_lea.hbm %s4437_s8, %s2905_s20 }
0x2bb2   : > { %2624 = vrot.lane.b32.xlu0 %v2542_v39, %s3624_s19 }
0x2bb4   : > { %2588 = vrot.lane.b32.xlu1 %v2542_v39, %s3616_s9  ;;  %s2743_s9 = sshll.u32 %s333_s26, 4  ;;  %s2744_s9 = int_to_ptr.vmem [resolvable:$true] %s2743_s9 }
0x2bb5   : > { %s3520_s28 = scalar_lea.vmem %s2744_s9, 128 }
0x2bb6   : > { %2648 = vrot.lane.b32.xlu0 %v2542_v39, %s3625_s29  ;;  %p3521_p2 = scmp.ne.s32.totalorder %s2744_s9, %s3520_s28 }
0x2bb8   : > { %2612 = vrot.lane.b32.xlu1 %v2542_v39, %s3618_s27  ;;  %p3522_p6 = pnand %p3521_p2, %p4459_p1 }
0x2bba   : > { %2672 = vrot.lane.b32.xlu0 %v2542_v39, %s3626_s24  ;;  %p3523_p7 = pneg %p3522_p6 }
0x2bbc   : > { %2636 = vrot.lane.b32.xlu1 %v2542_v39, %s3620_s18  ;;  %s2730_s18 = scalar_lea.sflag [#allocation7], %s3812_s30 }
0x2bc0   : > { %2660 = vrot.lane.b32.xlu1 %v2542_v39, %s3622_s10  ;;  %s3524_s10 = sshll.u32 %s3627_s14, 4  ;;  %s3525_s10 = int_to_ptr.vmem [resolvable:$false] %s3524_s10 }
0x2bc1   : > { %s3526_s11 = scalar_lea.vmem %s3525_s10, 256  ;;  %p3527_p11 = scmp.lt.s32.totalorder %s2744_s9, %s3525_s10 }
0x2bc2   : > { %p3528_p3 = scmp.lt.s32.totalorder %s3526_s11, %s3520_s28 }
0x2bc4   : > { %2676 = vrot.lane.b32.xlu1 %v4357_v59, %s3626_s24  ;;  %p3529_p8 = por %p3528_p3, %p3527_p11 }
0x2bc6   : > { %p3530_p0 = pnand %p3529_p8, %p3523_p7 }
0x2bf2   : > { %v2585_v40 = vpop.permute.xlu0 %2584  ;;  %v2547_v57 = vpop.permute.xlu1 %2546 }
0x2bf3   : > { %v2549_v42 = vmin.f32 %v4344_v60, %v2547_v57 }
0x2bf6   : > { %v2609_v41 = vpop.permute.xlu0 %2608  ;;  %v2561_v20 = vpop.permute.xlu1 %2560 }
0x2bf7   : > { %v2563_v43 = vmin.f32 %v2549_v42, %v2561_v20 }
0x2bfa   : > { %v2633_v16 = vpop.permute.xlu0 %2632  ;;  %v2573_v3 = vpop.permute.xlu1 %2572 }
0x2bfb   : > { %v2575_v45 = vmin.f32 %v2563_v43, %v2573_v3 }
0x2bfd   : > { %v2587_v46 = vmin.f32 %v2575_v45, %v2585_v40 }
0x2bfe   : > { %v2597_v48 = vpop.permute.xlu1 %2596  ;;  %v2657_v50 = vpop.permute.xlu0 %2656 }
0x2bff   : > { %v2599_v49 = vmin.f32 %v2587_v46, %v2597_v48 }
0x2c01   : > { %v2611_v51 = vmin.f32 %v2599_v49, %v2609_v41 }
0x2c02   : > { %v2621_v53 = vpop.permute.xlu1 %2620 }
0x2c03   : > { %v2623_v55 = vmin.f32 %v2611_v51, %v2621_v53 }
0x2c04   : > { %v2569_v1 = vpop.permute.xlu0 %2568 }
0x2c05   : > { %v2635_v63 = vmin.f32 %v2623_v55, %v2633_v16  ;;  %v2699_v55 = vsel %vm2698_vm14, %v4333_v29, 1 }
0x2c06   : > { %v2645_v56 = vpop.permute.xlu1 %2644 }
0x2c07   : > { %v2647_v58 = vmin.f32 %v2635_v63, %v2645_v56 }
0x2c08   : > { %v2593_v61 = vpop.permute.xlu0 %2592 }
0x2c09   : > { %v2659_v52 = vmin.f32 %v2647_v58, %v2657_v50 }
0x2c0a   : > { %v2669_v9 = vpop.permute.xlu1 %2668 }
0x2c0b   : > { %v2671_v54 = vmin.f32 %v2659_v52, %v2669_v9 }
0x2c0c   : > { %v2617_v62 = vpop.permute.xlu0 %2616 }
0x2c0d   : > { %2691 = vrot.lane.b32.xlu1 %v2671_v54, %s3626_s24 }
0x2c0e   : > { %v2557_v5 = vpop.permute.xlu1 %2556 }
0x2c0f   : > { %v2559_v13 = vadd.f32 %v2557_v5, %v4357_v59 }
0x2c10   : > { %v2641_v32 = vpop.permute.xlu0 %2640 }
0x2c11   : > { %v2571_v44 = vadd.f32 %v2569_v1, %v2559_v13  ;;  %v2700_v1 = vcvt.s32.f32 %v2699_v55 }
0x2c12   : > { %v2581_v2 = vpop.permute.xlu1 %2580 }
0x2c13   : > { %v2583_v6 = vadd.f32 %v2581_v2, %v2571_v44 }
0x2c14   : > { %v2665_v4 = vpop.permute.xlu0 %2664 }
0x2c15   : > { %v2595_v31 = vadd.f32 %v2593_v61, %v2583_v6 }
0x2c16   : > { %v2605_v7 = vpop.permute.xlu1 %2604 }
0x2c17   : > { %v2607_v11 = vadd.f32 %v2605_v7, %v2595_v31 }
0x2c18   : > { %v2552_v35 = vpop.permute.xlu0 %2551 }
0x2c19   : > { %v2554_v12 = vadd.f32 %v2552_v35, %v2542_v39  ;;  %v2619_v33 = vadd.f32 %v2617_v62, %v2607_v11 }
0x2c1a   : > { %v2629_v8 = vpop.permute.xlu1 %2628 }
0x2c1b   : > { %v2631_v24 = vadd.f32 %v2629_v8, %v2619_v33 }
0x2c1c   : > { %v2577_v17 = vpop.permute.xlu0 %2576 }
0x2c1d   : > { %v2643_v30 = vadd.f32 %v2641_v32, %v2631_v24 }
0x2c1e   : > { %v2653_v37 = vpop.permute.xlu1 %2652 }
0x2c1f   : > { %v2655_v47 = vadd.f32 %v2653_v37, %v2643_v30 }
0x2c20   : > { %v2601_v0 = vpop.permute.xlu0 %2600 }
0x2c21   : > { %v2667_v60 = vadd.f32 %v2665_v4, %v2655_v47 }
0x2c22   : > { %v2565_v14 = vpop.permute.xlu1 %2564 }
0x2c23   : > { %v2567_v15 = vadd.f32 %v2565_v14, %v2554_v12 }
0x2c24   : > { %v2625_v19 = vpop.permute.xlu0 %2624 }
0x2c25   : > { %v2579_v23 = vadd.f32 %v2577_v17, %v2567_v15 }
0x2c26   : > { %v2589_v18 = vpop.permute.xlu1 %2588 }
0x2c27   : > { %v2591_v25 = vadd.f32 %v2589_v18, %v2579_v23 }
0x2c28   : > { %v2649_v40 = vpop.permute.xlu0 %2648 }
0x2c29   : > { %v2603_v34 = vadd.f32 %v2601_v0, %v2591_v25 }
0x2c2a   : > { %v2613_v21 = vpop.permute.xlu1 %2612 }
0x2c2b   : > { %v2615_v36 = vadd.f32 %v2613_v21, %v2603_v34 }
0x2c2c   : > { %v2673_v20 = vpop.permute.xlu0 %2672 }
0x2c2d   : > { %v2627_v59 = vadd.f32 %v2625_v19, %v2615_v36 }
0x2c2e   : > { %v2637_v22 = vpop.permute.xlu1 %2636 }
0x2c2f   : > { %v2639_v39 = vadd.f32 %v2637_v22, %v2627_v59 }
0x2c31   : > { %v2651_v57 = vadd.f32 %v2649_v40, %v2639_v39 }
0x2c32   : > { %v2661_v10 = vpop.permute.xlu1 %2660 }
0x2c33   : > { %v2663_v41 = vadd.f32 %v2661_v10, %v2651_v57 }
0x2c35   : > { %v2675_v42 = vadd.f32 %v2673_v20, %v2663_v41 }
0x2c36   : > { %v2677_v28 = vpop.permute.xlu1 %2676 }
0x2c37   : > { %v2679_v38 = vadd.f32 %v2677_v28, %v2667_v60 }
0x2c39   : > { %vm2681_vm11 = vcmp.gt.f32.partialorder %v2679_v38, 0.0 }
0x2c3a   : > { %v2682_v26 = vsel %vm2681_vm11, %v2679_v38, 1.0 }
0x2c3b   : > { %3412 = vrcp.f32 %v2682_v26 }
0x2c3c   : > { %3414 = vrcp.f32 %v2700_v1 }
0x2c48   : > { %v3413_v43 = vpop.eup %3412 }
0x2c49   : > { %v2684_v16 = vmul.f32 %v3413_v43, %v2675_v42  ;;  %v3415_v63 = vpop.eup %3414 }
0x2c4b   : > { %2686 = vrot.lane.b32.xlu0 %v2684_v16, %s3626_s24 }
0x2c7f   : > { %v2692_v3 = vpop.permute.xlu1 %2691 }
0x2c80   : > { %v2694_v45 = vsel %vm2680_vm12, %v2692_v3, 0.0 }
0x2c81   : > { %v2696_v49 = vmul.f32 0.5, %v2694_v45 }
0x2cbd   : > { %v2687_v46 = vpop.permute.xlu0 %2686 }
0x2cbe   : > { %v2689_v48 = vsel %vm2680_vm12, %v2687_v46, 0.0 }
0x2cbf   : > { %v2695_v50 = vmul.f32 0.5, %v2689_v48 }
0x2cc1   : > { %v2697_v51 = vadd.f32 %v2696_v49, %v2695_v50 }
0x2cc3   : > { %v2702_v53 = vsel %vm2701_vm13, %v2697_v51, 0.0 }
0x2cc4   : > { %2703 = vadd.xlane.f32.xlu0 %v2702_v53 }
0x2d4d   : > { %v2704_v56 = vpop.xlane.xlu0 %2703 }
0x2d4e   : > { %v2706_v58 = vmul.f32 %v3415_v63, %v2704_v56 }
0x2d50   : > { %v2901_v61 = vmul.f32 -1.442695, %v2706_v58 }
0x2d52   : > { %3416 = vpow2.f32 %v2901_v61 }
0x2d5f   : > { %v3417_v52 = vpop.eup %3416 }
0x2d60   : > { %v2710_v9 = vadd.f32 1.0, %v3417_v52 }
0x2d62   : > { %3418 = vrcp.f32 %v2710_v9 }
0x2d6f   : > { %v3419_v54 = vpop.eup %3418 }
0x2d70   : > { %v2713_v62 = vmul.f32 3.4641016, %v3419_v54 }
0x2d72   : > { %v2902_v5 = vadd.f32 -1.7320508, %v2713_v62 }
0x2d74   : > { %v2903_v13 = vmul.f32 -1.442695, %v2902_v5 }
0x2d76   : > { %3420 = vpow2.f32 %v2903_v13 }
0x2d83   : > { %v3421_v32 = vpop.eup %3420 }
0x2d84   : > { %v2718_v29 = vadd.f32 1.0, %v3421_v32 }
0x2d86   : > { %3422 = vrcp.f32 %v2718_v29 }
0x2d93   : > { %v3423_v2 = vpop.eup %3422 }
0x2d94   : > { %v2725_v44 = vsel %vm2722_vm15, %v3419_v54, %v3423_v2 }
0x2d95   : > { %v2727_v7 = vsel %vm2726_vm0, %v2725_v44, 0.0 }
0x2d96   : > { %2728 = vst [vmem:[%s333_s26] sm:$0xff] %v2727_v7 }
0x2d97   : > { %3533 = shalt.err (!%p3530_p0)
}
0x2d98   : > { %s3534_s19 = scalar_lea.hbm %s4392_s16, 128  ;;  %s3538_s24 = scalar_lea.hbm %s4437_s8, 256 }
0x2d99   : > { %p3535_p4 = scmp.ne.s32.totalorder %s4392_s16, %s3534_s19  ;;  %p3539_p9 = scmp.lt.s32.totalorder %s4392_s16, %s4437_s8 }
0x2d9a   : > { %p3540_p13 = scmp.lt.s32.totalorder %s3538_s24, %s3534_s19 }
0x2d9b   : > { %p3536_p10 = pnand %p3535_p4, %p4459_p1 }
0x2d9c   : > { %p3541_p12 = por %p3540_p13, %p3539_p9 }
0x2d9d   : > { %p3537_p5 = pneg %p3536_p10 }
0x2d9f   : > { %p3542_p2 = pnand %p3541_p12, %p3537_p5 }
0x2da1   : > { %3545 = shalt.err (!%p3542_p2)
}
0x2da2   : > { %3203 = dma.vmem_to_hbm [thread:$0]  (%p4459_p1), %s2744_s9, 128, %s4392_s16, %s2730_s18  }
0x2da3 PF: > { %s2755_s26 = sand.u32 1, %s3578_s0   ;;  %p4460_p6 = scmp.ne.s32.totalorder %s4445_s17, 0 }
0x2da4   : > { %p4461_p7 = scmp.ge.s32.totalorder %s3590_s13, 2  ;;  %s2756_s25 = scalar_lea.sflag [#allocation7], %s2755_s26 }
0x2da6   : > { %p3217_p11 = pnand %p4461_p7, %p4460_p6 }
0x2da8   : > { %p3218_p3 = pneg %p3217_p11 }
0x2daa   : > { %3573 = dma.done.wait (%p3218_p3), %s2756_s25, 128  }
0x2dab   : > { %3575 = vsyncadd (%p3218_p3), %s2756_s25, 4294967168  ;;  %p29_p8 = scmp.ge.s32.totalorder %s3754_s15, 4   ;;  %s4462_s0 = smov %s3582_s7 }
0x2dac   : > { %s4463_s7 = smov %s3586_s12  ;;  %s4464_s12 = smov %s3763_s22 }
0x2dad   : > { %s4465_s13 = smov %s3754_s15  ;;  %31 = sbr.rel (!%p29_p8) target bundleno = 21 (0x15), region = 101 }
0x2db2   :  { %2761 = vsyncpa [#allocation6], 1 }
0x2db3   :  { %2763 = vsyncpa [#allocation6 + $0x1], 1 }
0x2db4   :  { %2764 = vsyncpa [#allocation9], 1 }
0x2db5   :  { %2765 = vsyncpa [#allocation7], 1 }
0x2db6   :  { %2767 = vsyncpa [#allocation7 + $0x1], 1 }

</bundles_post_ra>
